<compile_context>
chip_gen: v7x
topology: tpu7x:2x2x1
jax: 0.10.0
libtpu: 0.0.40
codegen_flags: <defaults>
</compile_context>

<pallas_src>
import functools
import math

import jax
import jax.numpy as jnp
from jax.experimental import pallas as pl
from jax.experimental.pallas import tpu as pltpu


def _round_up(v, m):
    return ((v + m - 1) // m) * m


# ----------------------------------------------------------------------------
# Fused CausalBlock kernel
# ----------------------------------------------------------------------------
def _causal_block_kernel(x_ref, w1_ref, b1_ref, w2_ref, b2_ref, w3_ref, b3_ref,
                         *rest, k, d, tl, off, has_proj):
    # x_ref      : (tl, Cin_p)      current sequence tile of the block input
    # w{1,2,3}   : (k*C, C) im2col weights, b{1,2,3}: (1, C)
    # rest       : [wr_ref (Cin_p, Cout_p), br_ref (1, Cout_p)]  (if has_proj)
    #              + o_ref (tl, Cout_p)
    #              + scratch x_buf / h1_buf / h2_buf  of shape (off + tl, C)
    # off = round_up(pad, 8) with pad = (k-1)*d; rows [off-pad, off) of each
    # scratch buffer hold the causal halo (zeros for the first tile, the last
    # `pad` rows of the previous tile afterwards).
    if has_proj:
        wr_ref, br_ref, o_ref, x_buf, h1_buf, h2_buf = rest
    else:
        o_ref, x_buf, h1_buf, h2_buf = rest

    pad = (k - 1) * d
    lt = pl.program_id(1)

    if off > 0:
        @pl.when(lt == 0)
        def _init_halo():
            x_buf[0:off, :] = jnp.zeros((off, x_buf.shape[1]), x_buf.dtype)
            h1_buf[0:off, :] = jnp.zeros((off, h1_buf.shape[1]), h1_buf.dtype)
            h2_buf[0:off, :] = jnp.zeros((off, h2_buf.shape[1]), h2_buf.dtype)

    if pad > 0:
        @pl.when(lt > 0)
        def _carry_halo():
            # last `pad` rows of the previous tile -> halo region
            x_buf[off - pad:off, :] = x_buf[off - pad + tl:off + tl, :]
            h1_buf[off - pad:off, :] = h1_buf[off - pad + tl:off + tl, :]
            h2_buf[off - pad:off, :] = h2_buf[off - pad + tl:off + tl, :]

    # Stage current input tile (8-aligned store offset).
    x_buf[off:off + tl, :] = x_ref[...].astype(x_buf.dtype)

    def conv(buf, w_ref, b_ref):
        # im2col: gather the k dilated taps along lanes -> (tl, k*Cin)
        taps = [buf[off - pad + j * d: off - pad + j * d + tl, :]
                for j in range(k)]
        im2col = taps[0] if k == 1 else jnp.concatenate(taps, axis=-1)
        return jnp.dot(im2col, w_ref[...],
                       preferred_element_type=jnp.float32) + b_ref[...]

    h1_buf[off:off + tl, :] = jnp.maximum(conv(x_buf, w1_ref, b1_ref), 0.0)
    h2_buf[off:off + tl, :] = jnp.maximum(conv(h1_buf, w2_ref, b2_ref), 0.0)
    y = conv(h2_buf, w3_ref, b3_ref)

    if has_proj:
        res = jnp.dot(x_buf[off:off + tl, :], wr_ref[...],
                      preferred_element_type=jnp.float32) + br_ref[...]
    else:
        res = x_buf[off:off + tl, :]

    o_ref[...] = jnp.maximum(y + res, 0.0).astype(o_ref.dtype)


def _choose_seq_tile(L):
    # Whole-L tile for short sequences; bounded tile for long ones (keeps the
    # f32 VMEM scratch + double-buffered blocks well under the 32 MiB default).
    if L <= 2048:
        return L
    for tl in (2048, 1024, 512, 256, 128):
        if L % tl == 0:
            return tl
    return L


def causal_block_forward(x_p, p):
    """Fused CausalBlock forward. x_p: (B, L, Cin_p) channel-padded, NLC."""
    B, L, cin_p = x_p.shape
    k, d, cout_p = p["k"], p["d"], p["cout_p"]
    pad = (k - 1) * d
    off = _round_up(pad, 8)
    tl = _choose_seq_tile(L)
    n_lt = L // tl

    has_proj = "wr" in p
    args = [x_p, p["w1"], p["b1"], p["w2"], p["b2"], p["w3"], p["b3"]]
    in_specs = [
        pl.BlockSpec((None, tl, cin_p), lambda b, t: (b, t, 0)),
        pl.BlockSpec((k * cin_p, cout_p), lambda b, t: (0, 0)),
        pl.BlockSpec((1, cout_p), lambda b, t: (0, 0)),
        pl.BlockSpec((k * cout_p, cout_p), lambda b, t: (0, 0)),
        pl.BlockSpec((1, cout_p), lambda b, t: (0, 0)),
        pl.BlockSpec((k * cout_p, cout_p), lambda b, t: (0, 0)),
        pl.BlockSpec((1, cout_p), lambda b, t: (0, 0)),
    ]
    if has_proj:
        args += [p["wr"], p["br"]]
        in_specs += [pl.BlockSpec((cin_p, cout_p), lambda b, t: (0, 0)),
                     pl.BlockSpec((1, cout_p), lambda b, t: (0, 0))]

    kernel = functools.partial(_causal_block_kernel, k=k, d=d, tl=tl, off=off,
                               has_proj=has_proj)

    return pl.pallas_call(
        kernel,
        out_shape=jax.ShapeDtypeStruct((B, L, cout_p), x_p.dtype),
        grid=(B, n_lt),
        in_specs=in_specs,
        out_specs=pl.BlockSpec((None, tl, cout_p), lambda b, t: (b, t, 0)),
        scratch_shapes=[
            pltpu.VMEM((off + tl, cin_p), jnp.float32),   # x (with halo)
            pltpu.VMEM((off + tl, cout_p), jnp.float32),  # h1
            pltpu.VMEM((off + tl, cout_p), jnp.float32),  # h2
        ],
        compiler_params=pltpu.CompilerParams(
            dimension_semantics=("parallel", "arbitrary")),
    )(*args)


# ----------------------------------------------------------------------------
# Parameter init (deterministic, mirrors init_weights: kaiming-uniform W, 0 b)
# ----------------------------------------------------------------------------
def _kaiming_uniform(key, cout, cin, k):
    fan_in = cin * k
    gain = math.sqrt(2.0)                      # nonlinearity='relu'
    bound = gain * math.sqrt(3.0 / fan_in)
    # Torch Conv1d weight layout: (Cout, Cin, k)
    return jax.random.uniform(key, (cout, cin, k), jnp.float32, -bound, bound)


def init_causal_block(key, cin, cout, k):
    keys = jax.random.split(key, 4)
    params = {
        "conv1": {"w": _kaiming_uniform(keys[0], cout, cin, k),
                  "b": jnp.zeros((cout,), jnp.float32)},
        "conv2": {"w": _kaiming_uniform(keys[1], cout, cout, k),
                  "b": jnp.zeros((cout,), jnp.float32)},
        "conv3": {"w": _kaiming_uniform(keys[2], cout, cout, k),
                  "b": jnp.zeros((cout,), jnp.float32)},
    }
    if cin != cout:  # 1x1 residual projection (nn.Conv1d(in, out, 1))
        params["res"] = {"w": _kaiming_uniform(keys[3], cout, cin, 1),
                         "b": jnp.zeros((cout,), jnp.float32)}
    return params


def init_causal_net(key, input_size, output_size, out_channels, layers,
                    kernel_size):
    assert layers >= 1
    keys = jax.random.split(key, layers + 2)
    blocks, dilations = [], []
    blocks.append(init_causal_block(keys[0], input_size, out_channels,
                                    kernel_size))
    dilations.append(1)
    for i in range(layers):
        blocks.append(init_causal_block(keys[i + 1], out_channels,
                                        out_channels, kernel_size))
        dilations.append(2 ** (i + 1))
    # Last block dilation = i + 2**2 with i = layers - 1 (as in the PyTorch code)
    blocks.append(init_causal_block(keys[-1], out_channels, output_size,
                                    kernel_size))
    dilations.append((layers - 1) + 2 ** 2)
    return blocks, dilations


# ----------------------------------------------------------------------------
# One-time parameter preprocessing: layout + lane padding + im2col reshape
# ----------------------------------------------------------------------------
def _prep_conv(w_torch, b, cin_p, cout_p):
    cout, cin, k = w_torch.shape
    w = jnp.transpose(w_torch, (2, 1, 0))                    # (k, Cin, Cout)
    w = jnp.pad(w, ((0, 0), (0, cin_p - cin), (0, cout_p - cout)))
    w = w.reshape(k * cin_p, cout_p)                          # im2col layout
    b = jnp.pad(b, (0, cout_p - cout)).reshape(1, cout_p)
    return w, b


def prep_causal_net(blocks, dilations):
    prepped = []
    for params, d in zip(blocks, dilations):
        cout, cin, k = params["conv1"]["w"].shape
        cin_p = _round_up(cin, 128)
        cout_p = _round_up(cout, 128)
        p = {"k": int(k), "d": int(d), "cin_p": cin_p, "cout_p": cout_p}
        p["w1"], p["b1"] = _prep_conv(params["conv1"]["w"],
                                      params["conv1"]["b"], cin_p, cout_p)
        p["w2"], p["b2"] = _prep_conv(params["conv2"]["w"],
                                      params["conv2"]["b"], cout_p, cout_p)
        p["w3"], p["b3"] = _prep_conv(params["conv3"]["w"],
                                      params["conv3"]["b"], cout_p, cout_p)
        if "res" in params:
            p["wr"], p["br"] = _prep_conv(params["res"]["w"],
                                          params["res"]["b"], cin_p, cout_p)
        prepped.append(p)
    return prepped


# ----------------------------------------------------------------------------
# Forward (NCL in / NCL out, like PyTorch)
# ----------------------------------------------------------------------------
def causal_net_forward(prepped, x_ncl, output_size):
    B, C, L = x_ncl.shape
    x = jnp.transpose(x_ncl, (0, 2, 1))                       # (B, L, C)
    cin_p = prepped[0]["cin_p"]
    if cin_p > C:
        x = jnp.pad(x, ((0, 0), (0, 0), (0, cin_p - C)))      # lane padding
    for p in prepped:
        x = causal_block_forward(x, p)
    x = x[:, :, :output_size]
    return jnp.transpose(x, (0, 2, 1))                        # (B, C_out, L)


# ----------------------------------------------------------------------------
# Pure-JAX reference (for correctness verification only)
# ----------------------------------------------------------------------------
def _ref_causal_conv(x_nlc, w_torch, b, dilation):
    k = w_torch.shape[2]
    L = x_nlc.shape[1]
    pad = (k - 1) * dilation
    xp = jnp.pad(x_nlc, ((0, 0), (pad, 0), (0, 0)))
    out = jnp.zeros(x_nlc.shape[:2] + (w_torch.shape[0],), jnp.float32)
    for j in range(k):
        xj = xp[:, j * dilation: j * dilation + L, :]
        out = out + jnp.einsum("blc,dc->bld", xj, w_torch[:, :, j])
    return out + b


def _ref_block(params, x, d):
    h = jax.nn.relu(_ref_causal_conv(x, params["conv1"]["w"],
                                     params["conv1"]["b"], d))
    h = jax.nn.relu(_ref_causal_conv(h, params["conv2"]["w"],
                                     params["conv2"]["b"], d))
    h = _ref_causal_conv(h, params["conv3"]["w"], params["conv3"]["b"], d)
    if "res" in params:
        r = _ref_causal_conv(x, params["res"]["w"], params["res"]["b"], 1)
    else:
        r = x
    return jax.nn.relu(h + r)


def _ref_net(blocks, dilations, x_ncl):
    x = jnp.transpose(x_ncl, (0, 2, 1))
    for p, d in zip(blocks, dilations):
        x = _ref_block(p, x, d)
    return jnp.transpose(x, (0, 2, 1))


# ----------------------------------------------------------------------------
if __name__ == "__main__":
    INPUT_SIZE = 4      # in channels
    OUTPUT_SIZE = 8     # out channels of the final block
    OUT_CHANNELS = 32   # hidden channels
    LAYERS = 2
    KERNEL_SIZE = 3
    BATCH = 2
    SEQ = 16

    root = jax.random.PRNGKey(0)
    k_params, k_data = jax.random.split(root)

    blocks, dilations = init_causal_net(
        k_params, INPUT_SIZE, OUTPUT_SIZE, OUT_CHANNELS, LAYERS, KERNEL_SIZE)
    prepped = prep_causal_net(blocks, dilations)

    x = jax.random.normal(k_data, (BATCH, INPUT_SIZE, SEQ), jnp.float32)

    fwd = jax.jit(lambda inp: causal_net_forward(prepped, inp, OUTPUT_SIZE))
    out = fwd(x)
    jax.block_until_ready(out)

    assert out.shape == (BATCH, OUTPUT_SIZE, SEQ), out.shape
    assert bool(jnp.all(jnp.isfinite(out)))

    ref = _ref_net(blocks, dilations, x)
    err = float(jnp.max(jnp.abs(out - ref)))
    assert err < 5e-2, f"max abs error vs reference: {err}"

    print("KERNEL_OK")
</pallas_src>

<mosaic_0001>
module attributes {stable_mosaic.version = 11 : i64} {
  func.func @_causal_block_kernel(%arg0: i32, %arg1: i32, %arg2: memref<1x16x128xf32, #tpu.memory_space<vmem>>, %arg3: memref<384x128xf32, #tpu.memory_space<vmem>>, %arg4: memref<1x128xf32, #tpu.memory_space<vmem>>, %arg5: memref<384x128xf32, #tpu.memory_space<vmem>>, %arg6: memref<1x128xf32, #tpu.memory_space<vmem>>, %arg7: memref<384x128xf32, #tpu.memory_space<vmem>>, %arg8: memref<1x128xf32, #tpu.memory_space<vmem>>, %arg9: memref<128x128xf32, #tpu.memory_space<vmem>>, %arg10: memref<1x128xf32, #tpu.memory_space<vmem>>, %arg11: memref<1x16x128xf32, #tpu.memory_space<vmem>>, %arg12: memref<24x128xf32, #tpu.memory_space<vmem>>, %arg13: memref<24x128xf32, #tpu.memory_space<vmem>>, %arg14: memref<24x128xf32, #tpu.memory_space<vmem>>) attributes {dimension_semantics = [#tpu.dimension_semantics<parallel>, #tpu.dimension_semantics<arbitrary>], iteration_bounds = array<i64: 2, 1>, scalar_prefetch = 0 : i64, scratch_operands = 3 : i64, tpu.core_type = #tpu.core_type<tc>, window_params = [{transform_indices = @transform_0, window_bounds = array<i64: 1, 16, 128>}, {pipeline_mode = #tpu.pipeline_mode<synchronous>, transform_indices = @transform_1, window_bounds = array<i64: 384, 128>}, {pipeline_mode = #tpu.pipeline_mode<synchronous>, transform_indices = @transform_2, window_bounds = array<i64: 1, 128>}, {pipeline_mode = #tpu.pipeline_mode<synchronous>, transform_indices = @transform_3, window_bounds = array<i64: 384, 128>}, {pipeline_mode = #tpu.pipeline_mode<synchronous>, transform_indices = @transform_4, window_bounds = array<i64: 1, 128>}, {pipeline_mode = #tpu.pipeline_mode<synchronous>, transform_indices = @transform_5, window_bounds = array<i64: 384, 128>}, {pipeline_mode = #tpu.pipeline_mode<synchronous>, transform_indices = @transform_6, window_bounds = array<i64: 1, 128>}, {pipeline_mode = #tpu.pipeline_mode<synchronous>, transform_indices = @transform_7, window_bounds = array<i64: 128, 128>}, {pipeline_mode = #tpu.pipeline_mode<synchronous>, transform_indices = @transform_8, window_bounds = array<i64: 1, 128>}, {transform_indices = @transform_9, window_bounds = array<i64: 1, 16, 128>}]} {
    %c0_i32 = arith.constant 0 : i32
    %0 = arith.cmpi eq, %arg1, %c0_i32 : i32
    %1 = arith.extui %0 : i1 to i32
    %c0_i32_0 = arith.constant 0 : i32
    %2 = arith.cmpi ne, %1, %c0_i32_0 : i32
    scf.if %2 {
      %cst_53 = arith.constant 0.000000e+00 : f32
      %54 = vector.broadcast %cst_53 : f32 to vector<8x128xf32>
      %c0_54 = arith.constant 0 : index
      %c0_55 = arith.constant 0 : index
      %55 = vector.load %arg12[%c0_54, %c0_55] : memref<24x128xf32, #tpu.memory_space<vmem>>, vector<8x128xf32>
      tpu.vector_store %arg12[%c0_54, %c0_55], %54 {strides = array<i32>} : memref<24x128xf32, #tpu.memory_space<vmem>>, vector<8x128xf32>,
      %cst_56 = arith.constant 0.000000e+00 : f32
      %56 = vector.broadcast %cst_56 : f32 to vector<8x128xf32>
      %c0_57 = arith.constant 0 : index
      %c0_58 = arith.constant 0 : index
      %57 = vector.load %arg13[%c0_57, %c0_58] : memref<24x128xf32, #tpu.memory_space<vmem>>, vector<8x128xf32>
      tpu.vector_store %arg13[%c0_57, %c0_58], %56 {strides = array<i32>} : memref<24x128xf32, #tpu.memory_space<vmem>>, vector<8x128xf32>,
      %cst_59 = arith.constant 0.000000e+00 : f32
      %58 = vector.broadcast %cst_59 : f32 to vector<8x128xf32>
      %c0_60 = arith.constant 0 : index
      %c0_61 = arith.constant 0 : index
      %59 = vector.load %arg14[%c0_60, %c0_61] : memref<24x128xf32, #tpu.memory_space<vmem>>, vector<8x128xf32>
      tpu.vector_store %arg14[%c0_60, %c0_61], %58 {strides = array<i32>} : memref<24x128xf32, #tpu.memory_space<vmem>>, vector<8x128xf32>,
    } else {
    }
    %c0_i32_1 = arith.constant 0 : i32
    %3 = arith.cmpi sgt, %arg1, %c0_i32_1 : i32
    %4 = arith.extui %3 : i1 to i32
    %c0_i32_2 = arith.constant 0 : i32
    %5 = arith.cmpi ne, %4, %c0_i32_2 : i32
    scf.if %5 {
      %c22 = arith.constant 22 : index
      %c0_53 = arith.constant 0 : index
      %54 = vector.load %arg12[%c22, %c0_53] : memref<24x128xf32, #tpu.memory_space<vmem>>, vector<2x128xf32>
      %c6_54 = arith.constant 6 : index
      %c0_55 = arith.constant 0 : index
      %55 = vector.load %arg12[%c6_54, %c0_55] : memref<24x128xf32, #tpu.memory_space<vmem>>, vector<2x128xf32>
      tpu.vector_store %arg12[%c6_54, %c0_55], %54 {strides = array<i32>} : memref<24x128xf32, #tpu.memory_space<vmem>>, vector<2x128xf32>,
      %c22_56 = arith.constant 22 : index
      %c0_57 = arith.constant 0 : index
      %56 = vector.load %arg13[%c22_56, %c0_57] : memref<24x128xf32, #tpu.memory_space<vmem>>, vector<2x128xf32>
      %c6_58 = arith.constant 6 : index
      %c0_59 = arith.constant 0 : index
      %57 = vector.load %arg13[%c6_58, %c0_59] : memref<24x128xf32, #tpu.memory_space<vmem>>, vector<2x128xf32>
      tpu.vector_store %arg13[%c6_58, %c0_59], %56 {strides = array<i32>} : memref<24x128xf32, #tpu.memory_space<vmem>>, vector<2x128xf32>,
      %c22_60 = arith.constant 22 : index
      %c0_61 = arith.constant 0 : index
      %58 = vector.load %arg14[%c22_60, %c0_61] : memref<24x128xf32, #tpu.memory_space<vmem>>, vector<2x128xf32>
      %c6_62 = arith.constant 6 : index
      %c0_63 = arith.constant 0 : index
      %59 = vector.load %arg14[%c6_62, %c0_63] : memref<24x128xf32, #tpu.memory_space<vmem>>, vector<2x128xf32>
      tpu.vector_store %arg14[%c6_62, %c0_63], %58 {strides = array<i32>} : memref<24x128xf32, #tpu.memory_space<vmem>>, vector<2x128xf32>,
    } else {
    }
    %c0 = arith.constant 0 : index
    %c0_3 = arith.constant 0 : index
    %c0_4 = arith.constant 0 : index
    %6 = vector.load %arg2[%c0, %c0_3, %c0_4] : memref<1x16x128xf32, #tpu.memory_space<vmem>>, vector<1x16x128xf32>
    %7 = vector.shape_cast %6 : vector<1x16x128xf32> to vector<16x128xf32>
    %c8 = arith.constant 8 : index
    %c0_5 = arith.constant 0 : index
    %8 = vector.load %arg12[%c8, %c0_5] : memref<24x128xf32, #tpu.memory_space<vmem>>, vector<16x128xf32>
    tpu.vector_store %arg12[%c8, %c0_5], %7 {strides = array<i32>} : memref<24x128xf32, #tpu.memory_space<vmem>>, vector<16x128xf32>,
    %c6 = arith.constant 6 : index
    %c0_6 = arith.constant 0 : index
    %9 = vector.load %arg12[%c6, %c0_6] : memref<24x128xf32, #tpu.memory_space<vmem>>, vector<16x128xf32>
    %c7 = arith.constant 7 : index
    %c0_7 = arith.constant 0 : index
    %10 = vector.load %arg12[%c7, %c0_7] : memref<24x128xf32, #tpu.memory_space<vmem>>, vector<16x128xf32>
    %c8_8 = arith.constant 8 : index
    %c0_9 = arith.constant 0 : index
    %11 = vector.load %arg12[%c8_8, %c0_9] : memref<24x128xf32, #tpu.memory_space<vmem>>, vector<16x128xf32>
    %12 = tpu.concatenate %9, %10, %11 in 1 : vector<16x128xf32>, vector<16x128xf32>, vector<16x128xf32> -> vector<16x384xf32>
    %c0_10 = arith.constant 0 : index
    %c0_11 = arith.constant 0 : index
    %13 = vector.load %arg3[%c0_10, %c0_11] : memref<384x128xf32, #tpu.memory_space<vmem>>, vector<384x128xf32>
    %cst = arith.constant dense<0.000000e+00> : vector<16x128xf32>
    %14 = tpu.matmul %12, %13, %cst {dimension_numbers = #tpu.dot_dimension_numbers<[1], [0], [0], [1], [0, 0, 1, 1], [], []>} : vector<16x384xf32>, vector<384x128xf32>, vector<16x128xf32> -> vector<16x128xf32>
    %c0_12 = arith.constant 0 : index
    %c0_13 = arith.constant 0 : index
    %15 = vector.load %arg4[%c0_12, %c0_13] : memref<1x128xf32, #tpu.memory_space<vmem>>, vector<1x128xf32>
    %16 = vector.broadcast %15 : vector<1x128xf32> to vector<16x128xf32>
    %17 = arith.addf %14, %16 : vector<16x128xf32>
    %cst_14 = arith.constant 0.000000e+00 : f32
    %18 = vector.broadcast %cst_14 : f32 to vector<16x128xf32>
    %19 = arith.maximumf %17, %18 : vector<16x128xf32>
    %c8_15 = arith.constant 8 : index
    %c0_16 = arith.constant 0 : index
    %20 = vector.load %arg13[%c8_15, %c0_16] : memref<24x128xf32, #tpu.memory_space<vmem>>, vector<16x128xf32>
    tpu.vector_store %arg13[%c8_15, %c0_16], %19 {strides = array<i32>} : memref<24x128xf32, #tpu.memory_space<vmem>>, vector<16x128xf32>,
    %c6_17 = arith.constant 6 : index
    %c0_18 = arith.constant 0 : index
    %21 = vector.load %arg13[%c6_17, %c0_18] : memref<24x128xf32, #tpu.memory_space<vmem>>, vector<16x128xf32>
    %c7_19 = arith.constant 7 : index
    %c0_20 = arith.constant 0 : index
    %22 = vector.load %arg13[%c7_19, %c0_20] : memref<24x128xf32, #tpu.memory_space<vmem>>, vector<16x128xf32>
    %c8_21 = arith.constant 8 : index
    %c0_22 = arith.constant 0 : index
    %23 = vector.load %arg13[%c8_21, %c0_22] : memref<24x128xf32, #tpu.memory_space<vmem>>, vector<16x128xf32>
    %24 = tpu.concatenate %21, %22, %23 in 1 : vector<16x128xf32>, vector<16x128xf32>, vector<16x128xf32> -> vector<16x384xf32>
    %c0_23 = arith.constant 0 : index
    %c0_24 = arith.constant 0 : index
    %25 = vector.load %arg5[%c0_23, %c0_24] : memref<384x128xf32, #tpu.memory_space<vmem>>, vector<384x128xf32>
    %cst_25 = arith.constant dense<0.000000e+00> : vector<16x128xf32>
    %26 = tpu.matmul %24, %25, %cst_25 {dimension_numbers = #tpu.dot_dimension_numbers<[1], [0], [0], [1], [0, 0, 1, 1], [], []>} : vector<16x384xf32>, vector<384x128xf32>, vector<16x128xf32> -> vector<16x128xf32>
    %c0_26 = arith.constant 0 : index
    %c0_27 = arith.constant 0 : index
    %27 = vector.load %arg6[%c0_26, %c0_27] : memref<1x128xf32, #tpu.memory_space<vmem>>, vector<1x128xf32>
    %28 = vector.broadcast %27 : vector<1x128xf32> to vector<16x128xf32>
    %29 = arith.addf %26, %28 : vector<16x128xf32>
    %cst_28 = arith.constant 0.000000e+00 : f32
    %30 = vector.broadcast %cst_28 : f32 to vector<16x128xf32>
    %31 = arith.maximumf %29, %30 : vector<16x128xf32>
    %c8_29 = arith.constant 8 : index
    %c0_30 = arith.constant 0 : index
    %32 = vector.load %arg14[%c8_29, %c0_30] : memref<24x128xf32, #tpu.memory_space<vmem>>, vector<16x128xf32>
    tpu.vector_store %arg14[%c8_29, %c0_30], %31 {strides = array<i32>} : memref<24x128xf32, #tpu.memory_space<vmem>>, vector<16x128xf32>,
    %c6_31 = arith.constant 6 : index
    %c0_32 = arith.constant 0 : index
    %33 = vector.load %arg14[%c6_31, %c0_32] : memref<24x128xf32, #tpu.memory_space<vmem>>, vector<16x128xf32>
    %c7_33 = arith.constant 7 : index
    %c0_34 = arith.constant 0 : index
    %34 = vector.load %arg14[%c7_33, %c0_34] : memref<24x128xf32, #tpu.memory_space<vmem>>, vector<16x128xf32>
    %c8_35 = arith.constant 8 : index
    %c0_36 = arith.constant 0 : index
    %35 = vector.load %arg14[%c8_35, %c0_36] : memref<24x128xf32, #tpu.memory_space<vmem>>, vector<16x128xf32>
    %36 = tpu.concatenate %33, %34, %35 in 1 : vector<16x128xf32>, vector<16x128xf32>, vector<16x128xf32> -> vector<16x384xf32>
    %c0_37 = arith.constant 0 : index
    %c0_38 = arith.constant 0 : index
    %37 = vector.load %arg7[%c0_37, %c0_38] : memref<384x128xf32, #tpu.memory_space<vmem>>, vector<384x128xf32>
    %cst_39 = arith.constant dense<0.000000e+00> : vector<16x128xf32>
    %38 = tpu.matmul %36, %37, %cst_39 {dimension_numbers = #tpu.dot_dimension_numbers<[1], [0], [0], [1], [0, 0, 1, 1], [], []>} : vector<16x384xf32>, vector<384x128xf32>, vector<16x128xf32> -> vector<16x128xf32>
    %c0_40 = arith.constant 0 : index
    %c0_41 = arith.constant 0 : index
    %39 = vector.load %arg8[%c0_40, %c0_41] : memref<1x128xf32, #tpu.memory_space<vmem>>, vector<1x128xf32>
    %40 = vector.broadcast %39 : vector<1x128xf32> to vector<16x128xf32>
    %41 = arith.addf %38, %40 : vector<16x128xf32>
    %c8_42 = arith.constant 8 : index
    %c0_43 = arith.constant 0 : index
    %42 = vector.load %arg12[%c8_42, %c0_43] : memref<24x128xf32, #tpu.memory_space<vmem>>, vector<16x128xf32>
    %c0_44 = arith.constant 0 : index
    %c0_45 = arith.constant 0 : index
    %43 = vector.load %arg9[%c0_44, %c0_45] : memref<128x128xf32, #tpu.memory_space<vmem>>, vector<128x128xf32>
    %cst_46 = arith.constant dense<0.000000e+00> : vector<16x128xf32>
    %44 = tpu.matmul %42, %43, %cst_46 {dimension_numbers = #tpu.dot_dimension_numbers<[1], [0], [0], [1], [0, 0, 1, 1], [], []>} : vector<16x128xf32>, vector<128x128xf32>, vector<16x128xf32> -> vector<16x128xf32>
    %c0_47 = arith.constant 0 : index
    %c0_48 = arith.constant 0 : index
    %45 = vector.load %arg10[%c0_47, %c0_48] : memref<1x128xf32, #tpu.memory_space<vmem>>, vector<1x128xf32>
    %46 = vector.broadcast %45 : vector<1x128xf32> to vector<16x128xf32>
    %47 = arith.addf %44, %46 : vector<16x128xf32>
    %48 = arith.addf %41, %47 : vector<16x128xf32>
    %cst_49 = arith.constant 0.000000e+00 : f32
    %49 = vector.broadcast %cst_49 : f32 to vector<16x128xf32>
    %50 = arith.maximumf %48, %49 : vector<16x128xf32>
    %c0_50 = arith.constant 0 : index
    %c0_51 = arith.constant 0 : index
    %c0_52 = arith.constant 0 : index
    %51 = vector.load %arg11[%c0_50, %c0_51, %c0_52] : memref<1x16x128xf32, #tpu.memory_space<vmem>>, vector<1x16x128xf32>
    %52 = vector.shape_cast %51 : vector<1x16x128xf32> to vector<16x128xf32>
    %53 = vector.shape_cast %50 : vector<16x128xf32> to vector<1x16x128xf32>
    tpu.vector_store %arg11[%c0_50, %c0_51, %c0_52], %53 {strides = array<i32>} : memref<1x16x128xf32, #tpu.memory_space<vmem>>, vector<1x16x128xf32>,
    return
  }
  func.func @transform_0(%arg0: i32, %arg1: i32) -> (i32, i32, i32) {
    %c0_i32 = arith.constant 0 : i32
    %c0_i32_0 = arith.constant 0 : i32
    return %arg0, %arg1, %c0_i32 : i32, i32, i32
  }
  func.func @transform_1(%arg0: i32, %arg1: i32) -> (i32, i32) {
    %c0_i32 = arith.constant 0 : i32
    %c0_i32_0 = arith.constant 0 : i32
    %c0_i32_1 = arith.constant 0 : i32
    return %c0_i32, %c0_i32_0 : i32, i32
  }
  func.func @transform_2(%arg0: i32, %arg1: i32) -> (i32, i32) {
    %c0_i32 = arith.constant 0 : i32
    %c0_i32_0 = arith.constant 0 : i32
    %c0_i32_1 = arith.constant 0 : i32
    return %c0_i32, %c0_i32_0 : i32, i32
  }
  func.func @transform_3(%arg0: i32, %arg1: i32) -> (i32, i32) {
    %c0_i32 = arith.constant 0 : i32
    %c0_i32_0 = arith.constant 0 : i32
    %c0_i32_1 = arith.constant 0 : i32
    return %c0_i32, %c0_i32_0 : i32, i32
  }
  func.func @transform_4(%arg0: i32, %arg1: i32) -> (i32, i32) {
    %c0_i32 = arith.constant 0 : i32
    %c0_i32_0 = arith.constant 0 : i32
    %c0_i32_1 = arith.constant 0 : i32
    return %c0_i32, %c0_i32_0 : i32, i32
  }
  func.func @transform_5(%arg0: i32, %arg1: i32) -> (i32, i32) {
    %c0_i32 = arith.constant 0 : i32
    %c0_i32_0 = arith.constant 0 : i32
    %c0_i32_1 = arith.constant 0 : i32
    return %c0_i32, %c0_i32_0 : i32, i32
  }
  func.func @transform_6(%arg0: i32, %arg1: i32) -> (i32, i32) {
    %c0_i32 = arith.constant 0 : i32
    %c0_i32_0 = arith.constant 0 : i32
    %c0_i32_1 = arith.constant 0 : i32
    return %c0_i32, %c0_i32_0 : i32, i32
  }
  func.func @transform_7(%arg0: i32, %arg1: i32) -> (i32, i32) {
    %c0_i32 = arith.constant 0 : i32
    %c0_i32_0 = arith.constant 0 : i32
    %c0_i32_1 = arith.constant 0 : i32
    return %c0_i32, %c0_i32_0 : i32, i32
  }
  func.func @transform_8(%arg0: i32, %arg1: i32) -> (i32, i32) {
    %c0_i32 = arith.constant 0 : i32
    %c0_i32_0 = arith.constant 0 : i32
    %c0_i32_1 = arith.constant 0 : i32
    return %c0_i32, %c0_i32_0 : i32, i32
  }
  func.func @transform_9(%arg0: i32, %arg1: i32) -> (i32, i32, i32) {
    %c0_i32 = arith.constant 0 : i32
    %c0_i32_0 = arith.constant 0 : i32
    return %arg0, %arg1, %c0_i32 : i32, i32, i32
  }
}

module attributes {stable_mosaic.version = 11 : i64} {
  func.func @_causal_block_kernel(%arg0: i32, %arg1: i32, %arg2: memref<1x16x128xf32, #tpu.memory_space<vmem>>, %arg3: memref<384x128xf32, #tpu.memory_space<vmem>>, %arg4: memref<1x128xf32, #tpu.memory_space<vmem>>, %arg5: memref<384x128xf32, #tpu.memory_space<vmem>>, %arg6: memref<1x128xf32, #tpu.memory_space<vmem>>, %arg7: memref<384x128xf32, #tpu.memory_space<vmem>>, %arg8: memref<1x128xf32, #tpu.memory_space<vmem>>, %arg9: memref<1x16x128xf32, #tpu.memory_space<vmem>>, %arg10: memref<24x128xf32, #tpu.memory_space<vmem>>, %arg11: memref<24x128xf32, #tpu.memory_space<vmem>>, %arg12: memref<24x128xf32, #tpu.memory_space<vmem>>) attributes {dimension_semantics = [#tpu.dimension_semantics<parallel>, #tpu.dimension_semantics<arbitrary>], iteration_bounds = array<i64: 2, 1>, scalar_prefetch = 0 : i64, scratch_operands = 3 : i64, tpu.core_type = #tpu.core_type<tc>, window_params = [{transform_indices = @transform_0, window_bounds = array<i64: 1, 16, 128>}, {pipeline_mode = #tpu.pipeline_mode<synchronous>, transform_indices = @transform_1, window_bounds = array<i64: 384, 128>}, {pipeline_mode = #tpu.pipeline_mode<synchronous>, transform_indices = @transform_2, window_bounds = array<i64: 1, 128>}, {pipeline_mode = #tpu.pipeline_mode<synchronous>, transform_indices = @transform_3, window_bounds = array<i64: 384, 128>}, {pipeline_mode = #tpu.pipeline_mode<synchronous>, transform_indices = @transform_4, window_bounds = array<i64: 1, 128>}, {pipeline_mode = #tpu.pipeline_mode<synchronous>, transform_indices = @transform_5, window_bounds = array<i64: 384, 128>}, {pipeline_mode = #tpu.pipeline_mode<synchronous>, transform_indices = @transform_6, window_bounds = array<i64: 1, 128>}, {transform_indices = @transform_7, window_bounds = array<i64: 1, 16, 128>}]} {
    %c0_i32 = arith.constant 0 : i32
    %0 = arith.cmpi eq, %arg1, %c0_i32 : i32
    %1 = arith.extui %0 : i1 to i32
    %c0_i32_0 = arith.constant 0 : i32
    %2 = arith.cmpi ne, %1, %c0_i32_0 : i32
    scf.if %2 {
      %cst_48 = arith.constant 0.000000e+00 : f32
      %49 = vector.broadcast %cst_48 : f32 to vector<8x128xf32>
      %c0_49 = arith.constant 0 : index
      %c0_50 = arith.constant 0 : index
      %50 = vector.load %arg10[%c0_49, %c0_50] : memref<24x128xf32, #tpu.memory_space<vmem>>, vector<8x128xf32>
      tpu.vector_store %arg10[%c0_49, %c0_50], %49 {strides = array<i32>} : memref<24x128xf32, #tpu.memory_space<vmem>>, vector<8x128xf32>,
      %cst_51 = arith.constant 0.000000e+00 : f32
      %51 = vector.broadcast %cst_51 : f32 to vector<8x128xf32>
      %c0_52 = arith.constant 0 : index
      %c0_53 = arith.constant 0 : index
      %52 = vector.load %arg11[%c0_52, %c0_53] : memref<24x128xf32, #tpu.memory_space<vmem>>, vector<8x128xf32>
      tpu.vector_store %arg11[%c0_52, %c0_53], %51 {strides = array<i32>} : memref<24x128xf32, #tpu.memory_space<vmem>>, vector<8x128xf32>,
      %cst_54 = arith.constant 0.000000e+00 : f32
      %53 = vector.broadcast %cst_54 : f32 to vector<8x128xf32>
      %c0_55 = arith.constant 0 : index
      %c0_56 = arith.constant 0 : index
      %54 = vector.load %arg12[%c0_55, %c0_56] : memref<24x128xf32, #tpu.memory_space<vmem>>, vector<8x128xf32>
      tpu.vector_store %arg12[%c0_55, %c0_56], %53 {strides = array<i32>} : memref<24x128xf32, #tpu.memory_space<vmem>>, vector<8x128xf32>,
    } else {
    }
    %c0_i32_1 = arith.constant 0 : i32
    %3 = arith.cmpi sgt, %arg1, %c0_i32_1 : i32
    %4 = arith.extui %3 : i1 to i32
    %c0_i32_2 = arith.constant 0 : i32
    %5 = arith.cmpi ne, %4, %c0_i32_2 : i32
    scf.if %5 {
      %c20 = arith.constant 20 : index
      %c0_48 = arith.constant 0 : index
      %49 = vector.load %arg10[%c20, %c0_48] : memref<24x128xf32, #tpu.memory_space<vmem>>, vector<4x128xf32>
      %c4_49 = arith.constant 4 : index
      %c0_50 = arith.constant 0 : index
      %50 = vector.load %arg10[%c4_49, %c0_50] : memref<24x128xf32, #tpu.memory_space<vmem>>, vector<4x128xf32>
      tpu.vector_store %arg10[%c4_49, %c0_50], %49 {strides = array<i32>} : memref<24x128xf32, #tpu.memory_space<vmem>>, vector<4x128xf32>,
      %c20_51 = arith.constant 20 : index
      %c0_52 = arith.constant 0 : index
      %51 = vector.load %arg11[%c20_51, %c0_52] : memref<24x128xf32, #tpu.memory_space<vmem>>, vector<4x128xf32>
      %c4_53 = arith.constant 4 : index
      %c0_54 = arith.constant 0 : index
      %52 = vector.load %arg11[%c4_53, %c0_54] : memref<24x128xf32, #tpu.memory_space<vmem>>, vector<4x128xf32>
      tpu.vector_store %arg11[%c4_53, %c0_54], %51 {strides = array<i32>} : memref<24x128xf32, #tpu.memory_space<vmem>>, vector<4x128xf32>,
      %c20_55 = arith.constant 20 : index
      %c0_56 = arith.constant 0 : index
      %53 = vector.load %arg12[%c20_55, %c0_56] : memref<24x128xf32, #tpu.memory_space<vmem>>, vector<4x128xf32>
      %c4_57 = arith.constant 4 : index
      %c0_58 = arith.constant 0 : index
      %54 = vector.load %arg12[%c4_57, %c0_58] : memref<24x128xf32, #tpu.memory_space<vmem>>, vector<4x128xf32>
      tpu.vector_store %arg12[%c4_57, %c0_58], %53 {strides = array<i32>} : memref<24x128xf32, #tpu.memory_space<vmem>>, vector<4x128xf32>,
    } else {
    }
    %c0 = arith.constant 0 : index
    %c0_3 = arith.constant 0 : index
    %c0_4 = arith.constant 0 : index
    %6 = vector.load %arg2[%c0, %c0_3, %c0_4] : memref<1x16x128xf32, #tpu.memory_space<vmem>>, vector<1x16x128xf32>
    %7 = vector.shape_cast %6 : vector<1x16x128xf32> to vector<16x128xf32>
    %c8 = arith.constant 8 : index
    %c0_5 = arith.constant 0 : index
    %8 = vector.load %arg10[%c8, %c0_5] : memref<24x128xf32, #tpu.memory_space<vmem>>, vector<16x128xf32>
    tpu.vector_store %arg10[%c8, %c0_5], %7 {strides = array<i32>} : memref<24x128xf32, #tpu.memory_space<vmem>>, vector<16x128xf32>,
    %c4 = arith.constant 4 : index
    %c0_6 = arith.constant 0 : index
    %9 = vector.load %arg10[%c4, %c0_6] : memref<24x128xf32, #tpu.memory_space<vmem>>, vector<16x128xf32>
    %c6 = arith.constant 6 : index
    %c0_7 = arith.constant 0 : index
    %10 = vector.load %arg10[%c6, %c0_7] : memref<24x128xf32, #tpu.memory_space<vmem>>, vector<16x128xf32>
    %c8_8 = arith.constant 8 : index
    %c0_9 = arith.constant 0 : index
    %11 = vector.load %arg10[%c8_8, %c0_9] : memref<24x128xf32, #tpu.memory_space<vmem>>, vector<16x128xf32>
    %12 = tpu.concatenate %9, %10, %11 in 1 : vector<16x128xf32>, vector<16x128xf32>, vector<16x128xf32> -> vector<16x384xf32>
    %c0_10 = arith.constant 0 : index
    %c0_11 = arith.constant 0 : index
    %13 = vector.load %arg3[%c0_10, %c0_11] : memref<384x128xf32, #tpu.memory_space<vmem>>, vector<384x128xf32>
    %cst = arith.constant dense<0.000000e+00> : vector<16x128xf32>
    %14 = tpu.matmul %12, %13, %cst {dimension_numbers = #tpu.dot_dimension_numbers<[1], [0], [0], [1], [0, 0, 1, 1], [], []>} : vector<16x384xf32>, vector<384x128xf32>, vector<16x128xf32> -> vector<16x128xf32>
    %c0_12 = arith.constant 0 : index
    %c0_13 = arith.constant 0 : index
    %15 = vector.load %arg4[%c0_12, %c0_13] : memref<1x128xf32, #tpu.memory_space<vmem>>, vector<1x128xf32>
    %16 = vector.broadcast %15 : vector<1x128xf32> to vector<16x128xf32>
    %17 = arith.addf %14, %16 : vector<16x128xf32>
    %cst_14 = arith.constant 0.000000e+00 : f32
    %18 = vector.broadcast %cst_14 : f32 to vector<16x128xf32>
    %19 = arith.maximumf %17, %18 : vector<16x128xf32>
    %c8_15 = arith.constant 8 : index
    %c0_16 = arith.constant 0 : index
    %20 = vector.load %arg11[%c8_15, %c0_16] : memref<24x128xf32, #tpu.memory_space<vmem>>, vector<16x128xf32>
    tpu.vector_store %arg11[%c8_15, %c0_16], %19 {strides = array<i32>} : memref<24x128xf32, #tpu.memory_space<vmem>>, vector<16x128xf32>,
    %c4_17 = arith.constant 4 : index
    %c0_18 = arith.constant 0 : index
    %21 = vector.load %arg11[%c4_17, %c0_18] : memref<24x128xf32, #tpu.memory_space<vmem>>, vector<16x128xf32>
    %c6_19 = arith.constant 6 : index
    %c0_20 = arith.constant 0 : index
    %22 = vector.load %arg11[%c6_19, %c0_20] : memref<24x128xf32, #tpu.memory_space<vmem>>, vector<16x128xf32>
    %c8_21 = arith.constant 8 : index
    %c0_22 = arith.constant 0 : index
    %23 = vector.load %arg11[%c8_21, %c0_22] : memref<24x128xf32, #tpu.memory_space<vmem>>, vector<16x128xf32>
    %24 = tpu.concatenate %21, %22, %23 in 1 : vector<16x128xf32>, vector<16x128xf32>, vector<16x128xf32> -> vector<16x384xf32>
    %c0_23 = arith.constant 0 : index
    %c0_24 = arith.constant 0 : index
    %25 = vector.load %arg5[%c0_23, %c0_24] : memref<384x128xf32, #tpu.memory_space<vmem>>, vector<384x128xf32>
    %cst_25 = arith.constant dense<0.000000e+00> : vector<16x128xf32>
    %26 = tpu.matmul %24, %25, %cst_25 {dimension_numbers = #tpu.dot_dimension_numbers<[1], [0], [0], [1], [0, 0, 1, 1], [], []>} : vector<16x384xf32>, vector<384x128xf32>, vector<16x128xf32> -> vector<16x128xf32>
    %c0_26 = arith.constant 0 : index
    %c0_27 = arith.constant 0 : index
    %27 = vector.load %arg6[%c0_26, %c0_27] : memref<1x128xf32, #tpu.memory_space<vmem>>, vector<1x128xf32>
    %28 = vector.broadcast %27 : vector<1x128xf32> to vector<16x128xf32>
    %29 = arith.addf %26, %28 : vector<16x128xf32>
    %cst_28 = arith.constant 0.000000e+00 : f32
    %30 = vector.broadcast %cst_28 : f32 to vector<16x128xf32>
    %31 = arith.maximumf %29, %30 : vector<16x128xf32>
    %c8_29 = arith.constant 8 : index
    %c0_30 = arith.constant 0 : index
    %32 = vector.load %arg12[%c8_29, %c0_30] : memref<24x128xf32, #tpu.memory_space<vmem>>, vector<16x128xf32>
    tpu.vector_store %arg12[%c8_29, %c0_30], %31 {strides = array<i32>} : memref<24x128xf32, #tpu.memory_space<vmem>>, vector<16x128xf32>,
    %c4_31 = arith.constant 4 : index
    %c0_32 = arith.constant 0 : index
    %33 = vector.load %arg12[%c4_31, %c0_32] : memref<24x128xf32, #tpu.memory_space<vmem>>, vector<16x128xf32>
    %c6_33 = arith.constant 6 : index
    %c0_34 = arith.constant 0 : index
    %34 = vector.load %arg12[%c6_33, %c0_34] : memref<24x128xf32, #tpu.memory_space<vmem>>, vector<16x128xf32>
    %c8_35 = arith.constant 8 : index
    %c0_36 = arith.constant 0 : index
    %35 = vector.load %arg12[%c8_35, %c0_36] : memref<24x128xf32, #tpu.memory_space<vmem>>, vector<16x128xf32>
    %36 = tpu.concatenate %33, %34, %35 in 1 : vector<16x128xf32>, vector<16x128xf32>, vector<16x128xf32> -> vector<16x384xf32>
    %c0_37 = arith.constant 0 : index
    %c0_38 = arith.constant 0 : index
    %37 = vector.load %arg7[%c0_37, %c0_38] : memref<384x128xf32, #tpu.memory_space<vmem>>, vector<384x128xf32>
    %cst_39 = arith.constant dense<0.000000e+00> : vector<16x128xf32>
    %38 = tpu.matmul %36, %37, %cst_39 {dimension_numbers = #tpu.dot_dimension_numbers<[1], [0], [0], [1], [0, 0, 1, 1], [], []>} : vector<16x384xf32>, vector<384x128xf32>, vector<16x128xf32> -> vector<16x128xf32>
    %c0_40 = arith.constant 0 : index
    %c0_41 = arith.constant 0 : index
    %39 = vector.load %arg8[%c0_40, %c0_41] : memref<1x128xf32, #tpu.memory_space<vmem>>, vector<1x128xf32>
    %40 = vector.broadcast %39 : vector<1x128xf32> to vector<16x128xf32>
    %41 = arith.addf %38, %40 : vector<16x128xf32>
    %c8_42 = arith.constant 8 : index
    %c0_43 = arith.constant 0 : index
    %42 = vector.load %arg10[%c8_42, %c0_43] : memref<24x128xf32, #tpu.memory_space<vmem>>, vector<16x128xf32>
    %43 = arith.addf %41, %42 : vector<16x128xf32>
    %cst_44 = arith.constant 0.000000e+00 : f32
    %44 = vector.broadcast %cst_44 : f32 to vector<16x128xf32>
    %45 = arith.maximumf %43, %44 : vector<16x128xf32>
    %c0_45 = arith.constant 0 : index
    %c0_46 = arith.constant 0 : index
    %c0_47 = arith.constant 0 : index
    %46 = vector.load %arg9[%c0_45, %c0_46, %c0_47] : memref<1x16x128xf32, #tpu.memory_space<vmem>>, vector<1x16x128xf32>
    %47 = vector.shape_cast %46 : vector<1x16x128xf32> to vector<16x128xf32>
    %48 = vector.shape_cast %45 : vector<16x128xf32> to vector<1x16x128xf32>
    tpu.vector_store %arg9[%c0_45, %c0_46, %c0_47], %48 {strides = array<i32>} : memref<1x16x128xf32, #tpu.memory_space<vmem>>, vector<1x16x128xf32>,
    return
  }
  func.func @transform_0(%arg0: i32, %arg1: i32) -> (i32, i32, i32) {
    %c0_i32 = arith.constant 0 : i32
    %c0_i32_0 = arith.constant 0 : i32
    return %arg0, %arg1, %c0_i32 : i32, i32, i32
  }
  func.func @transform_1(%arg0: i32, %arg1: i32) -> (i32, i32) {
    %c0_i32 = arith.constant 0 : i32
    %c0_i32_0 = arith.constant 0 : i32
    %c0_i32_1 = arith.constant 0 : i32
    return %c0_i32, %c0_i32_0 : i32, i32
  }
  func.func @transform_2(%arg0: i32, %arg1: i32) -> (i32, i32) {
    %c0_i32 = arith.constant 0 : i32
    %c0_i32_0 = arith.constant 0 : i32
    %c0_i32_1 = arith.constant 0 : i32
    return %c0_i32, %c0_i32_0 : i32, i32
  }
  func.func @transform_3(%arg0: i32, %arg1: i32) -> (i32, i32) {
    %c0_i32 = arith.constant 0 : i32
    %c0_i32_0 = arith.constant 0 : i32
    %c0_i32_1 = arith.constant 0 : i32
    return %c0_i32, %c0_i32_0 : i32, i32
  }
  func.func @transform_4(%arg0: i32, %arg1: i32) -> (i32, i32) {
    %c0_i32 = arith.constant 0 : i32
    %c0_i32_0 = arith.constant 0 : i32
    %c0_i32_1 = arith.constant 0 : i32
    return %c0_i32, %c0_i32_0 : i32, i32
  }
  func.func @transform_5(%arg0: i32, %arg1: i32) -> (i32, i32) {
    %c0_i32 = arith.constant 0 : i32
    %c0_i32_0 = arith.constant 0 : i32
    %c0_i32_1 = arith.constant 0 : i32
    return %c0_i32, %c0_i32_0 : i32, i32
  }
  func.func @transform_6(%arg0: i32, %arg1: i32) -> (i32, i32) {
    %c0_i32 = arith.constant 0 : i32
    %c0_i32_0 = arith.constant 0 : i32
    %c0_i32_1 = arith.constant 0 : i32
    return %c0_i32, %c0_i32_0 : i32, i32
  }
  func.func @transform_7(%arg0: i32, %arg1: i32) -> (i32, i32, i32) {
    %c0_i32 = arith.constant 0 : i32
    %c0_i32_0 = arith.constant 0 : i32
    return %arg0, %arg1, %c0_i32 : i32, i32, i32
  }
}

module attributes {stable_mosaic.version = 11 : i64} {
  func.func @_causal_block_kernel(%arg0: i32, %arg1: i32, %arg2: memref<1x16x128xf32, #tpu.memory_space<vmem>>, %arg3: memref<384x128xf32, #tpu.memory_space<vmem>>, %arg4: memref<1x128xf32, #tpu.memory_space<vmem>>, %arg5: memref<384x128xf32, #tpu.memory_space<vmem>>, %arg6: memref<1x128xf32, #tpu.memory_space<vmem>>, %arg7: memref<384x128xf32, #tpu.memory_space<vmem>>, %arg8: memref<1x128xf32, #tpu.memory_space<vmem>>, %arg9: memref<1x16x128xf32, #tpu.memory_space<vmem>>, %arg10: memref<24x128xf32, #tpu.memory_space<vmem>>, %arg11: memref<24x128xf32, #tpu.memory_space<vmem>>, %arg12: memref<24x128xf32, #tpu.memory_space<vmem>>) attributes {dimension_semantics = [#tpu.dimension_semantics<parallel>, #tpu.dimension_semantics<arbitrary>], iteration_bounds = array<i64: 2, 1>, scalar_prefetch = 0 : i64, scratch_operands = 3 : i64, tpu.core_type = #tpu.core_type<tc>, window_params = [{transform_indices = @transform_0, window_bounds = array<i64: 1, 16, 128>}, {pipeline_mode = #tpu.pipeline_mode<synchronous>, transform_indices = @transform_1, window_bounds = array<i64: 384, 128>}, {pipeline_mode = #tpu.pipeline_mode<synchronous>, transform_indices = @transform_2, window_bounds = array<i64: 1, 128>}, {pipeline_mode = #tpu.pipeline_mode<synchronous>, transform_indices = @transform_3, window_bounds = array<i64: 384, 128>}, {pipeline_mode = #tpu.pipeline_mode<synchronous>, transform_indices = @transform_4, window_bounds = array<i64: 1, 128>}, {pipeline_mode = #tpu.pipeline_mode<synchronous>, transform_indices = @transform_5, window_bounds = array<i64: 384, 128>}, {pipeline_mode = #tpu.pipeline_mode<synchronous>, transform_indices = @transform_6, window_bounds = array<i64: 1, 128>}, {transform_indices = @transform_7, window_bounds = array<i64: 1, 16, 128>}]} {
    %c0_i32 = arith.constant 0 : i32
    %0 = arith.cmpi eq, %arg1, %c0_i32 : i32
    %1 = arith.extui %0 : i1 to i32
    %c0_i32_0 = arith.constant 0 : i32
    %2 = arith.cmpi ne, %1, %c0_i32_0 : i32
    scf.if %2 {
      %cst_49 = arith.constant 0.000000e+00 : f32
      %49 = vector.broadcast %cst_49 : f32 to vector<8x128xf32>
      %c0_50 = arith.constant 0 : index
      %c0_51 = arith.constant 0 : index
      %50 = vector.load %arg10[%c0_50, %c0_51] : memref<24x128xf32, #tpu.memory_space<vmem>>, vector<8x128xf32>
      tpu.vector_store %arg10[%c0_50, %c0_51], %49 {strides = array<i32>} : memref<24x128xf32, #tpu.memory_space<vmem>>, vector<8x128xf32>,
      %cst_52 = arith.constant 0.000000e+00 : f32
      %51 = vector.broadcast %cst_52 : f32 to vector<8x128xf32>
      %c0_53 = arith.constant 0 : index
      %c0_54 = arith.constant 0 : index
      %52 = vector.load %arg11[%c0_53, %c0_54] : memref<24x128xf32, #tpu.memory_space<vmem>>, vector<8x128xf32>
      tpu.vector_store %arg11[%c0_53, %c0_54], %51 {strides = array<i32>} : memref<24x128xf32, #tpu.memory_space<vmem>>, vector<8x128xf32>,
      %cst_55 = arith.constant 0.000000e+00 : f32
      %53 = vector.broadcast %cst_55 : f32 to vector<8x128xf32>
      %c0_56 = arith.constant 0 : index
      %c0_57 = arith.constant 0 : index
      %54 = vector.load %arg12[%c0_56, %c0_57] : memref<24x128xf32, #tpu.memory_space<vmem>>, vector<8x128xf32>
      tpu.vector_store %arg12[%c0_56, %c0_57], %53 {strides = array<i32>} : memref<24x128xf32, #tpu.memory_space<vmem>>, vector<8x128xf32>,
    } else {
    }
    %c0_i32_1 = arith.constant 0 : i32
    %3 = arith.cmpi sgt, %arg1, %c0_i32_1 : i32
    %4 = arith.extui %3 : i1 to i32
    %c0_i32_2 = arith.constant 0 : i32
    %5 = arith.cmpi ne, %4, %c0_i32_2 : i32
    scf.if %5 {
      %c16 = arith.constant 16 : index
      %c0_49 = arith.constant 0 : index
      %49 = vector.load %arg10[%c16, %c0_49] : memref<24x128xf32, #tpu.memory_space<vmem>>, vector<8x128xf32>
      %c0_50 = arith.constant 0 : index
      %c0_51 = arith.constant 0 : index
      %50 = vector.load %arg10[%c0_50, %c0_51] : memref<24x128xf32, #tpu.memory_space<vmem>>, vector<8x128xf32>
      tpu.vector_store %arg10[%c0_50, %c0_51], %49 {strides = array<i32>} : memref<24x128xf32, #tpu.memory_space<vmem>>, vector<8x128xf32>,
      %c16_52 = arith.constant 16 : index
      %c0_53 = arith.constant 0 : index
      %51 = vector.load %arg11[%c16_52, %c0_53] : memref<24x128xf32, #tpu.memory_space<vmem>>, vector<8x128xf32>
      %c0_54 = arith.constant 0 : index
      %c0_55 = arith.constant 0 : index
      %52 = vector.load %arg11[%c0_54, %c0_55] : memref<24x128xf32, #tpu.memory_space<vmem>>, vector<8x128xf32>
      tpu.vector_store %arg11[%c0_54, %c0_55], %51 {strides = array<i32>} : memref<24x128xf32, #tpu.memory_space<vmem>>, vector<8x128xf32>,
      %c16_56 = arith.constant 16 : index
      %c0_57 = arith.constant 0 : index
      %53 = vector.load %arg12[%c16_56, %c0_57] : memref<24x128xf32, #tpu.memory_space<vmem>>, vector<8x128xf32>
      %c0_58 = arith.constant 0 : index
      %c0_59 = arith.constant 0 : index
      %54 = vector.load %arg12[%c0_58, %c0_59] : memref<24x128xf32, #tpu.memory_space<vmem>>, vector<8x128xf32>
      tpu.vector_store %arg12[%c0_58, %c0_59], %53 {strides = array<i32>} : memref<24x128xf32, #tpu.memory_space<vmem>>, vector<8x128xf32>,
    } else {
    }
    %c0 = arith.constant 0 : index
    %c0_3 = arith.constant 0 : index
    %c0_4 = arith.constant 0 : index
    %6 = vector.load %arg2[%c0, %c0_3, %c0_4] : memref<1x16x128xf32, #tpu.memory_space<vmem>>, vector<1x16x128xf32>
    %7 = vector.shape_cast %6 : vector<1x16x128xf32> to vector<16x128xf32>
    %c8 = arith.constant 8 : index
    %c0_5 = arith.constant 0 : index
    %8 = vector.load %arg10[%c8, %c0_5] : memref<24x128xf32, #tpu.memory_space<vmem>>, vector<16x128xf32>
    tpu.vector_store %arg10[%c8, %c0_5], %7 {strides = array<i32>} : memref<24x128xf32, #tpu.memory_space<vmem>>, vector<16x128xf32>,
    %c0_6 = arith.constant 0 : index
    %c0_7 = arith.constant 0 : index
    %9 = vector.load %arg10[%c0_6, %c0_7] : memref<24x128xf32, #tpu.memory_space<vmem>>, vector<16x128xf32>
    %c4 = arith.constant 4 : index
    %c0_8 = arith.constant 0 : index
    %10 = vector.load %arg10[%c4, %c0_8] : memref<24x128xf32, #tpu.memory_space<vmem>>, vector<16x128xf32>
    %c8_9 = arith.constant 8 : index
    %c0_10 = arith.constant 0 : index
    %11 = vector.load %arg10[%c8_9, %c0_10] : memref<24x128xf32, #tpu.memory_space<vmem>>, vector<16x128xf32>
    %12 = tpu.concatenate %9, %10, %11 in 1 : vector<16x128xf32>, vector<16x128xf32>, vector<16x128xf32> -> vector<16x384xf32>
    %c0_11 = arith.constant 0 : index
    %c0_12 = arith.constant 0 : index
    %13 = vector.load %arg3[%c0_11, %c0_12] : memref<384x128xf32, #tpu.memory_space<vmem>>, vector<384x128xf32>
    %cst = arith.constant dense<0.000000e+00> : vector<16x128xf32>
    %14 = tpu.matmul %12, %13, %cst {dimension_numbers = #tpu.dot_dimension_numbers<[1], [0], [0], [1], [0, 0, 1, 1], [], []>} : vector<16x384xf32>, vector<384x128xf32>, vector<16x128xf32> -> vector<16x128xf32>
    %c0_13 = arith.constant 0 : index
    %c0_14 = arith.constant 0 : index
    %15 = vector.load %arg4[%c0_13, %c0_14] : memref<1x128xf32, #tpu.memory_space<vmem>>, vector<1x128xf32>
    %16 = vector.broadcast %15 : vector<1x128xf32> to vector<16x128xf32>
    %17 = arith.addf %14, %16 : vector<16x128xf32>
    %cst_15 = arith.constant 0.000000e+00 : f32
    %18 = vector.broadcast %cst_15 : f32 to vector<16x128xf32>
    %19 = arith.maximumf %17, %18 : vector<16x128xf32>
    %c8_16 = arith.constant 8 : index
    %c0_17 = arith.constant 0 : index
    %20 = vector.load %arg11[%c8_16, %c0_17] : memref<24x128xf32, #tpu.memory_space<vmem>>, vector<16x128xf32>
    tpu.vector_store %arg11[%c8_16, %c0_17], %19 {strides = array<i32>} : memref<24x128xf32, #tpu.memory_space<vmem>>, vector<16x128xf32>,
    %c0_18 = arith.constant 0 : index
    %c0_19 = arith.constant 0 : index
    %21 = vector.load %arg11[%c0_18, %c0_19] : memref<24x128xf32, #tpu.memory_space<vmem>>, vector<16x128xf32>
    %c4_20 = arith.constant 4 : index
    %c0_21 = arith.constant 0 : index
    %22 = vector.load %arg11[%c4_20, %c0_21] : memref<24x128xf32, #tpu.memory_space<vmem>>, vector<16x128xf32>
    %c8_22 = arith.constant 8 : index
    %c0_23 = arith.constant 0 : index
    %23 = vector.load %arg11[%c8_22, %c0_23] : memref<24x128xf32, #tpu.memory_space<vmem>>, vector<16x128xf32>
    %24 = tpu.concatenate %21, %22, %23 in 1 : vector<16x128xf32>, vector<16x128xf32>, vector<16x128xf32> -> vector<16x384xf32>
    %c0_24 = arith.constant 0 : index
    %c0_25 = arith.constant 0 : index
    %25 = vector.load %arg5[%c0_24, %c0_25] : memref<384x128xf32, #tpu.memory_space<vmem>>, vector<384x128xf32>
    %cst_26 = arith.constant dense<0.000000e+00> : vector<16x128xf32>
    %26 = tpu.matmul %24, %25, %cst_26 {dimension_numbers = #tpu.dot_dimension_numbers<[1], [0], [0], [1], [0, 0, 1, 1], [], []>} : vector<16x384xf32>, vector<384x128xf32>, vector<16x128xf32> -> vector<16x128xf32>
    %c0_27 = arith.constant 0 : index
    %c0_28 = arith.constant 0 : index
    %27 = vector.load %arg6[%c0_27, %c0_28] : memref<1x128xf32, #tpu.memory_space<vmem>>, vector<1x128xf32>
    %28 = vector.broadcast %27 : vector<1x128xf32> to vector<16x128xf32>
    %29 = arith.addf %26, %28 : vector<16x128xf32>
    %cst_29 = arith.constant 0.000000e+00 : f32
    %30 = vector.broadcast %cst_29 : f32 to vector<16x128xf32>
    %31 = arith.maximumf %29, %30 : vector<16x128xf32>
    %c8_30 = arith.constant 8 : index
    %c0_31 = arith.constant 0 : index
    %32 = vector.load %arg12[%c8_30, %c0_31] : memref<24x128xf32, #tpu.memory_space<vmem>>, vector<16x128xf32>
    tpu.vector_store %arg12[%c8_30, %c0_31], %31 {strides = array<i32>} : memref<24x128xf32, #tpu.memory_space<vmem>>, vector<16x128xf32>,
    %c0_32 = arith.constant 0 : index
    %c0_33 = arith.constant 0 : index
    %33 = vector.load %arg12[%c0_32, %c0_33] : memref<24x128xf32, #tpu.memory_space<vmem>>, vector<16x128xf32>
    %c4_34 = arith.constant 4 : index
    %c0_35 = arith.constant 0 : index
    %34 = vector.load %arg12[%c4_34, %c0_35] : memref<24x128xf32, #tpu.memory_space<vmem>>, vector<16x128xf32>
    %c8_36 = arith.constant 8 : index
    %c0_37 = arith.constant 0 : index
    %35 = vector.load %arg12[%c8_36, %c0_37] : memref<24x128xf32, #tpu.memory_space<vmem>>, vector<16x128xf32>
    %36 = tpu.concatenate %33, %34, %35 in 1 : vector<16x128xf32>, vector<16x128xf32>, vector<16x128xf32> -> vector<16x384xf32>
    %c0_38 = arith.constant 0 : index
    %c0_39 = arith.constant 0 : index
    %37 = vector.load %arg7[%c0_38, %c0_39] : memref<384x128xf32, #tpu.memory_space<vmem>>, vector<384x128xf32>
    %cst_40 = arith.constant dense<0.000000e+00> : vector<16x128xf32>
    %38 = tpu.matmul %36, %37, %cst_40 {dimension_numbers = #tpu.dot_dimension_numbers<[1], [0], [0], [1], [0, 0, 1, 1], [], []>} : vector<16x384xf32>, vector<384x128xf32>, vector<16x128xf32> -> vector<16x128xf32>
    %c0_41 = arith.constant 0 : index
    %c0_42 = arith.constant 0 : index
    %39 = vector.load %arg8[%c0_41, %c0_42] : memref<1x128xf32, #tpu.memory_space<vmem>>, vector<1x128xf32>
    %40 = vector.broadcast %39 : vector<1x128xf32> to vector<16x128xf32>
    %41 = arith.addf %38, %40 : vector<16x128xf32>
    %c8_43 = arith.constant 8 : index
    %c0_44 = arith.constant 0 : index
    %42 = vector.load %arg10[%c8_43, %c0_44] : memref<24x128xf32, #tpu.memory_space<vmem>>, vector<16x128xf32>
    %43 = arith.addf %41, %42 : vector<16x128xf32>
    %cst_45 = arith.constant 0.000000e+00 : f32
    %44 = vector.broadcast %cst_45 : f32 to vector<16x128xf32>
    %45 = arith.maximumf %43, %44 : vector<16x128xf32>
    %c0_46 = arith.constant 0 : index
    %c0_47 = arith.constant 0 : index
    %c0_48 = arith.constant 0 : index
    %46 = vector.load %arg9[%c0_46, %c0_47, %c0_48] : memref<1x16x128xf32, #tpu.memory_space<vmem>>, vector<1x16x128xf32>
    %47 = vector.shape_cast %46 : vector<1x16x128xf32> to vector<16x128xf32>
    %48 = vector.shape_cast %45 : vector<16x128xf32> to vector<1x16x128xf32>
    tpu.vector_store %arg9[%c0_46, %c0_47, %c0_48], %48 {strides = array<i32>} : memref<1x16x128xf32, #tpu.memory_space<vmem>>, vector<1x16x128xf32>,
    return
  }
  func.func @transform_0(%arg0: i32, %arg1: i32) -> (i32, i32, i32) {
    %c0_i32 = arith.constant 0 : i32
    %c0_i32_0 = arith.constant 0 : i32
    return %arg0, %arg1, %c0_i32 : i32, i32, i32
  }
  func.func @transform_1(%arg0: i32, %arg1: i32) -> (i32, i32) {
    %c0_i32 = arith.constant 0 : i32
    %c0_i32_0 = arith.constant 0 : i32
    %c0_i32_1 = arith.constant 0 : i32
    return %c0_i32, %c0_i32_0 : i32, i32
  }
  func.func @transform_2(%arg0: i32, %arg1: i32) -> (i32, i32) {
    %c0_i32 = arith.constant 0 : i32
    %c0_i32_0 = arith.constant 0 : i32
    %c0_i32_1 = arith.constant 0 : i32
    return %c0_i32, %c0_i32_0 : i32, i32
  }
  func.func @transform_3(%arg0: i32, %arg1: i32) -> (i32, i32) {
    %c0_i32 = arith.constant 0 : i32
    %c0_i32_0 = arith.constant 0 : i32
    %c0_i32_1 = arith.constant 0 : i32
    return %c0_i32, %c0_i32_0 : i32, i32
  }
  func.func @transform_4(%arg0: i32, %arg1: i32) -> (i32, i32) {
    %c0_i32 = arith.constant 0 : i32
    %c0_i32_0 = arith.constant 0 : i32
    %c0_i32_1 = arith.constant 0 : i32
    return %c0_i32, %c0_i32_0 : i32, i32
  }
  func.func @transform_5(%arg0: i32, %arg1: i32) -> (i32, i32) {
    %c0_i32 = arith.constant 0 : i32
    %c0_i32_0 = arith.constant 0 : i32
    %c0_i32_1 = arith.constant 0 : i32
    return %c0_i32, %c0_i32_0 : i32, i32
  }
  func.func @transform_6(%arg0: i32, %arg1: i32) -> (i32, i32) {
    %c0_i32 = arith.constant 0 : i32
    %c0_i32_0 = arith.constant 0 : i32
    %c0_i32_1 = arith.constant 0 : i32
    return %c0_i32, %c0_i32_0 : i32, i32
  }
  func.func @transform_7(%arg0: i32, %arg1: i32) -> (i32, i32, i32) {
    %c0_i32 = arith.constant 0 : i32
    %c0_i32_0 = arith.constant 0 : i32
    return %arg0, %arg1, %c0_i32 : i32, i32, i32
  }
}

module attributes {stable_mosaic.version = 11 : i64} {
  func.func @_causal_block_kernel(%arg0: i32, %arg1: i32, %arg2: memref<1x16x128xf32, #tpu.memory_space<vmem>>, %arg3: memref<384x128xf32, #tpu.memory_space<vmem>>, %arg4: memref<1x128xf32, #tpu.memory_space<vmem>>, %arg5: memref<384x128xf32, #tpu.memory_space<vmem>>, %arg6: memref<1x128xf32, #tpu.memory_space<vmem>>, %arg7: memref<384x128xf32, #tpu.memory_space<vmem>>, %arg8: memref<1x128xf32, #tpu.memory_space<vmem>>, %arg9: memref<128x128xf32, #tpu.memory_space<vmem>>, %arg10: memref<1x128xf32, #tpu.memory_space<vmem>>, %arg11: memref<1x16x128xf32, #tpu.memory_space<vmem>>, %arg12: memref<32x128xf32, #tpu.memory_space<vmem>>, %arg13: memref<32x128xf32, #tpu.memory_space<vmem>>, %arg14: memref<32x128xf32, #tpu.memory_space<vmem>>) attributes {dimension_semantics = [#tpu.dimension_semantics<parallel>, #tpu.dimension_semantics<arbitrary>], iteration_bounds = array<i64: 2, 1>, scalar_prefetch = 0 : i64, scratch_operands = 3 : i64, tpu.core_type = #tpu.core_type<tc>, window_params = [{transform_indices = @transform_0, window_bounds = array<i64: 1, 16, 128>}, {pipeline_mode = #tpu.pipeline_mode<synchronous>, transform_indices = @transform_1, window_bounds = array<i64: 384, 128>}, {pipeline_mode = #tpu.pipeline_mode<synchronous>, transform_indices = @transform_2, window_bounds = array<i64: 1, 128>}, {pipeline_mode = #tpu.pipeline_mode<synchronous>, transform_indices = @transform_3, window_bounds = array<i64: 384, 128>}, {pipeline_mode = #tpu.pipeline_mode<synchronous>, transform_indices = @transform_4, window_bounds = array<i64: 1, 128>}, {pipeline_mode = #tpu.pipeline_mode<synchronous>, transform_indices = @transform_5, window_bounds = array<i64: 384, 128>}, {pipeline_mode = #tpu.pipeline_mode<synchronous>, transform_indices = @transform_6, window_bounds = array<i64: 1, 128>}, {pipeline_mode = #tpu.pipeline_mode<synchronous>, transform_indices = @transform_7, window_bounds = array<i64: 128, 128>}, {pipeline_mode = #tpu.pipeline_mode<synchronous>, transform_indices = @transform_8, window_bounds = array<i64: 1, 128>}, {transform_indices = @transform_9, window_bounds = array<i64: 1, 16, 128>}]} {
    %c0_i32 = arith.constant 0 : i32
    %0 = arith.cmpi eq, %arg1, %c0_i32 : i32
    %1 = arith.extui %0 : i1 to i32
    %c0_i32_0 = arith.constant 0 : i32
    %2 = arith.cmpi ne, %1, %c0_i32_0 : i32
    scf.if %2 {
      %cst_53 = arith.constant 0.000000e+00 : f32
      %54 = vector.broadcast %cst_53 : f32 to vector<16x128xf32>
      %c0_54 = arith.constant 0 : index
      %c0_55 = arith.constant 0 : index
      %55 = vector.load %arg12[%c0_54, %c0_55] : memref<32x128xf32, #tpu.memory_space<vmem>>, vector<16x128xf32>
      tpu.vector_store %arg12[%c0_54, %c0_55], %54 {strides = array<i32>} : memref<32x128xf32, #tpu.memory_space<vmem>>, vector<16x128xf32>,
      %cst_56 = arith.constant 0.000000e+00 : f32
      %56 = vector.broadcast %cst_56 : f32 to vector<16x128xf32>
      %c0_57 = arith.constant 0 : index
      %c0_58 = arith.constant 0 : index
      %57 = vector.load %arg13[%c0_57, %c0_58] : memref<32x128xf32, #tpu.memory_space<vmem>>, vector<16x128xf32>
      tpu.vector_store %arg13[%c0_57, %c0_58], %56 {strides = array<i32>} : memref<32x128xf32, #tpu.memory_space<vmem>>, vector<16x128xf32>,
      %cst_59 = arith.constant 0.000000e+00 : f32
      %58 = vector.broadcast %cst_59 : f32 to vector<16x128xf32>
      %c0_60 = arith.constant 0 : index
      %c0_61 = arith.constant 0 : index
      %59 = vector.load %arg14[%c0_60, %c0_61] : memref<32x128xf32, #tpu.memory_space<vmem>>, vector<16x128xf32>
      tpu.vector_store %arg14[%c0_60, %c0_61], %58 {strides = array<i32>} : memref<32x128xf32, #tpu.memory_space<vmem>>, vector<16x128xf32>,
    } else {
    }
    %c0_i32_1 = arith.constant 0 : i32
    %3 = arith.cmpi sgt, %arg1, %c0_i32_1 : i32
    %4 = arith.extui %3 : i1 to i32
    %c0_i32_2 = arith.constant 0 : i32
    %5 = arith.cmpi ne, %4, %c0_i32_2 : i32
    scf.if %5 {
      %c22 = arith.constant 22 : index
      %c0_53 = arith.constant 0 : index
      %54 = vector.load %arg12[%c22, %c0_53] : memref<32x128xf32, #tpu.memory_space<vmem>>, vector<10x128xf32>
      %c6_54 = arith.constant 6 : index
      %c0_55 = arith.constant 0 : index
      %55 = vector.load %arg12[%c6_54, %c0_55] : memref<32x128xf32, #tpu.memory_space<vmem>>, vector<10x128xf32>
      tpu.vector_store %arg12[%c6_54, %c0_55], %54 {strides = array<i32>} : memref<32x128xf32, #tpu.memory_space<vmem>>, vector<10x128xf32>,
      %c22_56 = arith.constant 22 : index
      %c0_57 = arith.constant 0 : index
      %56 = vector.load %arg13[%c22_56, %c0_57] : memref<32x128xf32, #tpu.memory_space<vmem>>, vector<10x128xf32>
      %c6_58 = arith.constant 6 : index
      %c0_59 = arith.constant 0 : index
      %57 = vector.load %arg13[%c6_58, %c0_59] : memref<32x128xf32, #tpu.memory_space<vmem>>, vector<10x128xf32>
      tpu.vector_store %arg13[%c6_58, %c0_59], %56 {strides = array<i32>} : memref<32x128xf32, #tpu.memory_space<vmem>>, vector<10x128xf32>,
      %c22_60 = arith.constant 22 : index
      %c0_61 = arith.constant 0 : index
      %58 = vector.load %arg14[%c22_60, %c0_61] : memref<32x128xf32, #tpu.memory_space<vmem>>, vector<10x128xf32>
      %c6_62 = arith.constant 6 : index
      %c0_63 = arith.constant 0 : index
      %59 = vector.load %arg14[%c6_62, %c0_63] : memref<32x128xf32, #tpu.memory_space<vmem>>, vector<10x128xf32>
      tpu.vector_store %arg14[%c6_62, %c0_63], %58 {strides = array<i32>} : memref<32x128xf32, #tpu.memory_space<vmem>>, vector<10x128xf32>,
    } else {
    }
    %c0 = arith.constant 0 : index
    %c0_3 = arith.constant 0 : index
    %c0_4 = arith.constant 0 : index
    %6 = vector.load %arg2[%c0, %c0_3, %c0_4] : memref<1x16x128xf32, #tpu.memory_space<vmem>>, vector<1x16x128xf32>
    %7 = vector.shape_cast %6 : vector<1x16x128xf32> to vector<16x128xf32>
    %c16 = arith.constant 16 : index
    %c0_5 = arith.constant 0 : index
    %8 = vector.load %arg12[%c16, %c0_5] : memref<32x128xf32, #tpu.memory_space<vmem>>, vector<16x128xf32>
    tpu.vector_store %arg12[%c16, %c0_5], %7 {strides = array<i32>} : memref<32x128xf32, #tpu.memory_space<vmem>>, vector<16x128xf32>,
    %c6 = arith.constant 6 : index
    %c0_6 = arith.constant 0 : index
    %9 = vector.load %arg12[%c6, %c0_6] : memref<32x128xf32, #tpu.memory_space<vmem>>, vector<16x128xf32>
    %c11 = arith.constant 11 : index
    %c0_7 = arith.constant 0 : index
    %10 = vector.load %arg12[%c11, %c0_7] : memref<32x128xf32, #tpu.memory_space<vmem>>, vector<16x128xf32>
    %c16_8 = arith.constant 16 : index
    %c0_9 = arith.constant 0 : index
    %11 = vector.load %arg12[%c16_8, %c0_9] : memref<32x128xf32, #tpu.memory_space<vmem>>, vector<16x128xf32>
    %12 = tpu.concatenate %9, %10, %11 in 1 : vector<16x128xf32>, vector<16x128xf32>, vector<16x128xf32> -> vector<16x384xf32>
    %c0_10 = arith.constant 0 : index
    %c0_11 = arith.constant 0 : index
    %13 = vector.load %arg3[%c0_10, %c0_11] : memref<384x128xf32, #tpu.memory_space<vmem>>, vector<384x128xf32>
    %cst = arith.constant dense<0.000000e+00> : vector<16x128xf32>
    %14 = tpu.matmul %12, %13, %cst {dimension_numbers = #tpu.dot_dimension_numbers<[1], [0], [0], [1], [0, 0, 1, 1], [], []>} : vector<16x384xf32>, vector<384x128xf32>, vector<16x128xf32> -> vector<16x128xf32>
    %c0_12 = arith.constant 0 : index
    %c0_13 = arith.constant 0 : index
    %15 = vector.load %arg4[%c0_12, %c0_13] : memref<1x128xf32, #tpu.memory_space<vmem>>, vector<1x128xf32>
    %16 = vector.broadcast %15 : vector<1x128xf32> to vector<16x128xf32>
    %17 = arith.addf %14, %16 : vector<16x128xf32>
    %cst_14 = arith.constant 0.000000e+00 : f32
    %18 = vector.broadcast %cst_14 : f32 to vector<16x128xf32>
    %19 = arith.maximumf %17, %18 : vector<16x128xf32>
    %c16_15 = arith.constant 16 : index
    %c0_16 = arith.constant 0 : index
    %20 = vector.load %arg13[%c16_15, %c0_16] : memref<32x128xf32, #tpu.memory_space<vmem>>, vector<16x128xf32>
    tpu.vector_store %arg13[%c16_15, %c0_16], %19 {strides = array<i32>} : memref<32x128xf32, #tpu.memory_space<vmem>>, vector<16x128xf32>,
    %c6_17 = arith.constant 6 : index
    %c0_18 = arith.constant 0 : index
    %21 = vector.load %arg13[%c6_17, %c0_18] : memref<32x128xf32, #tpu.memory_space<vmem>>, vector<16x128xf32>
    %c11_19 = arith.constant 11 : index
    %c0_20 = arith.constant 0 : index
    %22 = vector.load %arg13[%c11_19, %c0_20] : memref<32x128xf32, #tpu.memory_space<vmem>>, vector<16x128xf32>
    %c16_21 = arith.constant 16 : index
    %c0_22 = arith.constant 0 : index
    %23 = vector.load %arg13[%c16_21, %c0_22] : memref<32x128xf32, #tpu.memory_space<vmem>>, vector<16x128xf32>
    %24 = tpu.concatenate %21, %22, %23 in 1 : vector<16x128xf32>, vector<16x128xf32>, vector<16x128xf32> -> vector<16x384xf32>
    %c0_23 = arith.constant 0 : index
    %c0_24 = arith.constant 0 : index
    %25 = vector.load %arg5[%c0_23, %c0_24] : memref<384x128xf32, #tpu.memory_space<vmem>>, vector<384x128xf32>
    %cst_25 = arith.constant dense<0.000000e+00> : vector<16x128xf32>
    %26 = tpu.matmul %24, %25, %cst_25 {dimension_numbers = #tpu.dot_dimension_numbers<[1], [0], [0], [1], [0, 0, 1, 1], [], []>} : vector<16x384xf32>, vector<384x128xf32>, vector<16x128xf32> -> vector<16x128xf32>
    %c0_26 = arith.constant 0 : index
    %c0_27 = arith.constant 0 : index
    %27 = vector.load %arg6[%c0_26, %c0_27] : memref<1x128xf32, #tpu.memory_space<vmem>>, vector<1x128xf32>
    %28 = vector.broadcast %27 : vector<1x128xf32> to vector<16x128xf32>
    %29 = arith.addf %26, %28 : vector<16x128xf32>
    %cst_28 = arith.constant 0.000000e+00 : f32
    %30 = vector.broadcast %cst_28 : f32 to vector<16x128xf32>
    %31 = arith.maximumf %29, %30 : vector<16x128xf32>
    %c16_29 = arith.constant 16 : index
    %c0_30 = arith.constant 0 : index
    %32 = vector.load %arg14[%c16_29, %c0_30] : memref<32x128xf32, #tpu.memory_space<vmem>>, vector<16x128xf32>
    tpu.vector_store %arg14[%c16_29, %c0_30], %31 {strides = array<i32>} : memref<32x128xf32, #tpu.memory_space<vmem>>, vector<16x128xf32>,
    %c6_31 = arith.constant 6 : index
    %c0_32 = arith.constant 0 : index
    %33 = vector.load %arg14[%c6_31, %c0_32] : memref<32x128xf32, #tpu.memory_space<vmem>>, vector<16x128xf32>
    %c11_33 = arith.constant 11 : index
    %c0_34 = arith.constant 0 : index
    %34 = vector.load %arg14[%c11_33, %c0_34] : memref<32x128xf32, #tpu.memory_space<vmem>>, vector<16x128xf32>
    %c16_35 = arith.constant 16 : index
    %c0_36 = arith.constant 0 : index
    %35 = vector.load %arg14[%c16_35, %c0_36] : memref<32x128xf32, #tpu.memory_space<vmem>>, vector<16x128xf32>
    %36 = tpu.concatenate %33, %34, %35 in 1 : vector<16x128xf32>, vector<16x128xf32>, vector<16x128xf32> -> vector<16x384xf32>
    %c0_37 = arith.constant 0 : index
    %c0_38 = arith.constant 0 : index
    %37 = vector.load %arg7[%c0_37, %c0_38] : memref<384x128xf32, #tpu.memory_space<vmem>>, vector<384x128xf32>
    %cst_39 = arith.constant dense<0.000000e+00> : vector<16x128xf32>
    %38 = tpu.matmul %36, %37, %cst_39 {dimension_numbers = #tpu.dot_dimension_numbers<[1], [0], [0], [1], [0, 0, 1, 1], [], []>} : vector<16x384xf32>, vector<384x128xf32>, vector<16x128xf32> -> vector<16x128xf32>
    %c0_40 = arith.constant 0 : index
    %c0_41 = arith.constant 0 : index
    %39 = vector.load %arg8[%c0_40, %c0_41] : memref<1x128xf32, #tpu.memory_space<vmem>>, vector<1x128xf32>
    %40 = vector.broadcast %39 : vector<1x128xf32> to vector<16x128xf32>
    %41 = arith.addf %38, %40 : vector<16x128xf32>
    %c16_42 = arith.constant 16 : index
    %c0_43 = arith.constant 0 : index
    %42 = vector.load %arg12[%c16_42, %c0_43] : memref<32x128xf32, #tpu.memory_space<vmem>>, vector<16x128xf32>
    %c0_44 = arith.constant 0 : index
    %c0_45 = arith.constant 0 : index
    %43 = vector.load %arg9[%c0_44, %c0_45] : memref<128x128xf32, #tpu.memory_space<vmem>>, vector<128x128xf32>
    %cst_46 = arith.constant dense<0.000000e+00> : vector<16x128xf32>
    %44 = tpu.matmul %42, %43, %cst_46 {dimension_numbers = #tpu.dot_dimension_numbers<[1], [0], [0], [1], [0, 0, 1, 1], [], []>} : vector<16x128xf32>, vector<128x128xf32>, vector<16x128xf32> -> vector<16x128xf32>
    %c0_47 = arith.constant 0 : index
    %c0_48 = arith.constant 0 : index
    %45 = vector.load %arg10[%c0_47, %c0_48] : memref<1x128xf32, #tpu.memory_space<vmem>>, vector<1x128xf32>
    %46 = vector.broadcast %45 : vector<1x128xf32> to vector<16x128xf32>
    %47 = arith.addf %44, %46 : vector<16x128xf32>
    %48 = arith.addf %41, %47 : vector<16x128xf32>
    %cst_49 = arith.constant 0.000000e+00 : f32
    %49 = vector.broadcast %cst_49 : f32 to vector<16x128xf32>
    %50 = arith.maximumf %48, %49 : vector<16x128xf32>
    %c0_50 = arith.constant 0 : index
    %c0_51 = arith.constant 0 : index
    %c0_52 = arith.constant 0 : index
    %51 = vector.load %arg11[%c0_50, %c0_51, %c0_52] : memref<1x16x128xf32, #tpu.memory_space<vmem>>, vector<1x16x128xf32>
    %52 = vector.shape_cast %51 : vector<1x16x128xf32> to vector<16x128xf32>
    %53 = vector.shape_cast %50 : vector<16x128xf32> to vector<1x16x128xf32>
    tpu.vector_store %arg11[%c0_50, %c0_51, %c0_52], %53 {strides = array<i32>} : memref<1x16x128xf32, #tpu.memory_space<vmem>>, vector<1x16x128xf32>,
    return
  }
  func.func @transform_0(%arg0: i32, %arg1: i32) -> (i32, i32, i32) {
    %c0_i32 = arith.constant 0 : i32
    %c0_i32_0 = arith.constant 0 : i32
    return %arg0, %arg1, %c0_i32 : i32, i32, i32
  }
  func.func @transform_1(%arg0: i32, %arg1: i32) -> (i32, i32) {
    %c0_i32 = arith.constant 0 : i32
    %c0_i32_0 = arith.constant 0 : i32
    %c0_i32_1 = arith.constant 0 : i32
    return %c0_i32, %c0_i32_0 : i32, i32
  }
  func.func @transform_2(%arg0: i32, %arg1: i32) -> (i32, i32) {
    %c0_i32 = arith.constant 0 : i32
    %c0_i32_0 = arith.constant 0 : i32
    %c0_i32_1 = arith.constant 0 : i32
    return %c0_i32, %c0_i32_0 : i32, i32
  }
  func.func @transform_3(%arg0: i32, %arg1: i32) -> (i32, i32) {
    %c0_i32 = arith.constant 0 : i32
    %c0_i32_0 = arith.constant 0 : i32
    %c0_i32_1 = arith.constant 0 : i32
    return %c0_i32, %c0_i32_0 : i32, i32
  }
  func.func @transform_4(%arg0: i32, %arg1: i32) -> (i32, i32) {
    %c0_i32 = arith.constant 0 : i32
    %c0_i32_0 = arith.constant 0 : i32
    %c0_i32_1 = arith.constant 0 : i32
    return %c0_i32, %c0_i32_0 : i32, i32
  }
  func.func @transform_5(%arg0: i32, %arg1: i32) -> (i32, i32) {
    %c0_i32 = arith.constant 0 : i32
    %c0_i32_0 = arith.constant 0 : i32
    %c0_i32_1 = arith.constant 0 : i32
    return %c0_i32, %c0_i32_0 : i32, i32
  }
  func.func @transform_6(%arg0: i32, %arg1: i32) -> (i32, i32) {
    %c0_i32 = arith.constant 0 : i32
    %c0_i32_0 = arith.constant 0 : i32
    %c0_i32_1 = arith.constant 0 : i32
    return %c0_i32, %c0_i32_0 : i32, i32
  }
  func.func @transform_7(%arg0: i32, %arg1: i32) -> (i32, i32) {
    %c0_i32 = arith.constant 0 : i32
    %c0_i32_0 = arith.constant 0 : i32
    %c0_i32_1 = arith.constant 0 : i32
    return %c0_i32, %c0_i32_0 : i32, i32
  }
  func.func @transform_8(%arg0: i32, %arg1: i32) -> (i32, i32) {
    %c0_i32 = arith.constant 0 : i32
    %c0_i32_0 = arith.constant 0 : i32
    %c0_i32_1 = arith.constant 0 : i32
    return %c0_i32, %c0_i32_0 : i32, i32
  }
  func.func @transform_9(%arg0: i32, %arg1: i32) -> (i32, i32, i32) {
    %c0_i32 = arith.constant 0 : i32
    %c0_i32_0 = arith.constant 0 : i32
    return %arg0, %arg1, %c0_i32 : i32, i32, i32
  }
}

</mosaic_0001>

<bundles_post_ra>
// kernel: _lambda_.5
= control target key start
LH: loop header
LB: loop body
LE: loop exit
PB: predicated region body
PF: predicated region fallthrough
CT: control target
= control target key end

     0   :  { %s1646_s24 = smov 0   ;;  %s1648_s25 = smov 0   ;;  %s2143_s0 = inlined_call_operand.vmem [shape: f32[2,16,128], index: 0, kind: input, shape index: {}]   ;;  %s2144_s1 = inlined_call_operand.vmem [shape: f32[384,128], index: 1, kind: input, shape index: {}]   ;;  %s2145_s2 = inlined_call_operand.vmem [shape: f32[1,128], index: 2, kind: input, shape index: {}, may-alias: {2,4,6}]   ;;  %s2146_s3 = inlined_call_operand.vmem [shape: f32[384,128], index: 3, kind: input, shape index: {}]   ;;  %s2147_s4 = inlined_call_operand.vmem [shape: f32[1,128], index: 4, kind: input, shape index: {}, may-alias: {2,4,6}]   ;;  %s2148_s5 = inlined_call_operand.vmem [shape: f32[384,128], index: 5, kind: input, shape index: {}]   ;;  %s2149_s6 = inlined_call_operand.vmem [shape: f32[1,128], index: 6, kind: input, shape index: {}, may-alias: {2,4,6}]   ;;  %s2150_s7 = inlined_call_operand.vmem [shape: f32[2,16,128], index: 7, kind: output, shape index: {}]  }
   0x1   :  { %s1650_s26 = smov 0  }
   0x2 LB: > { %s29_s27 = sadd.s32 1, %s1599_s25  ;;  %p1079_p0 = scmp.ge.s32.totalorder %s1603_s26, 1  ;;  %s1603_s26 = sphi %s1650_s26, %s17_s26   ;;  %s1599_s25 = sphi %s1648_s25, %s2152_s25   ;;  %s1595_s24 = sphi %s1646_s24, %s2151_s24  }
   0x3   : > { %p31_p1 = scmp.ge.s32.totalorder %s29_s27, 2  ;;  %p258_p2 = scmp.lt.s32.totalorder %s1603_s26, 3 }
   0x5   : > { %s2154_s27 = smov (%p31_p1, %s29_s27), 0  ;;  %p259_p3 = pnand %p1079_p0, %p258_p2 }
   0x6   : > { %v361_v0 = vld [vmem:[%s2144_s1 + $0x80] sm:$0xff] (!%p259_p3)  ;;  %v362_v1 = vld [vmem:[%s2144_s1 + $0x88] sm:$0xff] (!%p259_p3)  ;;  %p299_p4 = scmp.lt.s32.totalorder (!%p259_p3), %s1595_s24, 1  ;;  %v1605_v7 = vmov (!%p259_p3), 0.0   ;;  %v363_v10 = vld [vmem:[%s2144_s1 + $0x90] sm:$0xff] (!%p259_p3) }
   0x7   : > { %262 = sbr.rel (%p259_p3) target bundleno = 729 (0x2d9), region = 48  ;;  %v345_v2 = vld [vmem:[%s2144_s1] sm:$0xff] (!%p259_p3)  ;;  %v1364_v3 = vpack.c.bf16 (!%p259_p3), %v362_v1, %v361_v0  ;;  %v346_v4 = vld [vmem:[%s2144_s1 + $0x8] sm:$0xff] (!%p259_p3)  ;;  %322 = vst [vmem:[#allocation2] sm:$0xff] (!%p259_p3), %v1605_v7  ;;  %323 = vst [vmem:[#allocation3] sm:$0xff] (!%p259_p3), %v1605_v7 }
   0x8   : > { %v377_v5 = vld [vmem:[%s2144_s1 + $0x100] sm:$0xff] (!%p259_p3)  ;;  %v378_v6 = vld [vmem:[%s2144_s1 + $0x108] sm:$0xff] (!%p259_p3)  ;;  %324 = vst [vmem:[#allocation4] sm:$0xff] (!%p259_p3), %v1605_v7  ;;  %v1366_v8 = vpack.c.bf16 (!%p259_p3), %v346_v4, %v345_v2  ;;  %v364_v11 = vld [vmem:[%s2144_s1 + $0x98] sm:$0xff] (!%p259_p3) }
   0x9   : > { %v1396_v9 = vpack.c.bf16 (!%p259_p3), %v378_v6, %v377_v5  ;;  %v347_v12 = vld [vmem:[%s2144_s1 + $0x10] sm:$0xff] (!%p259_p3)  ;;  %1365 = vmatprep.subr.bf16.mxu0 (!%p259_p3), %v1364_v3  ;;  %v1368_v13 = vpack.c.bf16 (!%p259_p3), %v364_v11, %v363_v10  ;;  %v348_v14 = vld [vmem:[%s2144_s1 + $0x18] sm:$0xff] (!%p259_p3)  ;;  %v365_v19 = vld [vmem:[%s2144_s1 + $0xa0] sm:$0xff] (!%p259_p3) }
   0xa   : > { %v379_v15 = vld [vmem:[%s2144_s1 + $0x110] sm:$0xff] (!%p259_p3)  ;;  %v380_v16 = vld [vmem:[%s2144_s1 + $0x118] sm:$0xff] (!%p259_p3)  ;;  %1367 = vmatpush3.bf16.msra.mxu0 (!%p259_p3), %v1366_v8  ;;  %v1370_v17 = vpack.c.bf16 (!%p259_p3), %v348_v14, %v347_v12  ;;  %v366_v20 = vld [vmem:[%s2144_s1 + $0xa8] sm:$0xff] (!%p259_p3) }
   0xb   : > { %1397 = vmatprep.subr.bf16.mxu1 (!%p259_p3), %v1396_v9  ;;  %v1400_v18 = vpack.c.bf16 (!%p259_p3), %v380_v16, %v379_v15  ;;  %v349_v21 = vld [vmem:[%s2144_s1 + $0x20] sm:$0xff] (!%p259_p3)  ;;  %1369 = vmatprep.subr.bf16.mxu0 (!%p259_p3), %v1368_v13  ;;  %v1372_v22 = vpack.c.bf16 (!%p259_p3), %v366_v20, %v365_v19  ;;  %v350_v23 = vld [vmem:[%s2144_s1 + $0x28] sm:$0xff] (!%p259_p3)  ;;  %v367_v27 = vld [vmem:[%s2144_s1 + $0xb0] sm:$0xff] (!%p259_p3) }
   0xc   : > { %1399 = vmatpush3.bf16.msra.mxu1 (!%p259_p3), %v1396_v9  ;;  %v381_v24 = vld [vmem:[%s2144_s1 + $0x120] sm:$0xff] (!%p259_p3)  ;;  %v382_v25 = vld [vmem:[%s2144_s1 + $0x128] sm:$0xff] (!%p259_p3)  ;;  %v368_v28 = vld [vmem:[%s2144_s1 + $0xb8] sm:$0xff] (!%p259_p3)  ;;  %v1374_v31 = vpack.c.bf16 (!%p259_p3), %v350_v23, %v349_v21 }
   0xd   : > { %1401 = vmatprep.subr.bf16.mxu1 (!%p259_p3), %v1400_v18  ;;  %v1404_v26 = vpack.c.bf16 (!%p259_p3), %v382_v25, %v381_v24  ;;  %v383_v29 = vld [vmem:[%s2144_s1 + $0x130] sm:$0xff] (!%p259_p3)  ;;  %v384_v30 = vld [vmem:[%s2144_s1 + $0x138] sm:$0xff] (!%p259_p3)  ;;  %v1376_v32 = vpack.c.bf16 (!%p259_p3), %v368_v28, %v367_v27  ;;  %v369_v36 = vld [vmem:[%s2144_s1 + $0xc0] sm:$0xff] (!%p259_p3) }
   0xe   : > { %s2156_s24 = smov (!%p299_p4, %s1595_s24), 1  ;;  %1371 = vmatpush3.bf16.msra.mxu0 %v1370_v17  ;;  %v351_v33 = vld [vmem:[%s2144_s1 + $0x30] sm:$0xff]  ;;  %v352_v34 = vld [vmem:[%s2144_s1 + $0x38] sm:$0xff]  ;;  %v1408_v35 = vpack.c.bf16 %v384_v30, %v383_v29  ;;  %v370_v37 = vld [vmem:[%s2144_s1 + $0xc8] sm:$0xff] }
   0xf   : > { %1373 = vmatprep.subr.bf16.mxu0 %v1372_v22  ;;  %s1089_s15 = sshll.u32 %s2156_s24, 4  ;;  %v385_v38 = vld [vmem:[%s2144_s1 + $0x140] sm:$0xff]  ;;  %v386_v39 = vld [vmem:[%s2144_s1 + $0x148] sm:$0xff]  ;;  %v1378_v40 = vpack.c.bf16 %v352_v34, %v351_v33  ;;  %v1380_v41 = vpack.c.bf16 %v370_v37, %v369_v36  ;;  %v371_v45 = vld [vmem:[%s2144_s1 + $0xd0] sm:$0xff] }
  0x10   : > { %1403 = vmatpush3.bf16.msra.mxu1 %v1400_v18  ;;  %s306_s30 = scalar_lea.vmem %s2143_s0, %s1089_s15  ;;  %v353_v42 = vld [vmem:[%s2144_s1 + $0x40] sm:$0xff]  ;;  %v354_v43 = vld [vmem:[%s2144_s1 + $0x48] sm:$0xff]  ;;  %v1412_v44 = vpack.c.bf16 %v386_v39, %v385_v38  ;;  %v372_v46 = vld [vmem:[%s2144_s1 + $0xd8] sm:$0xff]  ;;  %s316_s14 = scalar_lea.vmem %s2150_s7, %s1089_s15 }
  0x11   : > { %1405 = vmatprep.subr.bf16.mxu1 %v1404_v26  ;;  %v387_v47 = vld [vmem:[%s2144_s1 + $0x150] sm:$0xff]  ;;  %v388_v48 = vld [vmem:[%s2144_s1 + $0x158] sm:$0xff]  ;;  %v1780_v49 = vld [vmem:[%s306_s30] sm:$0xff]  ;;  %v1382_v50 = vpack.c.bf16 %v354_v43, %v353_v42  ;;  %v1384_v52 = vpack.c.bf16 %v372_v46, %v371_v45 }
  0x12   : > { %1375 = vmatpush3.bf16.msra.mxu0 %v1374_v31  ;;  %337 = vst [vmem:[#allocation2 + $0x8] sm:$0xff] %v1780_v49  ;;  %1291 = vmatprep.mubr.f32.mxu1 %v1780_v49  ;;  %v1784_v51 = vld [vmem:[%s306_s30 + $0x8] sm:$0xff]  ;;  %v355_v53 = vld [vmem:[%s2144_s1 + $0x50] sm:$0xff]  ;;  %v356_v54 = vld [vmem:[%s2144_s1 + $0x58] sm:$0xff]  ;;  %v1416_v55 = vpack.c.bf16 %v388_v48, %v387_v47 }
  0x13   : > { %1377 = vmatprep.subr.bf16.mxu0 %v1376_v32  ;;  %338 = vst [vmem:[#allocation2 + $0x10] sm:$0xff] %v1784_v51  ;;  %v373_v56 = vld [vmem:[%s2144_s1 + $0xe0] sm:$0xff]  ;;  %v374_v57 = vld [vmem:[%s2144_s1 + $0xe8] sm:$0xff]  ;;  %v1386_v60 = vpack.c.bf16 %v356_v54, %v355_v53  ;;  %v375_v1 = vld [vmem:[%s2144_s1 + $0xf0] sm:$0xff] }
  0x14   : > { %1407 = vmatpush3.bf16.msra.mxu1 %v1404_v26  ;;  %v389_v58 = vld [vmem:[%s2144_s1 + $0x160] sm:$0xff]  ;;  %v390_v59 = vld [vmem:[%s2144_s1 + $0x168] sm:$0xff]  ;;  %v1388_v61 = vpack.c.bf16 %v374_v57, %v373_v56  ;;  %v376_v2 = vld [vmem:[%s2144_s1 + $0xf8] sm:$0xff] }
  0x15   : > { %1409 = vmatprep.subr.bf16.mxu1 %v1408_v35  ;;  %v357_v62 = vld [vmem:[%s2144_s1 + $0x60] sm:$0xff]  ;;  %v358_v63 = vld [vmem:[%s2144_s1 + $0x68] sm:$0xff]  ;;  %v1420_v0 = vpack.c.bf16 %v390_v59, %v389_v58  ;;  %v391_v4 = vld [vmem:[%s2144_s1 + $0x170] sm:$0xff]  ;;  %v1392_v7 = vpack.c.bf16 %v376_v2, %v375_v1 }
  0x16   : > { %1379 = vmatpush3.bf16.msra.mxu0 %v1378_v40  ;;  %v392_v5 = vld [vmem:[%s2144_s1 + $0x178] sm:$0xff]  ;;  %v1390_v6 = vpack.c.bf16 %v358_v63, %v357_v62  ;;  %v359_v8 = vld [vmem:[%s2144_s1 + $0x70] sm:$0xff]  ;;  %v576_v11 = vld [vmem:[%s2146_s3 + $0x80] sm:$0xff] }
  0x17   : > { %1381 = vmatprep.subr.bf16.mxu0 %v1380_v41  ;;  %v360_v9 = vld [vmem:[%s2144_s1 + $0x78] sm:$0xff]  ;;  %v1424_v10 = vpack.c.bf16 %v392_v5, %v391_v4  ;;  %v577_v12 = vld [vmem:[%s2146_s3 + $0x88] sm:$0xff]  ;;  %v592_v13 = vld [vmem:[%s2146_s3 + $0x100] sm:$0xff] }
  0x18   : > { %1411 = vmatpush3.bf16.msra.mxu1 %v1408_v35  ;;  %v593_v14 = vld [vmem:[%s2146_s3 + $0x108] sm:$0xff]  ;;  %v1394_v15 = vpack.c.bf16 %v360_v9, %v359_v8  ;;  %v1428_v16 = vpack.c.bf16 %v577_v12, %v576_v11  ;;  %v560_v17 = vld [vmem:[%s2146_s3] sm:$0xff]  ;;  %v578_v20 = vld [vmem:[%s2146_s3 + $0x90] sm:$0xff] }
  0x19   : > { %1413 = vmatprep.subr.bf16.mxu1 %v1412_v44  ;;  %v341_v3 = vld [vmem:[#allocation2 + $0x6] sm:$0xff]  ;;  %v1460_v19 = vpack.c.bf16 %v593_v14, %v592_v13  ;;  %v579_v21 = vld [vmem:[%s2146_s3 + $0x98] sm:$0xff]  ;;  %v594_v22 = vld [vmem:[%s2146_s3 + $0x110] sm:$0xff] }
  0x1a   : > { %1383 = vmatpush3.bf16.msra.mxu0 %v1382_v50  ;;  %464 = vmatprep.mubr.f32.mxu0 %v341_v3  ;;  %v561_v18 = vld [vmem:[%s2146_s3 + $0x8] sm:$0xff]  ;;  %v595_v23 = vld [vmem:[%s2146_s3 + $0x118] sm:$0xff]  ;;  %v1432_v27 = vpack.c.bf16 %v579_v21, %v578_v20  ;;  %v562_v28 = vld [vmem:[%s2146_s3 + $0x10] sm:$0xff] }
  0x1b   : > { %1385 = vmatprep.subr.bf16.mxu0 %v1384_v52  ;;  %v339_v24 = vld [vmem:[#allocation2 + $0x4] sm:$0xff]  ;;  %v342_v25 = vld [vmem:[#allocation2 + $0xe] sm:$0xff]  ;;  %v1430_v26 = vpack.c.bf16 %v561_v18, %v560_v17  ;;  %v563_v29 = vld [vmem:[%s2146_s3 + $0x18] sm:$0xff]  ;;  %v1464_v30 = vpack.c.bf16 %v595_v23, %v594_v22 }
  0x1c   : > { %1415 = vmatpush3.bf16.msra.mxu1 %v1412_v44  ;;  %v580_v31 = vld [vmem:[%s2146_s3 + $0xa0] sm:$0xff]  ;;  %v581_v32 = vld [vmem:[%s2146_s3 + $0xa8] sm:$0xff]  ;;  %v1434_v36 = vpack.c.bf16 %v563_v29, %v562_v28  ;;  %v582_v41 = vld [vmem:[%s2146_s3 + $0xb0] sm:$0xff] }
  0x1d   : > { %1417 = vmatprep.subr.bf16.mxu1 %v1416_v55  ;;  %v596_v33 = vld [vmem:[%s2146_s3 + $0x120] sm:$0xff]  ;;  %v597_v34 = vld [vmem:[%s2146_s3 + $0x128] sm:$0xff]  ;;  %v1436_v37 = vpack.c.bf16 %v581_v32, %v580_v31  ;;  %v583_v42 = vld [vmem:[%s2146_s3 + $0xb8] sm:$0xff] }
  0x1e   : > { %1387 = vmatpush3.bf16.msra.mxu0 %v1386_v60  ;;  %v340_v35 = vld [vmem:[#allocation2 + $0xc] sm:$0xff]  ;;  %v564_v38 = vld [vmem:[%s2146_s3 + $0x20] sm:$0xff]  ;;  %v1468_v40 = vpack.c.bf16 %v597_v34, %v596_v33  ;;  %v1440_v44 = vpack.c.bf16 %v583_v42, %v582_v41  ;;  %v599_v46 = vld [vmem:[%s2146_s3 + $0x138] sm:$0xff] }
  0x1f   : > { %1389 = vmatprep.subr.bf16.mxu0 %v1388_v61  ;;  %v565_v39 = vld [vmem:[%s2146_s3 + $0x28] sm:$0xff]  ;;  %v598_v45 = vld [vmem:[%s2146_s3 + $0x130] sm:$0xff]  ;;  %v600_v48 = vld [vmem:[%s2146_s3 + $0x140] sm:$0xff] }
  0x20   : > { %1419 = vmatpush3.bf16.msra.mxu1 %v1416_v55  ;;  %v1438_v43 = vpack.c.bf16 %v565_v39, %v564_v38  ;;  %v1472_v47 = vpack.c.bf16 %v599_v46, %v598_v45  ;;  %v601_v50 = vld [vmem:[%s2146_s3 + $0x148] sm:$0xff]  ;;  %v566_v53 = vld [vmem:[%s2146_s3 + $0x30] sm:$0xff]  ;;  %v567_v54 = vld [vmem:[%s2146_s3 + $0x38] sm:$0xff] }
  0x21   : > { %1421 = vmatprep.subr.bf16.mxu1 %v1420_v0  ;;  %v1476_v52 = vpack.c.bf16 %v601_v50, %v600_v48  ;;  %v1442_v55 = vpack.c.bf16 %v567_v54, %v566_v53  ;;  %v602_v56 = vld [vmem:[%s2146_s3 + $0x150] sm:$0xff]  ;;  %v603_v57 = vld [vmem:[%s2146_s3 + $0x158] sm:$0xff]  ;;  %v584_v58 = vld [vmem:[%s2146_s3 + $0xc0] sm:$0xff] }
  0x22   : > { %1391 = vmatpush3.bf16.msra.mxu0 %v1390_v6  ;;  %v585_v59 = vld [vmem:[%s2146_s3 + $0xc8] sm:$0xff]  ;;  %v1480_v60 = vpack.c.bf16 %v603_v57, %v602_v56  ;;  %v568_v62 = vld [vmem:[%s2146_s3 + $0x40] sm:$0xff]  ;;  %v586_v3 = vld [vmem:[%s2146_s3 + $0xd0] sm:$0xff] }
  0x23   : > { %1393 = vmatprep.subr.bf16.mxu0 %v1392_v7  ;;  %v1444_v61 = vpack.c.bf16 %v585_v59, %v584_v58  ;;  %v569_v63 = vld [vmem:[%s2146_s3 + $0x48] sm:$0xff]  ;;  %v604_v1 = vld [vmem:[%s2146_s3 + $0x160] sm:$0xff]  ;;  %v587_v4 = vld [vmem:[%s2146_s3 + $0xd8] sm:$0xff] }
  0x24   : > { %1423 = vmatpush3.bf16.msra.mxu1 %v1420_v0  ;;  %v1446_v0 = vpack.c.bf16 %v569_v63, %v568_v62  ;;  %v605_v2 = vld [vmem:[%s2146_s3 + $0x168] sm:$0xff]  ;;  %v1448_v6 = vpack.c.bf16 %v587_v4, %v586_v3  ;;  %v570_v7 = vld [vmem:[%s2146_s3 + $0x50] sm:$0xff]  ;;  %v571_v8 = vld [vmem:[%s2146_s3 + $0x58] sm:$0xff] }
  0x25   : > { %1425 = vmatprep.subr.bf16.mxu1 %v1424_v10  ;;  %v1484_v5 = vpack.c.bf16 %v605_v2, %v604_v1  ;;  %v1450_v9 = vpack.c.bf16 %v571_v8, %v570_v7  ;;  %v607_v11 = vld [vmem:[%s2146_s3 + $0x178] sm:$0xff]  ;;  %v588_v12 = vld [vmem:[%s2146_s3 + $0xe0] sm:$0xff]  ;;  %v589_v13 = vld [vmem:[%s2146_s3 + $0xe8] sm:$0xff] }
  0x26   : > { %1395 = vmatpush3.bf16.msra.mxu0 %v1394_v15  ;;  %v1452_v15 = vpack.c.bf16 %v589_v13, %v588_v12  ;;  %v573_v17 = vld [vmem:[%s2146_s3 + $0x68] sm:$0xff]  ;;  %v591_v20 = vld [vmem:[%s2146_s3 + $0xf8] sm:$0xff]  ;;  %v574_v22 = vld [vmem:[%s2146_s3 + $0x70] sm:$0xff] }
  0x27   : > { %1429 = vmatprep.subr.bf16.mxu0 %v1428_v16  ;;  %v572_v16 = vld [vmem:[%s2146_s3 + $0x60] sm:$0xff]  ;;  %v575_v23 = vld [vmem:[%s2146_s3 + $0x78] sm:$0xff]  ;;  %v808_v29 = vld [vmem:[%s2148_s5 + $0x108] sm:$0xff] }
  0x28   : > { %1427 = vmatpush3.bf16.msra.mxu1 %v1424_v10  ;;  %v606_v10 = vld [vmem:[%s2146_s3 + $0x170] sm:$0xff]  ;;  %v1454_v18 = vpack.c.bf16 %v573_v17, %v572_v16  ;;  %v807_v28 = vld [vmem:[%s2148_s5 + $0x100] sm:$0xff]  ;;  %v810_v45 = vld [vmem:[%s2148_s5 + $0x118] sm:$0xff] }
  0x29   : > { %1461 = vmatprep.subr.bf16.mxu1 %v1460_v19  ;;  %465 = vmatmul.mubr.f32.vlgmr.msra.gmra.mrb[0].mxu0 %v339_v24  ;;  %v1488_v14 = vpack.c.bf16 %v607_v11, %v606_v10  ;;  %v1458_v24 = vpack.c.bf16 %v575_v23, %v574_v22  ;;  %v1084_v34 = vld [vmem:[%s2145_s2] ss:$0 sm:$0xff]  ;;  %v812_v54 = vld [vmem:[%s2148_s5 + $0x128] sm:$0xff]  ;;  %v794_v56 = vld [vmem:[%s2148_s5 + $0x98] sm:$0xff] }
  0x2a   : > { %469 = vmatprep.mubr.f32.mxu0 %v342_v25  ;;  %1431 = vmatpush3.bf16.msra.mxu0 %v1430_v26  ;;  %v791_v25 = vld [vmem:[%s2148_s5 + $0x80] sm:$0xff]  ;;  %v792_v26 = vld [vmem:[%s2148_s5 + $0x88] sm:$0xff]  ;;  %v777_v58 = vld [vmem:[%s2148_s5 + $0x10] sm:$0xff] }
  0x2b   : > { %1292 = vmatmul.mubr.f32.vlgmr.msra.gmra.mrb[0].mxu1 %v1784_v51  ;;  %1433 = vmatprep.subr.bf16.mxu0 %v1432_v27  ;;  %v1492_v27 = vpack.c.bf16 %v792_v26, %v791_v25  ;;  %v775_v48 = vld [vmem:[%s2148_s5] sm:$0xff]  ;;  %v778_v63 = vld [vmem:[%s2148_s5 + $0x18] sm:$0xff]  ;;  %v796_v1 = vld [vmem:[%s2148_s5 + $0xa8] sm:$0xff] }
  0x2c   : > { %1463 = vmatpush3.bf16.msra.mxu1 %v1460_v19  ;;  %v590_v19 = vld [vmem:[%s2146_s3 + $0xf0] sm:$0xff]  ;;  %v811_v53 = vld [vmem:[%s2148_s5 + $0x120] sm:$0xff]  ;;  %v1498_v2 = vpack.c.bf16 %v778_v63, %v777_v58  ;;  %v780_v7 = vld [vmem:[%s2148_s5 + $0x28] sm:$0xff] }
  0x2d   : > { %1465 = vmatprep.subr.bf16.mxu1 %v1464_v30  ;;  %470 = vmatmul.mubr.f32.gmra.mrb[2].mxu0 %v340_v35  ;;  %v1456_v21 = vpack.c.bf16 %v591_v20, %v590_v19  ;;  %v1532_v59 = vpack.c.bf16 %v812_v54, %v811_v53  ;;  %v779_v3 = vld [vmem:[%s2148_s5 + $0x20] sm:$0xff]  ;;  %v797_v8 = vld [vmem:[%s2148_s5 + $0xb0] sm:$0xff]  ;;  %v814_v13 = vld [vmem:[%s2148_s5 + $0x138] sm:$0xff] }
  0x2e   : > { %1435 = vmatpush3.bf16.msra.mxu0 %v1434_v36  ;;  %v1502_v10 = vpack.c.bf16 %v780_v7, %v779_v3  ;;  %v813_v12 = vld [vmem:[%s2148_s5 + $0x130] sm:$0xff]  ;;  %v816_v16 = vld [vmem:[%s2148_s5 + $0x148] sm:$0xff]  ;;  %v782_v19 = vld [vmem:[%s2148_s5 + $0x38] sm:$0xff] }
  0x2f   : > { %1437 = vmatprep.subr.bf16.mxu0 %v1436_v37  ;;  %v818_v22 = vld [vmem:[%s2148_s5 + $0x158] sm:$0xff]  ;;  %v799_v23 = vld [vmem:[%s2148_s5 + $0xc0] sm:$0xff]  ;;  %v789_v53 = vld [vmem:[%s2148_s5 + $0x70] sm:$0xff] }
  0x30   : > { %1467 = vmatpush3.bf16.msra.mxu1 %v1464_v30  ;;  %v1524_v30 = vpack.c.bf16 %v808_v29, %v807_v28  ;;  %v784_v28 = vld [vmem:[%s2148_s5 + $0x48] sm:$0xff]  ;;  %v790_v54 = vld [vmem:[%s2148_s5 + $0x78] sm:$0xff] }
  0x31   : > { %1469 = vmatprep.subr.bf16.mxu1 %v1468_v40 }
  0x32   : > { %1439 = vmatpush3.bf16.msra.mxu0 %v1438_v43 }
  0x33   : > { %1441 = vmatprep.subr.bf16.mxu0 %v1440_v44  ;;  %v809_v44 = vld [vmem:[%s2148_s5 + $0x110] sm:$0xff] }
  0x34   : > { %1471 = vmatpush3.bf16.msra.mxu1 %v1468_v40  ;;  %v1528_v50 = vpack.c.bf16 %v810_v45, %v809_v44  ;;  %v787_v45 = vld [vmem:[%s2148_s5 + $0x60] sm:$0xff] }
  0x35   : > { %1473 = vmatprep.subr.bf16.mxu1 %v1472_v47 }
  0x36   : > { %1443 = vmatpush3.bf16.msra.mxu0 %v1442_v55  ;;  %v793_v55 = vld [vmem:[%s2148_s5 + $0x90] sm:$0xff] }
  0x37   : > { %1445 = vmatprep.subr.bf16.mxu0 %v1444_v61  ;;  %v1496_v62 = vpack.c.bf16 %v794_v56, %v793_v55  ;;  %v1522_v55 = vpack.c.bf16 %v790_v54, %v789_v53 }
  0x38   : > { %1475 = vmatpush3.bf16.msra.mxu1 %v1472_v47 }
  0x39   : > { %1477 = vmatprep.subr.bf16.mxu1 %v1476_v52 }
  0x3a   : > { %1447 = vmatpush3.bf16.msra.mxu0 %v1446_v0  ;;  %v795_v0 = vld [vmem:[%s2148_s5 + $0xa0] sm:$0xff] }
  0x3b   : > { %1449 = vmatprep.subr.bf16.mxu0 %v1448_v6  ;;  %v1500_v6 = vpack.c.bf16 %v796_v1, %v795_v0 }
  0x3c   : > { %1479 = vmatpush3.bf16.msra.mxu1 %v1476_v52  ;;  %v776_v52 = vld [vmem:[%s2148_s5 + $0x8] sm:$0xff] }
  0x3d   : > { %1481 = vmatprep.subr.bf16.mxu1 %v1480_v60  ;;  %v1494_v57 = vpack.c.bf16 %v776_v52, %v775_v48  ;;  %v805_v48 = vld [vmem:[%s2148_s5 + $0xf0] sm:$0xff] }
  0x3e   : > { %1451 = vmatpush3.bf16.msra.mxu0 %v1450_v9  ;;  %v798_v9 = vld [vmem:[%s2148_s5 + $0xb8] sm:$0xff] }
  0x3f   : > { %1453 = vmatprep.subr.bf16.mxu0 %v1452_v15  ;;  %v1504_v11 = vpack.c.bf16 %v798_v9, %v797_v8  ;;  %v815_v15 = vld [vmem:[%s2148_s5 + $0x140] sm:$0xff] }
  0x40   : > { %1483 = vmatpush3.bf16.msra.mxu1 %v1480_v60  ;;  %v1540_v17 = vpack.c.bf16 %v816_v16, %v815_v15  ;;  %v1086_v15 = vld [vmem:[%s2149_s6] ss:$0 sm:$0xff] }
  0x41   : > { %1485 = vmatprep.subr.bf16.mxu1 %v1484_v5 }
  0x42   : > { %1455 = vmatpush3.bf16.msra.mxu0 %v1454_v18  ;;  %v781_v18 = vld [vmem:[%s2148_s5 + $0x30] sm:$0xff] }
  0x43   : > { %1457 = vmatprep.subr.bf16.mxu0 %v1456_v21  ;;  %v1506_v20 = vpack.c.bf16 %v782_v19, %v781_v18  ;;  %v817_v21 = vld [vmem:[%s2148_s5 + $0x150] sm:$0xff] }
  0x44   : > { %1487 = vmatpush3.bf16.msra.mxu1 %v1484_v5  ;;  %v1544_v25 = vpack.c.bf16 %v818_v22, %v817_v21 }
  0x45   : > { %1489 = vmatprep.subr.bf16.mxu1 %v1488_v14 }
  0x46   : > { %1459 = vmatpush3.bf16.msra.mxu0 %v1458_v24  ;;  %v800_v24 = vld [vmem:[%s2148_s5 + $0xc8] sm:$0xff] }
  0x47   : > { %1493 = vmatprep.subr.bf16.mxu0 %v1492_v27  ;;  %v1508_v26 = vpack.c.bf16 %v800_v24, %v799_v23  ;;  %v783_v27 = vld [vmem:[%s2148_s5 + $0x40] sm:$0xff] }
  0x48   : > { %1491 = vmatpush3.bf16.msra.mxu1 %v1488_v14  ;;  %v1536_v14 = vpack.c.bf16 %v814_v13, %v813_v12  ;;  %v1510_v29 = vpack.c.bf16 %v784_v28, %v783_v27 }
  0x49   : > { %1525 = vmatprep.subr.bf16.mxu1 %v1524_v30 }
  0xfc   : > { %v1123_v31 = vpop.f32.mrb[0].mxu0 }
  0xfd   : > { %v1124_v32 = vpop.f32.mrb[1].mxu0 }
  0xfe   : > { %v1293_v33 = vpop.f32.mrb[0].mxu1  ;;  %v1125_v35 = vadd.f32 %v1124_v32, %v1123_v31  ;;  %v820_v31 = vld [vmem:[%s2148_s5 + $0x168] sm:$0xff]  ;;  %v801_v32 = vld [vmem:[%s2148_s5 + $0xd0] sm:$0xff] }
  0xff   : > { %v541_v36 = vpop.f32.mrb[1].mxu1 }
 0x100   : > { %v1126_v37 = vpop.f32.mrb[2].mxu0  ;;  %v467_v38 = vadd.f32 %v1125_v35, %v1084_v34 }
 0x101   : > { %v1127_v39 = vpop.f32.mrb[3].mxu0 }
 0x102   : > { %v542_v40 = vadd.f32 %v541_v36, %v467_v38  ;;  %v1128_v41 = vadd.f32 %v1127_v39, %v1126_v37  ;;  %v785_v36 = vld [vmem:[%s2148_s5 + $0x50] sm:$0xff]  ;;  %v786_v37 = vld [vmem:[%s2148_s5 + $0x58] sm:$0xff] }
 0x103   : > { %v1514_v38 = vpack.c.bf16 %v786_v37, %v785_v36  ;;  %v821_v39 = vld [vmem:[%s2148_s5 + $0x170] sm:$0xff] }
 0x104   : > { %v550_v42 = vmax.f32 %v542_v40, 0.0  ;;  %v472_v43 = vadd.f32 %v1128_v41, %v1084_v34  ;;  %v822_v40 = vld [vmem:[%s2148_s5 + $0x178] sm:$0xff]  ;;  %v803_v41 = vld [vmem:[%s2148_s5 + $0xe0] sm:$0xff] }
 0x106   : > { %552 = vst [vmem:[#allocation3 + $0x8] sm:$0xff] %v550_v42  ;;  %v547_v46 = vadd.f32 %v1293_v33, %v472_v43  ;;  %1326 = vmatprep.mubr.f32.mxu1 %v550_v42  ;;  %v802_v33 = vld [vmem:[%s2148_s5 + $0xd8] sm:$0xff]  ;;  %v804_v42 = vld [vmem:[%s2148_s5 + $0xe8] sm:$0xff]  ;;  %v1552_v43 = vpack.c.bf16 %v822_v40, %v821_v39 }
 0x107   : > { %v1512_v35 = vpack.c.bf16 %v802_v33, %v801_v32  ;;  %v1516_v44 = vpack.c.bf16 %v804_v42, %v803_v41 }
 0x108   : > { %v551_v47 = vmax.f32 %v547_v46, 0.0  ;;  %v788_v46 = vld [vmem:[%s2148_s5 + $0x68] sm:$0xff] }
 0x10a   : > { %553 = vst [vmem:[#allocation3 + $0x10] sm:$0xff] %v551_v47  ;;  %1327 = vmatmul.mubr.f32.vlgmr.msra.gmra.mrb[2].mxu1 %v551_v47  ;;  %v1518_v47 = vpack.c.bf16 %v788_v46, %v787_v45 }
 0x10b   : > { %1527 = vmatpush3.bf16.msra.mxu1 %v1524_v30  ;;  %v819_v30 = vld [vmem:[%s2148_s5 + $0x160] sm:$0xff] }
 0x10c   : > { %1529 = vmatprep.subr.bf16.mxu1 %v1528_v50  ;;  %v1548_v34 = vpack.c.bf16 %v820_v31, %v819_v30 }
 0x10d   : > { %v556_v60 = vld [vmem:[#allocation3 + $0x6] sm:$0xff] }
 0x10e   : > { %v554_v61 = vld [vmem:[#allocation3 + $0x4] sm:$0xff]  ;;  %679 = vmatprep.mubr.f32.mxu0 %v556_v60 }
 0x10f   : > { %680 = vmatmul.mubr.f32.vlgmr.msra.gmra.mrb[4].mxu0 %v554_v61  ;;  %1531 = vmatpush3.bf16.msra.mxu1 %v1528_v50  ;;  %v806_v50 = vld [vmem:[%s2148_s5 + $0xf8] sm:$0xff]  ;;  %v1085_v60 = vld [vmem:[%s2147_s4] ss:$0 sm:$0xff] }
 0x110   : > { %1495 = vmatpush3.bf16.msra.mxu0 %v1494_v57  ;;  %1533 = vmatprep.subr.bf16.mxu1 %v1532_v59  ;;  %v1520_v52 = vpack.c.bf16 %v806_v50, %v805_v48 }
 0x111   : > { %v557_v4 = vld [vmem:[#allocation3 + $0xe] sm:$0xff]  ;;  %1497 = vmatprep.subr.bf16.mxu0 %v1496_v62 }
 0x112   : > { %v555_v5 = vld [vmem:[#allocation3 + $0xc] sm:$0xff]  ;;  %684 = vmatprep.mubr.f32.mxu0 %v557_v4 }
 0x113   : > { %685 = vmatmul.mubr.f32.gmra.mrb[6].mxu0 %v555_v5  ;;  %1535 = vmatpush3.bf16.msra.mxu1 %v1532_v59 }
 0x114   : > { %1499 = vmatpush3.bf16.msra.mxu0 %v1498_v2  ;;  %1537 = vmatprep.subr.bf16.mxu1 %v1536_v14 }
 0x115   : > { %1501 = vmatprep.subr.bf16.mxu0 %v1500_v6 }
 0x117   : > { %1539 = vmatpush3.bf16.msra.mxu1 %v1536_v14 }
 0x118   : > { %1503 = vmatpush3.bf16.msra.mxu0 %v1502_v10  ;;  %1541 = vmatprep.subr.bf16.mxu1 %v1540_v17 }
 0x119   : > { %1505 = vmatprep.subr.bf16.mxu0 %v1504_v11 }
 0x11b   : > { %1543 = vmatpush3.bf16.msra.mxu1 %v1540_v17 }
 0x11c   : > { %1507 = vmatpush3.bf16.msra.mxu0 %v1506_v20  ;;  %1545 = vmatprep.subr.bf16.mxu1 %v1544_v25 }
 0x11d   : > { %1509 = vmatprep.subr.bf16.mxu0 %v1508_v26 }
 0x11f   : > { %1547 = vmatpush3.bf16.msra.mxu1 %v1544_v25 }
 0x120   : > { %1511 = vmatpush3.bf16.msra.mxu0 %v1510_v29  ;;  %1549 = vmatprep.subr.bf16.mxu1 %v1548_v34 }
 0x121   : > { %1513 = vmatprep.subr.bf16.mxu0 %v1512_v35 }
 0x123   : > { %1551 = vmatpush3.bf16.msra.mxu1 %v1548_v34 }
 0x124   : > { %1515 = vmatpush3.bf16.msra.mxu0 %v1514_v38  ;;  %1553 = vmatprep.subr.bf16.mxu1 %v1552_v43 }
 0x125   : > { %1517 = vmatprep.subr.bf16.mxu0 %v1516_v44 }
 0x127   : > { %1555 = vmatpush3.bf16.msra.mxu1 %v1552_v43 }
 0x128   : > { %1519 = vmatpush3.bf16.msra.mxu0 %v1518_v47 }
 0x129   : > { %1521 = vmatprep.subr.bf16.mxu0 %v1520_v52 }
 0x12c   : > { %1523 = vmatpush3.bf16.msra.mxu0 %v1522_v55 }
 0x1dd   : > { %v1328_v56 = vpop.f32.mrb[2].mxu1 }
 0x1de   : > { %v756_v57 = vpop.f32.mrb[3].mxu1 }
 0x1e2   : > { %v1179_v58 = vpop.f32.mrb[4].mxu0 }
 0x1e3   : > { %v1180_v59 = vpop.f32.mrb[5].mxu0 }
 0x1e4   : > { %v1181_v61 = vadd.f32 %v1180_v59, %v1179_v58 }
 0x1e6   : > { %v1182_v62 = vpop.f32.mrb[6].mxu0  ;;  %v682_v63 = vadd.f32 %v1181_v61, %v1085_v60 }
 0x1e7   : > { %v1183_v0 = vpop.f32.mrb[7].mxu0 }
 0x1e8   : > { %v757_v1 = vadd.f32 %v756_v57, %v682_v63  ;;  %v1184_v2 = vadd.f32 %v1183_v0, %v1182_v62 }
 0x1ea   : > { %v765_v3 = vmax.f32 %v757_v1, 0.0  ;;  %v687_v4 = vadd.f32 %v1184_v2, %v1085_v60 }
 0x1ec   : > { %767 = vst [vmem:[#allocation4 + $0x8] sm:$0xff] %v765_v3  ;;  %v762_v5 = vadd.f32 %v1328_v56, %v687_v4  ;;  %1361 = vmatprep.mubr.f32.mxu1 %v765_v3 }
 0x1ee   : > { %v766_v6 = vmax.f32 %v762_v5, 0.0 }
 0x1f0   : > { %768 = vst [vmem:[#allocation4 + $0x10] sm:$0xff] %v766_v6  ;;  %1362 = vmatmul.mubr.f32.vlgmr.msra.gmra.mrb[4].mxu1 %v766_v6 }
 0x1f3   : > { %v771_v7 = vld [vmem:[#allocation4 + $0x6] sm:$0xff] }
 0x1f4   : > { %v769_v8 = vld [vmem:[#allocation4 + $0x4] sm:$0xff]  ;;  %894 = vmatprep.mubr.f32.mxu0 %v771_v7 }
 0x1f5   : > { %895 = vmatmul.mubr.f32.vlgmr.msra.gmra.mrb[8].mxu0 %v769_v8 }
 0x1f7   : > { %v772_v9 = vld [vmem:[#allocation4 + $0xe] sm:$0xff] }
 0x1f8   : > { %v770_v10 = vld [vmem:[#allocation4 + $0xc] sm:$0xff]  ;;  %899 = vmatprep.mubr.f32.mxu0 %v772_v9 }
 0x1f9   : > { %900 = vmatmul.mubr.f32.gmra.mrb[10].mxu0 %v770_v10 }
 0x2c3   : > { %v1363_v11 = vpop.f32.mrb[4].mxu1 }
 0x2c4   : > { %v971_v12 = vpop.f32.mrb[5].mxu1 }
 0x2c8   : > { %v1235_v13 = vpop.f32.mrb[8].mxu0 }
 0x2c9   : > { %v1236_v14 = vpop.f32.mrb[9].mxu0 }
 0x2ca   : > { %v1237_v16 = vadd.f32 %v1236_v14, %v1235_v13 }
 0x2cc   : > { %v1238_v17 = vpop.f32.mrb[10].mxu0  ;;  %v897_v18 = vadd.f32 %v1237_v16, %v1086_v15 }
 0x2cd   : > { %v1239_v19 = vpop.f32.mrb[11].mxu0 }
 0x2ce   : > { %v972_v20 = vadd.f32 %v971_v12, %v897_v18  ;;  %v1240_v21 = vadd.f32 %v1239_v19, %v1238_v17 }
 0x2d0   : > { %v982_v22 = vadd.f32 %v972_v20, %v1780_v49  ;;  %v902_v23 = vadd.f32 %v1240_v21, %v1086_v15 }
 0x2d2   : > { %v984_v24 = vmax.f32 %v982_v22, 0.0  ;;  %v977_v25 = vadd.f32 %v1363_v11, %v902_v23 }
 0x2d4   : > { %986 = vst [vmem:[%s316_s14] sm:$0xff] %v984_v24  ;;  %v983_v26 = vadd.f32 %v977_v25, %v1784_v51 }
 0x2d6   : > { %v985_v27 = vmax.f32 %v983_v26, 0.0 }
 0x2d8   : > { %987 = vst [vmem:[%s316_s14 + $0x8] sm:$0xff] %v985_v27 }
 0x2d9 PF: > { %s17_s26 = sadd.s32 1, %s1603_s26   ;;  %s2151_s24 = smov %s1599_s25 }
 0x2da   : > { %p14_p5 = scmp.ge.s32.totalorder %s17_s26, 4   ;;  %s2152_s25 = smov %s2154_s27 }
 0x2dc   :  { %16 = sbr.rel (!%p14_p5) target bundleno = 2 (0x2), region = 86 }

// kernel: _lambda_.6
= control target key start
LH: loop header
LB: loop body
LE: loop exit
PB: predicated region body
PF: predicated region fallthrough
CT: control target
= control target key end

     0   :  { %s1646_s24 = smov 0   ;;  %s1648_s25 = smov 0   ;;  %s2150_s0 = inlined_call_operand.vmem [shape: f32[2,16,128], index: 0, kind: input, shape index: {}]   ;;  %s2151_s1 = inlined_call_operand.vmem [shape: f32[384,128], index: 1, kind: input, shape index: {}]   ;;  %s2152_s2 = inlined_call_operand.vmem [shape: f32[1,128], index: 2, kind: input, shape index: {}, may-alias: {2,4,6}]   ;;  %s2153_s3 = inlined_call_operand.vmem [shape: f32[384,128], index: 3, kind: input, shape index: {}]   ;;  %s2154_s4 = inlined_call_operand.vmem [shape: f32[1,128], index: 4, kind: input, shape index: {}, may-alias: {2,4,6}]   ;;  %s2155_s5 = inlined_call_operand.vmem [shape: f32[384,128], index: 5, kind: input, shape index: {}]   ;;  %s2156_s6 = inlined_call_operand.vmem [shape: f32[1,128], index: 6, kind: input, shape index: {}, may-alias: {2,4,6}]   ;;  %s2157_s7 = inlined_call_operand.vmem [shape: f32[2,16,128], index: 7, kind: output, shape index: {}]  }
   0x1   :  { %s1650_s26 = smov 0  }
   0x2 LB: > { %s29_s27 = sadd.s32 1, %s1599_s25  ;;  %p1079_p0 = scmp.ge.s32.totalorder %s1603_s26, 1  ;;  %s1603_s26 = sphi %s1650_s26, %s17_s26   ;;  %s1599_s25 = sphi %s1648_s25, %s2159_s25   ;;  %s1595_s24 = sphi %s1646_s24, %s2158_s24  }
   0x3   : > { %p31_p1 = scmp.ge.s32.totalorder %s29_s27, 2  ;;  %p258_p2 = scmp.lt.s32.totalorder %s1603_s26, 3 }
   0x5   : > { %s2161_s27 = smov (%p31_p1, %s29_s27), 0  ;;  %p259_p3 = pnand %p1079_p0, %p258_p2 }
   0x6   : > { %v361_v0 = vld [vmem:[%s2151_s1 + $0x80] sm:$0xff] (!%p259_p3)  ;;  %v362_v1 = vld [vmem:[%s2151_s1 + $0x88] sm:$0xff] (!%p259_p3)  ;;  %p299_p4 = scmp.lt.s32.totalorder (!%p259_p3), %s1595_s24, 1  ;;  %v1605_v7 = vmov (!%p259_p3), 0.0   ;;  %v363_v10 = vld [vmem:[%s2151_s1 + $0x90] sm:$0xff] (!%p259_p3) }
   0x7   : > { %262 = sbr.rel (%p259_p3) target bundleno = 729 (0x2d9), region = 48  ;;  %v345_v2 = vld [vmem:[%s2151_s1] sm:$0xff] (!%p259_p3)  ;;  %v1364_v3 = vpack.c.bf16 (!%p259_p3), %v362_v1, %v361_v0  ;;  %v346_v4 = vld [vmem:[%s2151_s1 + $0x8] sm:$0xff] (!%p259_p3)  ;;  %322 = vst [vmem:[#allocation2] sm:$0xff] (!%p259_p3), %v1605_v7  ;;  %323 = vst [vmem:[#allocation3] sm:$0xff] (!%p259_p3), %v1605_v7 }
   0x8   : > { %v377_v5 = vld [vmem:[%s2151_s1 + $0x100] sm:$0xff] (!%p259_p3)  ;;  %v378_v6 = vld [vmem:[%s2151_s1 + $0x108] sm:$0xff] (!%p259_p3)  ;;  %324 = vst [vmem:[#allocation4] sm:$0xff] (!%p259_p3), %v1605_v7  ;;  %v1366_v8 = vpack.c.bf16 (!%p259_p3), %v346_v4, %v345_v2  ;;  %v364_v11 = vld [vmem:[%s2151_s1 + $0x98] sm:$0xff] (!%p259_p3) }
   0x9   : > { %v1396_v9 = vpack.c.bf16 (!%p259_p3), %v378_v6, %v377_v5  ;;  %v347_v12 = vld [vmem:[%s2151_s1 + $0x10] sm:$0xff] (!%p259_p3)  ;;  %1365 = vmatprep.subr.bf16.mxu0 (!%p259_p3), %v1364_v3  ;;  %v1368_v13 = vpack.c.bf16 (!%p259_p3), %v364_v11, %v363_v10  ;;  %v348_v14 = vld [vmem:[%s2151_s1 + $0x18] sm:$0xff] (!%p259_p3)  ;;  %v365_v19 = vld [vmem:[%s2151_s1 + $0xa0] sm:$0xff] (!%p259_p3) }
   0xa   : > { %v379_v15 = vld [vmem:[%s2151_s1 + $0x110] sm:$0xff] (!%p259_p3)  ;;  %v380_v16 = vld [vmem:[%s2151_s1 + $0x118] sm:$0xff] (!%p259_p3)  ;;  %1367 = vmatpush3.bf16.msra.mxu0 (!%p259_p3), %v1366_v8  ;;  %v1370_v17 = vpack.c.bf16 (!%p259_p3), %v348_v14, %v347_v12  ;;  %v366_v20 = vld [vmem:[%s2151_s1 + $0xa8] sm:$0xff] (!%p259_p3) }
   0xb   : > { %1397 = vmatprep.subr.bf16.mxu1 (!%p259_p3), %v1396_v9  ;;  %v1400_v18 = vpack.c.bf16 (!%p259_p3), %v380_v16, %v379_v15  ;;  %v349_v21 = vld [vmem:[%s2151_s1 + $0x20] sm:$0xff] (!%p259_p3)  ;;  %1369 = vmatprep.subr.bf16.mxu0 (!%p259_p3), %v1368_v13  ;;  %v1372_v22 = vpack.c.bf16 (!%p259_p3), %v366_v20, %v365_v19  ;;  %v350_v23 = vld [vmem:[%s2151_s1 + $0x28] sm:$0xff] (!%p259_p3)  ;;  %v367_v27 = vld [vmem:[%s2151_s1 + $0xb0] sm:$0xff] (!%p259_p3) }
   0xc   : > { %1399 = vmatpush3.bf16.msra.mxu1 (!%p259_p3), %v1396_v9  ;;  %v381_v24 = vld [vmem:[%s2151_s1 + $0x120] sm:$0xff] (!%p259_p3)  ;;  %v382_v25 = vld [vmem:[%s2151_s1 + $0x128] sm:$0xff] (!%p259_p3)  ;;  %v368_v28 = vld [vmem:[%s2151_s1 + $0xb8] sm:$0xff] (!%p259_p3)  ;;  %v1374_v31 = vpack.c.bf16 (!%p259_p3), %v350_v23, %v349_v21 }
   0xd   : > { %1401 = vmatprep.subr.bf16.mxu1 (!%p259_p3), %v1400_v18  ;;  %v1404_v26 = vpack.c.bf16 (!%p259_p3), %v382_v25, %v381_v24  ;;  %v383_v29 = vld [vmem:[%s2151_s1 + $0x130] sm:$0xff] (!%p259_p3)  ;;  %v384_v30 = vld [vmem:[%s2151_s1 + $0x138] sm:$0xff] (!%p259_p3)  ;;  %v1376_v32 = vpack.c.bf16 (!%p259_p3), %v368_v28, %v367_v27  ;;  %v369_v36 = vld [vmem:[%s2151_s1 + $0xc0] sm:$0xff] (!%p259_p3) }
   0xe   : > { %s2163_s24 = smov (!%p299_p4, %s1595_s24), 1  ;;  %1371 = vmatpush3.bf16.msra.mxu0 %v1370_v17  ;;  %v351_v33 = vld [vmem:[%s2151_s1 + $0x30] sm:$0xff]  ;;  %v352_v34 = vld [vmem:[%s2151_s1 + $0x38] sm:$0xff]  ;;  %v1408_v35 = vpack.c.bf16 %v384_v30, %v383_v29  ;;  %v370_v37 = vld [vmem:[%s2151_s1 + $0xc8] sm:$0xff] }
   0xf   : > { %1373 = vmatprep.subr.bf16.mxu0 %v1372_v22  ;;  %s1089_s15 = sshll.u32 %s2163_s24, 4  ;;  %v385_v38 = vld [vmem:[%s2151_s1 + $0x140] sm:$0xff]  ;;  %v386_v39 = vld [vmem:[%s2151_s1 + $0x148] sm:$0xff]  ;;  %v1378_v40 = vpack.c.bf16 %v352_v34, %v351_v33  ;;  %v1380_v41 = vpack.c.bf16 %v370_v37, %v369_v36  ;;  %v371_v45 = vld [vmem:[%s2151_s1 + $0xd0] sm:$0xff] }
  0x10   : > { %1403 = vmatpush3.bf16.msra.mxu1 %v1400_v18  ;;  %s306_s30 = scalar_lea.vmem %s2150_s0, %s1089_s15  ;;  %v353_v42 = vld [vmem:[%s2151_s1 + $0x40] sm:$0xff]  ;;  %v354_v43 = vld [vmem:[%s2151_s1 + $0x48] sm:$0xff]  ;;  %v1412_v44 = vpack.c.bf16 %v386_v39, %v385_v38  ;;  %v372_v46 = vld [vmem:[%s2151_s1 + $0xd8] sm:$0xff]  ;;  %s316_s14 = scalar_lea.vmem %s2157_s7, %s1089_s15 }
  0x11   : > { %1405 = vmatprep.subr.bf16.mxu1 %v1404_v26  ;;  %v387_v47 = vld [vmem:[%s2151_s1 + $0x150] sm:$0xff]  ;;  %v388_v48 = vld [vmem:[%s2151_s1 + $0x158] sm:$0xff]  ;;  %v1783_v49 = vld [vmem:[%s306_s30] sm:$0xff]  ;;  %v1382_v50 = vpack.c.bf16 %v354_v43, %v353_v42  ;;  %v1384_v52 = vpack.c.bf16 %v372_v46, %v371_v45 }
  0x12   : > { %1375 = vmatpush3.bf16.msra.mxu0 %v1374_v31  ;;  %337 = vst [vmem:[#allocation2 + $0x8] sm:$0xff] %v1783_v49  ;;  %1291 = vmatprep.mubr.f32.mxu1 %v1783_v49  ;;  %v1787_v51 = vld [vmem:[%s306_s30 + $0x8] sm:$0xff]  ;;  %v355_v53 = vld [vmem:[%s2151_s1 + $0x50] sm:$0xff]  ;;  %v356_v54 = vld [vmem:[%s2151_s1 + $0x58] sm:$0xff]  ;;  %v1416_v55 = vpack.c.bf16 %v388_v48, %v387_v47 }
  0x13   : > { %1377 = vmatprep.subr.bf16.mxu0 %v1376_v32  ;;  %338 = vst [vmem:[#allocation2 + $0x10] sm:$0xff] %v1787_v51  ;;  %v373_v56 = vld [vmem:[%s2151_s1 + $0xe0] sm:$0xff]  ;;  %v374_v57 = vld [vmem:[%s2151_s1 + $0xe8] sm:$0xff]  ;;  %v1386_v60 = vpack.c.bf16 %v356_v54, %v355_v53  ;;  %v375_v1 = vld [vmem:[%s2151_s1 + $0xf0] sm:$0xff] }
  0x14   : > { %1407 = vmatpush3.bf16.msra.mxu1 %v1404_v26  ;;  %v389_v58 = vld [vmem:[%s2151_s1 + $0x160] sm:$0xff]  ;;  %v390_v59 = vld [vmem:[%s2151_s1 + $0x168] sm:$0xff]  ;;  %v1388_v61 = vpack.c.bf16 %v374_v57, %v373_v56  ;;  %v376_v2 = vld [vmem:[%s2151_s1 + $0xf8] sm:$0xff] }
  0x15   : > { %1409 = vmatprep.subr.bf16.mxu1 %v1408_v35  ;;  %v357_v62 = vld [vmem:[%s2151_s1 + $0x60] sm:$0xff]  ;;  %v358_v63 = vld [vmem:[%s2151_s1 + $0x68] sm:$0xff]  ;;  %v1420_v0 = vpack.c.bf16 %v390_v59, %v389_v58  ;;  %v391_v4 = vld [vmem:[%s2151_s1 + $0x170] sm:$0xff]  ;;  %v1392_v8 = vpack.c.bf16 %v376_v2, %v375_v1 }
  0x16   : > { %1379 = vmatpush3.bf16.msra.mxu0 %v1378_v40  ;;  %v392_v5 = vld [vmem:[%s2151_s1 + $0x178] sm:$0xff]  ;;  %v1390_v6 = vpack.c.bf16 %v358_v63, %v357_v62  ;;  %v359_v9 = vld [vmem:[%s2151_s1 + $0x70] sm:$0xff]  ;;  %v576_v12 = vld [vmem:[%s2153_s3 + $0x80] sm:$0xff] }
  0x17   : > { %1381 = vmatprep.subr.bf16.mxu0 %v1380_v41  ;;  %v360_v10 = vld [vmem:[%s2151_s1 + $0x78] sm:$0xff]  ;;  %v1424_v11 = vpack.c.bf16 %v392_v5, %v391_v4  ;;  %v577_v13 = vld [vmem:[%s2153_s3 + $0x88] sm:$0xff]  ;;  %v592_v14 = vld [vmem:[%s2153_s3 + $0x100] sm:$0xff] }
  0x18   : > { %1411 = vmatpush3.bf16.msra.mxu1 %v1408_v35  ;;  %v593_v15 = vld [vmem:[%s2153_s3 + $0x108] sm:$0xff]  ;;  %v1394_v16 = vpack.c.bf16 %v360_v10, %v359_v9  ;;  %v1428_v17 = vpack.c.bf16 %v577_v13, %v576_v12  ;;  %v560_v18 = vld [vmem:[%s2153_s3] sm:$0xff]  ;;  %v578_v21 = vld [vmem:[%s2153_s3 + $0x90] sm:$0xff] }
  0x19   : > { %1413 = vmatprep.subr.bf16.mxu1 %v1412_v44  ;;  %v341_v3 = vld [vmem:[#allocation2 + $0x4] sm:$0xff]  ;;  %v1460_v20 = vpack.c.bf16 %v593_v15, %v592_v14  ;;  %v579_v22 = vld [vmem:[%s2153_s3 + $0x98] sm:$0xff]  ;;  %v594_v23 = vld [vmem:[%s2153_s3 + $0x110] sm:$0xff] }
  0x1a   : > { %1383 = vmatpush3.bf16.msra.mxu0 %v1382_v50  ;;  %464 = vmatprep.mubr.f32.mxu0 %v341_v3  ;;  %v561_v19 = vld [vmem:[%s2153_s3 + $0x8] sm:$0xff]  ;;  %v595_v24 = vld [vmem:[%s2153_s3 + $0x118] sm:$0xff]  ;;  %v1432_v27 = vpack.c.bf16 %v579_v22, %v578_v21  ;;  %v562_v28 = vld [vmem:[%s2153_s3 + $0x10] sm:$0xff] }
  0x1b   : > { %1385 = vmatprep.subr.bf16.mxu0 %v1384_v52  ;;  %v342_v25 = vld [vmem:[#allocation2 + $0xc] sm:$0xff]  ;;  %v1430_v26 = vpack.c.bf16 %v561_v19, %v560_v18  ;;  %v563_v29 = vld [vmem:[%s2153_s3 + $0x18] sm:$0xff]  ;;  %v1464_v30 = vpack.c.bf16 %v595_v24, %v594_v23  ;;  %v580_v31 = vld [vmem:[%s2153_s3 + $0xa0] sm:$0xff] }
  0x1c   : > { %1415 = vmatpush3.bf16.msra.mxu1 %v1412_v44  ;;  %v581_v32 = vld [vmem:[%s2153_s3 + $0xa8] sm:$0xff]  ;;  %v596_v33 = vld [vmem:[%s2153_s3 + $0x120] sm:$0xff]  ;;  %v1434_v35 = vpack.c.bf16 %v563_v29, %v562_v28  ;;  %v582_v40 = vld [vmem:[%s2153_s3 + $0xb0] sm:$0xff] }
  0x1d   : > { %1417 = vmatprep.subr.bf16.mxu1 %v1416_v55  ;;  %v597_v34 = vld [vmem:[%s2153_s3 + $0x128] sm:$0xff]  ;;  %v1436_v36 = vpack.c.bf16 %v581_v32, %v580_v31  ;;  %v564_v37 = vld [vmem:[%s2153_s3 + $0x20] sm:$0xff]  ;;  %v583_v41 = vld [vmem:[%s2153_s3 + $0xb8] sm:$0xff] }
  0x1e   : > { %1387 = vmatpush3.bf16.msra.mxu0 %v1386_v60  ;;  %v565_v38 = vld [vmem:[%s2153_s3 + $0x28] sm:$0xff]  ;;  %v1468_v39 = vpack.c.bf16 %v597_v34, %v596_v33  ;;  %v1440_v43 = vpack.c.bf16 %v583_v41, %v582_v40  ;;  %v598_v44 = vld [vmem:[%s2153_s3 + $0x130] sm:$0xff]  ;;  %v599_v45 = vld [vmem:[%s2153_s3 + $0x138] sm:$0xff] }
  0x1f   : > { %1389 = vmatprep.subr.bf16.mxu0 %v1388_v61  ;;  %v1438_v42 = vpack.c.bf16 %v565_v38, %v564_v37  ;;  %v1472_v46 = vpack.c.bf16 %v599_v45, %v598_v44  ;;  %v600_v47 = vld [vmem:[%s2153_s3 + $0x140] sm:$0xff]  ;;  %v601_v48 = vld [vmem:[%s2153_s3 + $0x148] sm:$0xff]  ;;  %v566_v52 = vld [vmem:[%s2153_s3 + $0x30] sm:$0xff] }
  0x20   : > { %1419 = vmatpush3.bf16.msra.mxu1 %v1416_v55  ;;  %v1476_v50 = vpack.c.bf16 %v601_v48, %v600_v47  ;;  %v567_v53 = vld [vmem:[%s2153_s3 + $0x38] sm:$0xff]  ;;  %v602_v55 = vld [vmem:[%s2153_s3 + $0x150] sm:$0xff]  ;;  %v584_v57 = vld [vmem:[%s2153_s3 + $0xc0] sm:$0xff] }
  0x21   : > { %1421 = vmatprep.subr.bf16.mxu1 %v1420_v0  ;;  %v1442_v54 = vpack.c.bf16 %v567_v53, %v566_v52  ;;  %v603_v56 = vld [vmem:[%s2153_s3 + $0x158] sm:$0xff]  ;;  %v585_v58 = vld [vmem:[%s2153_s3 + $0xc8] sm:$0xff]  ;;  %v568_v61 = vld [vmem:[%s2153_s3 + $0x40] sm:$0xff] }
  0x22   : > { %1391 = vmatpush3.bf16.msra.mxu0 %v1390_v6  ;;  %v1480_v59 = vpack.c.bf16 %v603_v56, %v602_v55  ;;  %v1444_v60 = vpack.c.bf16 %v585_v58, %v584_v57  ;;  %v569_v62 = vld [vmem:[%s2153_s3 + $0x48] sm:$0xff]  ;;  %v586_v2 = vld [vmem:[%s2153_s3 + $0xd0] sm:$0xff]  ;;  %v587_v3 = vld [vmem:[%s2153_s3 + $0xd8] sm:$0xff] }
  0x23   : > { %1393 = vmatprep.subr.bf16.mxu0 %v1392_v8  ;;  %v1446_v63 = vpack.c.bf16 %v569_v62, %v568_v61  ;;  %v605_v1 = vld [vmem:[%s2153_s3 + $0x168] sm:$0xff]  ;;  %v1448_v5 = vpack.c.bf16 %v587_v3, %v586_v2  ;;  %v570_v6 = vld [vmem:[%s2153_s3 + $0x50] sm:$0xff]  ;;  %v571_v8 = vld [vmem:[%s2153_s3 + $0x58] sm:$0xff] }
  0x24   : > { %1423 = vmatpush3.bf16.msra.mxu1 %v1420_v0  ;;  %v604_v0 = vld [vmem:[%s2153_s3 + $0x160] sm:$0xff]  ;;  %v1450_v9 = vpack.c.bf16 %v571_v8, %v570_v6  ;;  %v606_v10 = vld [vmem:[%s2153_s3 + $0x170] sm:$0xff]  ;;  %v589_v13 = vld [vmem:[%s2153_s3 + $0xe8] sm:$0xff] }
  0x25   : > { %1425 = vmatprep.subr.bf16.mxu1 %v1424_v11  ;;  %v1484_v4 = vpack.c.bf16 %v605_v1, %v604_v0  ;;  %v588_v12 = vld [vmem:[%s2153_s3 + $0xe0] sm:$0xff]  ;;  %v590_v19 = vld [vmem:[%s2153_s3 + $0xf0] sm:$0xff]  ;;  %v575_v23 = vld [vmem:[%s2153_s3 + $0x78] sm:$0xff] }
  0x26   : > { %1395 = vmatpush3.bf16.msra.mxu0 %v1394_v16  ;;  %v1452_v15 = vpack.c.bf16 %v589_v13, %v588_v12  ;;  %v572_v16 = vld [vmem:[%s2153_s3 + $0x60] sm:$0xff]  ;;  %v574_v22 = vld [vmem:[%s2153_s3 + $0x70] sm:$0xff]  ;;  %v808_v29 = vld [vmem:[%s2155_s5 + $0x108] sm:$0xff] }
  0x27   : > { %1429 = vmatprep.subr.bf16.mxu0 %v1428_v17  ;;  %v573_v17 = vld [vmem:[%s2153_s3 + $0x68] sm:$0xff]  ;;  %v1458_v24 = vpack.c.bf16 %v575_v23, %v574_v22  ;;  %v807_v28 = vld [vmem:[%s2155_s5 + $0x100] sm:$0xff]  ;;  %v809_v44 = vld [vmem:[%s2155_s5 + $0x110] sm:$0xff] }
  0x28   : > { %1427 = vmatpush3.bf16.msra.mxu1 %v1424_v11  ;;  %v607_v11 = vld [vmem:[%s2153_s3 + $0x178] sm:$0xff]  ;;  %v1454_v18 = vpack.c.bf16 %v573_v17, %v572_v16  ;;  %v1084_v34 = vld [vmem:[%s2152_s2] ss:$0 sm:$0xff]  ;;  %v776_v52 = vld [vmem:[%s2155_s5 + $0x8] sm:$0xff] }
  0x29   : > { %1461 = vmatprep.subr.bf16.mxu1 %v1460_v20  ;;  %465 = vmatmul.mubr.f32.vlgmr.msra.gmra.mrb[0].mxu0 %v1605_v7  ;;  %v1488_v14 = vpack.c.bf16 %v607_v11, %v606_v10  ;;  %v810_v45 = vld [vmem:[%s2155_s5 + $0x118] sm:$0xff]  ;;  %v775_v48 = vld [vmem:[%s2155_s5] sm:$0xff]  ;;  %v793_v55 = vld [vmem:[%s2155_s5 + $0x90] sm:$0xff] }
  0x2a   : > { %469 = vmatprep.mubr.f32.mxu0 %v342_v25  ;;  %1431 = vmatpush3.bf16.msra.mxu0 %v1430_v26  ;;  %v791_v25 = vld [vmem:[%s2155_s5 + $0x80] sm:$0xff]  ;;  %v792_v26 = vld [vmem:[%s2155_s5 + $0x88] sm:$0xff]  ;;  %v794_v56 = vld [vmem:[%s2155_s5 + $0x98] sm:$0xff]  ;;  %v1494_v57 = vpack.c.bf16 %v776_v52, %v775_v48 }
  0x2b   : > { %1292 = vmatmul.mubr.f32.vlgmr.msra.gmra.mrb[0].mxu1 %v1787_v51  ;;  %1433 = vmatprep.subr.bf16.mxu0 %v1432_v27  ;;  %v1492_v27 = vpack.c.bf16 %v792_v26, %v791_v25  ;;  %v811_v53 = vld [vmem:[%s2155_s5 + $0x120] sm:$0xff]  ;;  %v777_v61 = vld [vmem:[%s2155_s5 + $0x10] sm:$0xff]  ;;  %v778_v62 = vld [vmem:[%s2155_s5 + $0x18] sm:$0xff] }
  0x2c   : > { %1463 = vmatpush3.bf16.msra.mxu1 %v1460_v20  ;;  %v591_v20 = vld [vmem:[%s2153_s3 + $0xf8] sm:$0xff]  ;;  %v796_v0 = vld [vmem:[%s2155_s5 + $0xa8] sm:$0xff]  ;;  %v1498_v1 = vpack.c.bf16 %v778_v62, %v777_v61  ;;  %v797_v6 = vld [vmem:[%s2155_s5 + $0xb0] sm:$0xff] }
  0x2d   : > { %1465 = vmatprep.subr.bf16.mxu1 %v1464_v30  ;;  %470 = vmatmul.mubr.f32.gmra.mrb[2].mxu0 %v1783_v49  ;;  %v1456_v21 = vpack.c.bf16 %v591_v20, %v590_v19  ;;  %v798_v8 = vld [vmem:[%s2155_s5 + $0xb8] sm:$0xff]  ;;  %v813_v11 = vld [vmem:[%s2155_s5 + $0x130] sm:$0xff]  ;;  %v799_v22 = vld [vmem:[%s2155_s5 + $0xc0] sm:$0xff] }
  0x2e   : > { %1435 = vmatpush3.bf16.msra.mxu0 %v1434_v35  ;;  %v1504_v10 = vpack.c.bf16 %v798_v8, %v797_v6  ;;  %v814_v12 = vld [vmem:[%s2155_s5 + $0x138] sm:$0xff]  ;;  %v781_v17 = vld [vmem:[%s2155_s5 + $0x30] sm:$0xff]  ;;  %v800_v23 = vld [vmem:[%s2155_s5 + $0xc8] sm:$0xff] }
  0x2f   : > { %1437 = vmatprep.subr.bf16.mxu0 %v1436_v36  ;;  %v1536_v13 = vpack.c.bf16 %v814_v12, %v813_v11  ;;  %v817_v20 = vld [vmem:[%s2155_s5 + $0x150] sm:$0xff]  ;;  %v1508_v25 = vpack.c.bf16 %v800_v23, %v799_v22  ;;  %v783_v26 = vld [vmem:[%s2155_s5 + $0x40] sm:$0xff]  ;;  %v806_v48 = vld [vmem:[%s2155_s5 + $0xf8] sm:$0xff] }
  0x30   : > { %1467 = vmatpush3.bf16.msra.mxu1 %v1464_v30  ;;  %v1524_v30 = vpack.c.bf16 %v808_v29, %v807_v28  ;;  %v819_v29 = vld [vmem:[%s2155_s5 + $0x160] sm:$0xff]  ;;  %v789_v52 = vld [vmem:[%s2155_s5 + $0x70] sm:$0xff] }
  0x31   : > { %1469 = vmatprep.subr.bf16.mxu1 %v1468_v39 }
  0x32   : > { %1439 = vmatpush3.bf16.msra.mxu0 %v1438_v42 }
  0x33   : > { %1441 = vmatprep.subr.bf16.mxu0 %v1440_v43 }
  0x34   : > { %1471 = vmatpush3.bf16.msra.mxu1 %v1468_v39 }
  0x35   : > { %1473 = vmatprep.subr.bf16.mxu1 %v1472_v46 }
  0x36   : > { %1443 = vmatpush3.bf16.msra.mxu0 %v1442_v54  ;;  %v812_v54 = vld [vmem:[%s2155_s5 + $0x128] sm:$0xff] }
  0x37   : > { %1445 = vmatprep.subr.bf16.mxu0 %v1444_v60  ;;  %v1532_v58 = vpack.c.bf16 %v812_v54, %v811_v53  ;;  %v1496_v60 = vpack.c.bf16 %v794_v56, %v793_v55  ;;  %v790_v53 = vld [vmem:[%s2155_s5 + $0x78] sm:$0xff] }
  0x38   : > { %1475 = vmatpush3.bf16.msra.mxu1 %v1472_v46  ;;  %v1522_v54 = vpack.c.bf16 %v790_v53, %v789_v52 }
  0x39   : > { %1477 = vmatprep.subr.bf16.mxu1 %v1476_v50 }
  0x3a   : > { %1447 = vmatpush3.bf16.msra.mxu0 %v1446_v63  ;;  %v795_v63 = vld [vmem:[%s2155_s5 + $0xa0] sm:$0xff] }
  0x3b   : > { %1449 = vmatprep.subr.bf16.mxu0 %v1448_v5  ;;  %v1500_v3 = vpack.c.bf16 %v796_v0, %v795_v63  ;;  %v780_v5 = vld [vmem:[%s2155_s5 + $0x28] sm:$0xff] }
  0x3c   : > { %1479 = vmatpush3.bf16.msra.mxu1 %v1476_v50  ;;  %v1528_v50 = vpack.c.bf16 %v810_v45, %v809_v44  ;;  %v787_v44 = vld [vmem:[%s2155_s5 + $0x60] sm:$0xff]  ;;  %v788_v45 = vld [vmem:[%s2155_s5 + $0x68] sm:$0xff] }
  0x3d   : > { %1481 = vmatprep.subr.bf16.mxu1 %v1480_v59 }
  0x3e   : > { %1451 = vmatpush3.bf16.msra.mxu0 %v1450_v9 }
  0x3f   : > { %1453 = vmatprep.subr.bf16.mxu0 %v1452_v15  ;;  %v816_v15 = vld [vmem:[%s2155_s5 + $0x148] sm:$0xff] }
  0x40   : > { %1483 = vmatpush3.bf16.msra.mxu1 %v1480_v59 }
  0x41   : > { %1485 = vmatprep.subr.bf16.mxu1 %v1484_v4 }
  0x42   : > { %1455 = vmatpush3.bf16.msra.mxu0 %v1454_v18  ;;  %v782_v18 = vld [vmem:[%s2155_s5 + $0x38] sm:$0xff] }
  0x43   : > { %1457 = vmatprep.subr.bf16.mxu0 %v1456_v21  ;;  %v1506_v19 = vpack.c.bf16 %v782_v18, %v781_v17  ;;  %v818_v21 = vld [vmem:[%s2155_s5 + $0x158] sm:$0xff] }
  0x44   : > { %1487 = vmatpush3.bf16.msra.mxu1 %v1484_v4  ;;  %v779_v4 = vld [vmem:[%s2155_s5 + $0x20] sm:$0xff] }
  0x45   : > { %1489 = vmatprep.subr.bf16.mxu1 %v1488_v14  ;;  %v1502_v9 = vpack.c.bf16 %v780_v5, %v779_v4 }
  0x46   : > { %1459 = vmatpush3.bf16.msra.mxu0 %v1458_v24  ;;  %v1544_v24 = vpack.c.bf16 %v818_v21, %v817_v20 }
  0x47   : > { %1493 = vmatprep.subr.bf16.mxu0 %v1492_v27  ;;  %v784_v27 = vld [vmem:[%s2155_s5 + $0x48] sm:$0xff] }
  0x48   : > { %1491 = vmatpush3.bf16.msra.mxu1 %v1488_v14  ;;  %v815_v14 = vld [vmem:[%s2155_s5 + $0x140] sm:$0xff]  ;;  %v1510_v28 = vpack.c.bf16 %v784_v27, %v783_v26 }
  0x49   : > { %1525 = vmatprep.subr.bf16.mxu1 %v1524_v30  ;;  %v1540_v16 = vpack.c.bf16 %v816_v15, %v815_v14 }
  0xfc   : > { %v1123_v31 = vpop.f32.mrb[0].mxu0 }
  0xfd   : > { %v1124_v32 = vpop.f32.mrb[1].mxu0 }
  0xfe   : > { %v1293_v33 = vpop.f32.mrb[0].mxu1  ;;  %v1125_v35 = vadd.f32 %v1124_v32, %v1123_v31  ;;  %v801_v31 = vld [vmem:[%s2155_s5 + $0xd0] sm:$0xff]  ;;  %v802_v32 = vld [vmem:[%s2155_s5 + $0xd8] sm:$0xff] }
  0xff   : > { %v541_v36 = vpop.f32.mrb[1].mxu1 }
 0x100   : > { %v1126_v37 = vpop.f32.mrb[2].mxu0  ;;  %v467_v38 = vadd.f32 %v1125_v35, %v1084_v34  ;;  %v785_v35 = vld [vmem:[%s2155_s5 + $0x50] sm:$0xff] }
 0x101   : > { %v1127_v39 = vpop.f32.mrb[3].mxu0 }
 0x102   : > { %v542_v40 = vadd.f32 %v541_v36, %v467_v38  ;;  %v1128_v41 = vadd.f32 %v1127_v39, %v1126_v37  ;;  %v786_v36 = vld [vmem:[%s2155_s5 + $0x58] sm:$0xff]  ;;  %v821_v38 = vld [vmem:[%s2155_s5 + $0x170] sm:$0xff] }
 0x103   : > { %v1514_v37 = vpack.c.bf16 %v786_v36, %v785_v35  ;;  %v822_v39 = vld [vmem:[%s2155_s5 + $0x178] sm:$0xff] }
 0x104   : > { %v550_v42 = vmax.f32 %v542_v40, 0.0  ;;  %v472_v43 = vadd.f32 %v1128_v41, %v1084_v34  ;;  %v1512_v34 = vpack.c.bf16 %v802_v32, %v801_v31  ;;  %v803_v40 = vld [vmem:[%s2155_s5 + $0xe0] sm:$0xff]  ;;  %v804_v41 = vld [vmem:[%s2155_s5 + $0xe8] sm:$0xff] }
 0x106   : > { %552 = vst [vmem:[#allocation3 + $0x8] sm:$0xff] %v550_v42  ;;  %v547_v46 = vadd.f32 %v1293_v33, %v472_v43  ;;  %1326 = vmatprep.mubr.f32.mxu1 %v550_v42  ;;  %v1516_v43 = vpack.c.bf16 %v804_v41, %v803_v40 }
 0x108   : > { %v551_v47 = vmax.f32 %v547_v46, 0.0  ;;  %v1518_v46 = vpack.c.bf16 %v788_v45, %v787_v44 }
 0x10a   : > { %553 = vst [vmem:[#allocation3 + $0x10] sm:$0xff] %v551_v47  ;;  %1327 = vmatmul.mubr.f32.vlgmr.msra.gmra.mrb[2].mxu1 %v551_v47  ;;  %v805_v47 = vld [vmem:[%s2155_s5 + $0xf0] sm:$0xff] }
 0x10b   : > { %1527 = vmatpush3.bf16.msra.mxu1 %v1524_v30  ;;  %v820_v30 = vld [vmem:[%s2155_s5 + $0x168] sm:$0xff] }
 0x10c   : > { %1529 = vmatprep.subr.bf16.mxu1 %v1528_v50  ;;  %v1548_v33 = vpack.c.bf16 %v820_v30, %v819_v29 }
 0x10d   : > { %v556_v59 = vld [vmem:[#allocation3 + $0x4] sm:$0xff] }
 0x10e   : > { %679 = vmatprep.mubr.f32.mxu0 %v556_v59  ;;  %v1085_v59 = vld [vmem:[%s2154_s4] ss:$0 sm:$0xff] }
 0x10f   : > { %680 = vmatmul.mubr.f32.vlgmr.msra.gmra.mrb[4].mxu0 %v1605_v7  ;;  %1531 = vmatpush3.bf16.msra.mxu1 %v1528_v50  ;;  %v1520_v50 = vpack.c.bf16 %v806_v48, %v805_v47 }
 0x110   : > { %1495 = vmatpush3.bf16.msra.mxu0 %v1494_v57  ;;  %1533 = vmatprep.subr.bf16.mxu1 %v1532_v58 }
 0x111   : > { %v557_v2 = vld [vmem:[#allocation3 + $0xc] sm:$0xff]  ;;  %1497 = vmatprep.subr.bf16.mxu0 %v1496_v60 }
 0x112   : > { %684 = vmatprep.mubr.f32.mxu0 %v557_v2 }
 0x113   : > { %685 = vmatmul.mubr.f32.gmra.mrb[6].mxu0 %v550_v42  ;;  %1535 = vmatpush3.bf16.msra.mxu1 %v1532_v58  ;;  %v1552_v42 = vpack.c.bf16 %v822_v39, %v821_v38 }
 0x114   : > { %1499 = vmatpush3.bf16.msra.mxu0 %v1498_v1  ;;  %1537 = vmatprep.subr.bf16.mxu1 %v1536_v13 }
 0x115   : > { %1501 = vmatprep.subr.bf16.mxu0 %v1500_v3 }
 0x117   : > { %1539 = vmatpush3.bf16.msra.mxu1 %v1536_v13  ;;  %v1086_v13 = vld [vmem:[%s2156_s6] ss:$0 sm:$0xff] }
 0x118   : > { %1503 = vmatpush3.bf16.msra.mxu0 %v1502_v9  ;;  %1541 = vmatprep.subr.bf16.mxu1 %v1540_v16 }
 0x119   : > { %1505 = vmatprep.subr.bf16.mxu0 %v1504_v10 }
 0x11b   : > { %1543 = vmatpush3.bf16.msra.mxu1 %v1540_v16 }
 0x11c   : > { %1507 = vmatpush3.bf16.msra.mxu0 %v1506_v19  ;;  %1545 = vmatprep.subr.bf16.mxu1 %v1544_v24 }
 0x11d   : > { %1509 = vmatprep.subr.bf16.mxu0 %v1508_v25 }
 0x11f   : > { %1547 = vmatpush3.bf16.msra.mxu1 %v1544_v24 }
 0x120   : > { %1511 = vmatpush3.bf16.msra.mxu0 %v1510_v28  ;;  %1549 = vmatprep.subr.bf16.mxu1 %v1548_v33 }
 0x121   : > { %1513 = vmatprep.subr.bf16.mxu0 %v1512_v34 }
 0x123   : > { %1551 = vmatpush3.bf16.msra.mxu1 %v1548_v33 }
 0x124   : > { %1515 = vmatpush3.bf16.msra.mxu0 %v1514_v37  ;;  %1553 = vmatprep.subr.bf16.mxu1 %v1552_v42 }
 0x125   : > { %1517 = vmatprep.subr.bf16.mxu0 %v1516_v43 }
 0x127   : > { %1555 = vmatpush3.bf16.msra.mxu1 %v1552_v42 }
 0x128   : > { %1519 = vmatpush3.bf16.msra.mxu0 %v1518_v46 }
 0x129   : > { %1521 = vmatprep.subr.bf16.mxu0 %v1520_v50 }
 0x12c   : > { %1523 = vmatpush3.bf16.msra.mxu0 %v1522_v54 }
 0x1dd   : > { %v1328_v55 = vpop.f32.mrb[2].mxu1 }
 0x1de   : > { %v756_v56 = vpop.f32.mrb[3].mxu1 }
 0x1e2   : > { %v1179_v57 = vpop.f32.mrb[4].mxu0 }
 0x1e3   : > { %v1180_v58 = vpop.f32.mrb[5].mxu0 }
 0x1e4   : > { %v1181_v60 = vadd.f32 %v1180_v58, %v1179_v57 }
 0x1e6   : > { %v1182_v61 = vpop.f32.mrb[6].mxu0  ;;  %v682_v62 = vadd.f32 %v1181_v60, %v1085_v59 }
 0x1e7   : > { %v1183_v63 = vpop.f32.mrb[7].mxu0 }
 0x1e8   : > { %v757_v0 = vadd.f32 %v756_v56, %v682_v62  ;;  %v1184_v1 = vadd.f32 %v1183_v63, %v1182_v61 }
 0x1ea   : > { %v765_v2 = vmax.f32 %v757_v0, 0.0  ;;  %v687_v3 = vadd.f32 %v1184_v1, %v1085_v59 }
 0x1ec   : > { %767 = vst [vmem:[#allocation4 + $0x8] sm:$0xff] %v765_v2  ;;  %v762_v4 = vadd.f32 %v1328_v55, %v687_v3  ;;  %1361 = vmatprep.mubr.f32.mxu1 %v765_v2 }
 0x1ee   : > { %v766_v5 = vmax.f32 %v762_v4, 0.0 }
 0x1f0   : > { %768 = vst [vmem:[#allocation4 + $0x10] sm:$0xff] %v766_v5  ;;  %1362 = vmatmul.mubr.f32.vlgmr.msra.gmra.mrb[4].mxu1 %v766_v5 }
 0x1f3   : > { %v771_v6 = vld [vmem:[#allocation4 + $0x4] sm:$0xff] }
 0x1f4   : > { %894 = vmatprep.mubr.f32.mxu0 %v771_v6 }
 0x1f5   : > { %895 = vmatmul.mubr.f32.vlgmr.msra.gmra.mrb[8].mxu0 %v1605_v7 }
 0x1f7   : > { %v772_v8 = vld [vmem:[#allocation4 + $0xc] sm:$0xff] }
 0x1f8   : > { %899 = vmatprep.mubr.f32.mxu0 %v772_v8 }
 0x1f9   : > { %900 = vmatmul.mubr.f32.gmra.mrb[10].mxu0 %v765_v2 }
 0x2c3   : > { %v1363_v9 = vpop.f32.mrb[4].mxu1 }
 0x2c4   : > { %v971_v10 = vpop.f32.mrb[5].mxu1 }
 0x2c8   : > { %v1235_v11 = vpop.f32.mrb[8].mxu0 }
 0x2c9   : > { %v1236_v12 = vpop.f32.mrb[9].mxu0 }
 0x2ca   : > { %v1237_v14 = vadd.f32 %v1236_v12, %v1235_v11 }
 0x2cc   : > { %v1238_v15 = vpop.f32.mrb[10].mxu0  ;;  %v897_v16 = vadd.f32 %v1237_v14, %v1086_v13 }
 0x2cd   : > { %v1239_v17 = vpop.f32.mrb[11].mxu0 }
 0x2ce   : > { %v972_v18 = vadd.f32 %v971_v10, %v897_v16  ;;  %v1240_v19 = vadd.f32 %v1239_v17, %v1238_v15 }
 0x2d0   : > { %v982_v7 = vadd.f32 %v972_v18, %v1783_v49  ;;  %v902_v20 = vadd.f32 %v1240_v19, %v1086_v13 }
 0x2d2   : > { %v984_v21 = vmax.f32 %v982_v7, 0.0  ;;  %v977_v22 = vadd.f32 %v1363_v9, %v902_v20 }
 0x2d4   : > { %986 = vst [vmem:[%s316_s14] sm:$0xff] %v984_v21  ;;  %v983_v23 = vadd.f32 %v977_v22, %v1787_v51 }
 0x2d6   : > { %v985_v24 = vmax.f32 %v983_v23, 0.0 }
 0x2d8   : > { %987 = vst [vmem:[%s316_s14 + $0x8] sm:$0xff] %v985_v24 }
 0x2d9 PF: > { %s17_s26 = sadd.s32 1, %s1603_s26   ;;  %s2158_s24 = smov %s1599_s25 }
 0x2da   : > { %p14_p5 = scmp.ge.s32.totalorder %s17_s26, 4   ;;  %s2159_s25 = smov %s2161_s27 }
 0x2dc   :  { %16 = sbr.rel (!%p14_p5) target bundleno = 2 (0x2), region = 86 }

// kernel: _lambda_.4
= control target key start
LH: loop header
LB: loop body
LE: loop exit
PB: predicated region body
PF: predicated region fallthrough
CT: control target
= control target key end

     0   :  { %14 = vsyncpa [#allocation6], 0  ;;  %s2336_s0 = inlined_call_operand.vmem [shape: f32[2,16,128], index: 0, kind: input, shape index: {}]   ;;  %s2337_s1 = inlined_call_operand.hbm [shape: f32[384,128], index: 1, kind: input, shape index: {}]   ;;  %s2338_s2 = inlined_call_operand.vmem [shape: f32[1,128], index: 2, kind: input, shape index: {}, may-alias: {2,4,6,8}]   ;;  %s2339_s3 = inlined_call_operand.hbm [shape: f32[384,128], index: 3, kind: input, shape index: {}]   ;;  %s2340_s4 = inlined_call_operand.vmem [shape: f32[1,128], index: 4, kind: input, shape index: {}, may-alias: {2,4,6,8}]   ;;  %s2341_s5 = inlined_call_operand.hbm [shape: f32[384,128], index: 5, kind: input, shape index: {}]   ;;  %s2342_s6 = inlined_call_operand.vmem [shape: f32[1,128], index: 6, kind: input, shape index: {}, may-alias: {2,4,6,8}]   ;;  %s2343_s7 = inlined_call_operand.vmem [shape: f32[128,128], index: 7, kind: input, shape index: {}]   ;;  %s2344_s8 = inlined_call_operand.vmem [shape: f32[1,128], index: 8, kind: input, shape index: {}, may-alias: {2,4,6,8}]   ;;  %s2345_s9 = inlined_call_operand.vmem [shape: f32[2,16,128], index: 9, kind: output, shape index: {}]  }
   0x1   :  { %15 = vsyncpa [#allocation8], 0  ;;  %s2111_s30 = smov 0   ;;  %s2113_s10 = smov 0  }
   0x2   :  { %s2115_s11 = smov 0  }
   0x3 LB: > { %2350 = sst [smem:[#allocation12_spill]] %s2049_s10  ;;  %s1302_s12 = sadd.s32 4294967295, %s2053_s11   ;;  %s2053_s11 = sphi %s2115_s11, %s21_s11   ;;  %s2049_s10 = sphi %s2113_s10, %s2359_s10   ;;  %s2045_s30 = sphi %s2111_s30, %s2358_s30  }
   0x4   : > { %p1304_p0 = scmp.ge.s32.totalorder %s2053_s11, 1  ;;  %p262_p1 = scmp.lt.s32.totalorder %s2053_s11, 3 }
   0x5   : > { %p2129_p2 = scmp.eq.s32.totalorder %s1302_s12, 0  ;;  %s2055_s15 = smov [#allocation7]  }
   0x6   : > { %p2133_p3 = pnand %p1304_p0, %p262_p1  ;;  %s290_s16 = sshll.u32 %s2055_s15, 4  ;;  %s2137_s16 = int_to_ptr.vmem [resolvable:$true] %s290_s16 }
   0x7   : > { %s2351_s13 = scalar_select %p2129_p2, 1, 0 }
   0x8   : > { %s2352_s14 = scalar_select %p2133_p3, 1, 0 }
   0x9   : > { %p1893_p4 = pneg %p2133_p3  ;;  %s33_s18 = sadd.s32 1, %s2049_s10 }
   0xa   : > { %p2148_p6 = scmp.ge.s32.totalorder %s33_s18, 2  ;;  %s2056_s20 = smov [#allocation5]  }
   0xb   : > { %p2143_p5 = pnand %p2129_p2, %p1893_p4  ;;  %s274_s21 = sshll.u32 %s2056_s20, 4  ;;  %s275_s21 = int_to_ptr.vmem [resolvable:$true] %s274_s21 }
   0xc   : > { %s1939_s24 = scalar_lea.hbm %s2339_s3, 6144 }
   0xd   : > { %p1940_p7 = scmp.ne.s32.totalorder %s2339_s3, %s1939_s24  ;;  %p2160_p8 = pneg %p2143_p5 }
   0xe   : > { %p1946_p11 = scmp.lt.u32.totalorder %s1939_s24, %s2339_s3 }
   0xf   : > { %p1942_p9 = pnand %p2160_p8, %p1940_p7 }
  0x11   : > { %p1943_p10 = pneg %p1942_p9 }
  0x13   : > { %p1948_p12 = pnand %p1946_p11, %p1943_p10 }
  0x15   : > { %1951 = shalt.err (!%p1948_p12)
}
  0x16   : > { %s1952_s12 = scalar_lea.vmem %s2137_s16, 6144  ;;  %p1960_p4 = scmp.lt.s32.totalorder %s2137_s16, %s2137_s16 }
  0x17   : > { %p1953_p13 = scmp.ne.s32.totalorder %s2137_s16, %s1952_s12  ;;  %p1961_p2 = scmp.lt.s32.totalorder %s1952_s12, %s1952_s12 }
  0x19   : > { %p1955_p0 = pnand %p1953_p13, %p2160_p8  ;;  %p1962_p7 = por %p1961_p2, %p1960_p4 }
  0x1b   : > { %p1956_p1 = pneg %p1955_p0 }
  0x1d   : > { %p1963_p9 = pnand %p1962_p7, %p1956_p1 }
  0x1f   : > { %1966 = shalt.err (!%p1963_p9)
}
  0x20   : > { %s2057_s15 = smov 128   ;;  %s2058_s20 = smov 8  }
  0x21   : > { %1899 = dma.hbm_to_vmem [thread:$0]  (!%p2143_p5), %s2339_s3, 6144, %s2137_s16, [#allocation8], %s2057_s15, %s2057_s15, %s2058_s20  }
  0x22   : > { %s2361_s18 = smov (%p2148_p6, %s33_s18), 0  ;;  %s1967_s26 = scalar_lea.hbm %s2337_s1, 6144 }
  0x23   : > { %p1968_p2 = scmp.ne.s32.totalorder %s2337_s1, %s1967_s26  ;;  %p1974_p12 = scmp.lt.u32.totalorder %s1967_s26, %s2337_s1 }
  0x25   : > { %p1970_p10 = pnand %p1968_p2, %p2160_p8 }
  0x27   : > { %p1971_p11 = pneg %p1970_p10 }
  0x29   : > { %p1976_p13 = pnand %p1974_p12, %p1971_p11 }
  0x2b   : > { %1979 = shalt.err (!%p1976_p13)
}
  0x2c   : > { %s1980_s16 = scalar_lea.vmem %s275_s21, 6144  ;;  %p1988_p4 = scmp.lt.s32.totalorder %s275_s21, %s275_s21 }
  0x2d   : > { %p1981_p6 = scmp.ne.s32.totalorder %s275_s21, %s1980_s16  ;;  %p1989_p7 = scmp.lt.s32.totalorder %s1980_s16, %s1980_s16 }
  0x2f   : > { %p1983_p0 = pnand %p1981_p6, %p2160_p8  ;;  %p1990_p9 = por %p1989_p7, %p1988_p4 }
  0x31   : > { %p1984_p1 = pneg %p1983_p0 }
  0x33   : > { %p1991_p3 = pnand %p1990_p9, %p1984_p1 }
  0x35   : > { %1994 = shalt.err (!%p1991_p3)
}
  0x36   : > { %1896 = dma.hbm_to_vmem [thread:$0]  (!%p2143_p5), %s2337_s1, 6144, %s275_s21, [#allocation6], %s2057_s15, %s2057_s15, %s2058_s20  }
  0x37   : > { %s2059_s22 = smov [#allocation9]   ;;  %s1995_s26 = scalar_lea.hbm %s2341_s5, 6144 }
  0x38   : > { %s306_s23 = sshll.u32 %s2059_s22, 4  ;;  %p1996_p3 = scmp.ne.s32.totalorder %s2341_s5, %s1995_s26  ;;  %s307_s23 = int_to_ptr.vmem [resolvable:$true] %s306_s23 }
  0x39   : > { %p2002_p11 = scmp.lt.u32.totalorder %s1995_s26, %s2341_s5 }
  0x3a   : > { %p1998_p2 = pnand %p1996_p3, %p2160_p8 }
  0x3c   : > { %p1999_p10 = pneg %p1998_p2 }
  0x3e   : > { %p2004_p12 = pnand %p2002_p11, %p1999_p10 }
  0x40   : > { %2007 = shalt.err (!%p2004_p12)
}
  0x41   : > { %s2008_s21 = scalar_lea.vmem %s307_s23, 6144  ;;  %p2016_p1 = scmp.lt.s32.totalorder %s307_s23, %s307_s23 }
  0x42   : > { %p2009_p13 = scmp.ne.s32.totalorder %s307_s23, %s2008_s21  ;;  %p2017_p4 = scmp.lt.s32.totalorder %s2008_s21, %s2008_s21 }
  0x44   : > { %p2011_p6 = pnand %p2009_p13, %p2160_p8  ;;  %p2018_p7 = por %p2017_p4, %p2016_p1 }
  0x46   : > { %p2012_p0 = pneg %p2011_p6 }
  0x48   : > { %p2019_p9 = pnand %p2018_p7, %p2012_p0 }
  0x4a   : > { %2022 = shalt.err (!%p2019_p9)
}
  0x4b   : > { %1902 = dma.hbm_to_vmem [thread:$0]  (!%p2143_p5), %s2341_s5, 6144, %s307_s23, [#allocation8], %s2057_s15, %s2057_s15, %s2058_s20  }
  0x4c   : > { %p2356_p3 = scmp.ne.s32.totalorder %s2352_s14, 0 }
  0x4d   : > { %p2357_p8 = scmp.ne.s32.totalorder (!%p2356_p3), %s2351_s13, 0 }
  0x4e   : > { %344 = sbr.rel (%p2356_p3) target bundleno = 830 (0x33e), region = 56 }
  0x55   : > { %2036 = dma.done.wait (%p2357_p8), [#allocation6], 6144  }
  0x56   : > { %2038 = vsyncadd (%p2357_p8), [#allocation6], 4294961152 }
  0x57   : > { %2040 = dma.done.wait (%p2357_p8), [#allocation8], 12288  }
  0x58   : > { %2042 = vsyncadd (%p2357_p8), [#allocation8], 4294955008  ;;  %v2060_v0 = vmov 0.0   ;;  %v459_v1 = vld [vmem:[#allocation5 + $0x80] sm:$0xff]  ;;  %v460_v2 = vld [vmem:[#allocation5 + $0x88] sm:$0xff]  ;;  %p397_p5 = scmp.lt.s32.totalorder %s2045_s30, 1 }
  0x59   : > { %420 = vst [vmem:[#allocation2] sm:$0xff] %v2060_v0  ;;  %421 = vst [vmem:[#allocation3] sm:$0xff] %v2060_v0  ;;  %v443_v3 = vld [vmem:[#allocation5] sm:$0xff]  ;;  %v1651_v4 = vpack.c.bf16 %v460_v2, %v459_v1  ;;  %v444_v5 = vld [vmem:[#allocation5 + $0x8] sm:$0xff] }
  0x5a   : > { %422 = vst [vmem:[#allocation4] sm:$0xff] %v2060_v0  ;;  %v475_v6 = vld [vmem:[#allocation5 + $0x100] sm:$0xff]  ;;  %v476_v7 = vld [vmem:[#allocation5 + $0x108] sm:$0xff]  ;;  %v1653_v8 = vpack.c.bf16 %v444_v5, %v443_v3  ;;  %v461_v10 = vld [vmem:[#allocation5 + $0x90] sm:$0xff]  ;;  %s2363_s30 = smov (!%p397_p5, %s2045_s30), 1 }
  0x5b   : > { %v1683_v9 = vpack.c.bf16 %v476_v7, %v475_v6  ;;  %v462_v11 = vld [vmem:[#allocation5 + $0x98] sm:$0xff]  ;;  %v445_v12 = vld [vmem:[#allocation5 + $0x10] sm:$0xff]  ;;  %1652 = vmatprep.subr.bf16.mxu0 %v1651_v4  ;;  %v463_v19 = vld [vmem:[#allocation5 + $0xa0] sm:$0xff]  ;;  %s1323_s13 = sshll.u32 %s2363_s30, 4 }
  0x5c   : > { %v1655_v13 = vpack.c.bf16 %v462_v11, %v461_v10  ;;  %v446_v14 = vld [vmem:[#allocation5 + $0x18] sm:$0xff]  ;;  %v477_v15 = vld [vmem:[#allocation5 + $0x110] sm:$0xff]  ;;  %1654 = vmatpush3.bf16.msra.mxu0 %v1653_v8  ;;  %v464_v20 = vld [vmem:[#allocation5 + $0xa8] sm:$0xff]  ;;  %s404_s27 = scalar_lea.vmem %s2336_s0, %s1323_s13  ;;  %s414_s29 = scalar_lea.vmem %s2345_s9, %s1323_s13 }
  0x5d   : > { %v478_v16 = vld [vmem:[#allocation5 + $0x118] sm:$0xff]  ;;  %1684 = vmatprep.subr.bf16.mxu1 %v1683_v9  ;;  %v1657_v17 = vpack.c.bf16 %v446_v14, %v445_v12  ;;  %v447_v21 = vld [vmem:[#allocation5 + $0x20] sm:$0xff]  ;;  %v1659_v22 = vpack.c.bf16 %v464_v20, %v463_v19  ;;  %v448_v23 = vld [vmem:[#allocation5 + $0x28] sm:$0xff] }
  0x5e   : > { %v1687_v18 = vpack.c.bf16 %v478_v16, %v477_v15  ;;  %1656 = vmatprep.subr.bf16.mxu0 %v1655_v13  ;;  %1686 = vmatpush3.bf16.msra.mxu1 %v1683_v9  ;;  %v479_v24 = vld [vmem:[#allocation5 + $0x120] sm:$0xff]  ;;  %v480_v25 = vld [vmem:[#allocation5 + $0x128] sm:$0xff]  ;;  %v465_v27 = vld [vmem:[#allocation5 + $0xb0] sm:$0xff]  ;;  %v1661_v31 = vpack.c.bf16 %v448_v23, %v447_v21 }
  0x5f   : > { %v1691_v26 = vpack.c.bf16 %v480_v25, %v479_v24  ;;  %v466_v28 = vld [vmem:[#allocation5 + $0xb8] sm:$0xff]  ;;  %v481_v29 = vld [vmem:[#allocation5 + $0x130] sm:$0xff]  ;;  %v467_v36 = vld [vmem:[#allocation5 + $0xc0] sm:$0xff] }
  0x60   : > { %1688 = vmatprep.subr.bf16.mxu1 %v1687_v18  ;;  %v482_v30 = vld [vmem:[#allocation5 + $0x138] sm:$0xff]  ;;  %1658 = vmatpush3.bf16.msra.mxu0 %v1657_v17  ;;  %v1663_v32 = vpack.c.bf16 %v466_v28, %v465_v27  ;;  %v449_v33 = vld [vmem:[#allocation5 + $0x30] sm:$0xff]  ;;  %v468_v37 = vld [vmem:[#allocation5 + $0xc8] sm:$0xff] }
  0x61   : > { %1660 = vmatprep.subr.bf16.mxu0 %v1659_v22  ;;  %v450_v34 = vld [vmem:[#allocation5 + $0x38] sm:$0xff]  ;;  %v1695_v35 = vpack.c.bf16 %v482_v30, %v481_v29  ;;  %v483_v38 = vld [vmem:[#allocation5 + $0x140] sm:$0xff]  ;;  %v484_v39 = vld [vmem:[#allocation5 + $0x148] sm:$0xff]  ;;  %v1667_v41 = vpack.c.bf16 %v468_v37, %v467_v36 }
  0x62   : > { %1690 = vmatpush3.bf16.msra.mxu1 %v1687_v18  ;;  %v1665_v40 = vpack.c.bf16 %v450_v34, %v449_v33  ;;  %v451_v42 = vld [vmem:[#allocation5 + $0x40] sm:$0xff]  ;;  %v452_v43 = vld [vmem:[#allocation5 + $0x48] sm:$0xff]  ;;  %v1699_v44 = vpack.c.bf16 %v484_v39, %v483_v38  ;;  %v469_v45 = vld [vmem:[#allocation5 + $0xd0] sm:$0xff] }
  0x63   : > { %1692 = vmatprep.subr.bf16.mxu1 %v1691_v26  ;;  %v470_v46 = vld [vmem:[#allocation5 + $0xd8] sm:$0xff]  ;;  %v485_v47 = vld [vmem:[#allocation5 + $0x150] sm:$0xff]  ;;  %v1669_v50 = vpack.c.bf16 %v452_v43, %v451_v42  ;;  %v2256_v51 = vld [vmem:[%s404_s27 + $0x8] sm:$0xff] }
  0x64   : > { %1662 = vmatpush3.bf16.msra.mxu0 %v1661_v31  ;;  %v486_v48 = vld [vmem:[#allocation5 + $0x158] sm:$0xff]  ;;  %v1671_v52 = vpack.c.bf16 %v470_v46, %v469_v45  ;;  %v453_v53 = vld [vmem:[#allocation5 + $0x50] sm:$0xff]  ;;  %436 = vst [vmem:[#allocation2 + $0x10] sm:$0xff] %v2256_v51  ;;  %v471_v56 = vld [vmem:[#allocation5 + $0xe0] sm:$0xff] }
  0x65   : > { %1664 = vmatprep.subr.bf16.mxu0 %v1663_v32  ;;  %v2252_v49 = vld [vmem:[%s404_s27] sm:$0xff]  ;;  %v1703_v55 = vpack.c.bf16 %v486_v48, %v485_v47  ;;  %v472_v57 = vld [vmem:[#allocation5 + $0xe8] sm:$0xff]  ;;  %v487_v58 = vld [vmem:[#allocation5 + $0x160] sm:$0xff] }
  0x66   : > { %1694 = vmatpush3.bf16.msra.mxu1 %v1691_v26  ;;  %435 = vst [vmem:[#allocation2 + $0x8] sm:$0xff] %v2252_v49  ;;  %1543 = vmatprep.mubr.f32.mxu1 %v2252_v49  ;;  %v454_v54 = vld [vmem:[#allocation5 + $0x58] sm:$0xff]  ;;  %v488_v59 = vld [vmem:[#allocation5 + $0x168] sm:$0xff]  ;;  %v1675_v61 = vpack.c.bf16 %v472_v57, %v471_v56  ;;  %v455_v62 = vld [vmem:[#allocation5 + $0x60] sm:$0xff] }
  0x67   : > { %1696 = vmatprep.subr.bf16.mxu1 %v1695_v35  ;;  %v1673_v60 = vpack.c.bf16 %v454_v54, %v453_v53  ;;  %v456_v63 = vld [vmem:[#allocation5 + $0x68] sm:$0xff]  ;;  %v1707_v0 = vpack.c.bf16 %v488_v59, %v487_v58  ;;  %v473_v1 = vld [vmem:[#allocation5 + $0xf0] sm:$0xff]  ;;  %v474_v2 = vld [vmem:[#allocation5 + $0xf8] sm:$0xff] }
  0x68   : > { %1666 = vmatpush3.bf16.msra.mxu0 %v1665_v40  ;;  %v489_v4 = vld [vmem:[#allocation5 + $0x170] sm:$0xff]  ;;  %v490_v5 = vld [vmem:[#allocation5 + $0x178] sm:$0xff]  ;;  %v1677_v6 = vpack.c.bf16 %v456_v63, %v455_v62  ;;  %v1679_v7 = vpack.c.bf16 %v474_v2, %v473_v1  ;;  %v674_v11 = vld [vmem:[#allocation7 + $0x80] sm:$0xff] }
  0x69   : > { %1668 = vmatprep.subr.bf16.mxu0 %v1667_v41  ;;  %v457_v8 = vld [vmem:[#allocation5 + $0x70] sm:$0xff]  ;;  %v458_v9 = vld [vmem:[#allocation5 + $0x78] sm:$0xff]  ;;  %v1711_v10 = vpack.c.bf16 %v490_v5, %v489_v4  ;;  %v675_v12 = vld [vmem:[#allocation7 + $0x88] sm:$0xff] }
  0x6a   : > { %1698 = vmatpush3.bf16.msra.mxu1 %v1695_v35  ;;  %v690_v13 = vld [vmem:[#allocation7 + $0x100] sm:$0xff]  ;;  %v691_v14 = vld [vmem:[#allocation7 + $0x108] sm:$0xff]  ;;  %v1681_v15 = vpack.c.bf16 %v458_v9, %v457_v8  ;;  %v1715_v16 = vpack.c.bf16 %v675_v12, %v674_v11  ;;  %v676_v20 = vld [vmem:[#allocation7 + $0x90] sm:$0xff] }
  0x6b   : > { %1700 = vmatprep.subr.bf16.mxu1 %v1699_v44  ;;  %v658_v17 = vld [vmem:[#allocation7] sm:$0xff]  ;;  %v659_v18 = vld [vmem:[#allocation7 + $0x8] sm:$0xff]  ;;  %v1747_v19 = vpack.c.bf16 %v691_v14, %v690_v13  ;;  %v677_v21 = vld [vmem:[#allocation7 + $0x98] sm:$0xff] }
  0x6c   : > { %1670 = vmatpush3.bf16.msra.mxu0 %v1669_v50  ;;  %v692_v22 = vld [vmem:[#allocation7 + $0x110] sm:$0xff]  ;;  %v693_v23 = vld [vmem:[#allocation7 + $0x118] sm:$0xff]  ;;  %v1717_v26 = vpack.c.bf16 %v659_v18, %v658_v17  ;;  %v1719_v27 = vpack.c.bf16 %v677_v21, %v676_v20  ;;  %v678_v31 = vld [vmem:[#allocation7 + $0xa0] sm:$0xff] }
  0x6d   : > { %1672 = vmatprep.subr.bf16.mxu0 %v1671_v52  ;;  %v439_v3 = vld [vmem:[#allocation2 + $0x7] sm:$0xff]  ;;  %v440_v25 = vld [vmem:[#allocation2 + $0xf] sm:$0xff]  ;;  %v660_v28 = vld [vmem:[#allocation7 + $0x10] sm:$0xff]  ;;  %v1751_v30 = vpack.c.bf16 %v693_v23, %v692_v22 }
  0x6e   : > { %1702 = vmatpush3.bf16.msra.mxu1 %v1699_v44  ;;  %562 = vmatprep.mubr.f32.mxu0 %v439_v3  ;;  %v437_v24 = vld [vmem:[#allocation2 + $0x6] sm:$0xff]  ;;  %v679_v32 = vld [vmem:[#allocation7 + $0xa8] sm:$0xff]  ;;  %v680_v41 = vld [vmem:[#allocation7 + $0xb0] sm:$0xff] }
  0x6f   : > { %1704 = vmatprep.subr.bf16.mxu1 %v1703_v55  ;;  %v661_v29 = vld [vmem:[#allocation7 + $0x18] sm:$0xff]  ;;  %v694_v33 = vld [vmem:[#allocation7 + $0x120] sm:$0xff]  ;;  %v695_v34 = vld [vmem:[#allocation7 + $0x128] sm:$0xff]  ;;  %v1723_v37 = vpack.c.bf16 %v679_v32, %v678_v31 }
  0x70   : > { %1674 = vmatpush3.bf16.msra.mxu0 %v1673_v60  ;;  %v438_v35 = vld [vmem:[#allocation2 + $0xe] sm:$0xff]  ;;  %v1721_v36 = vpack.c.bf16 %v661_v29, %v660_v28  ;;  %v1755_v40 = vpack.c.bf16 %v695_v34, %v694_v33  ;;  %v681_v42 = vld [vmem:[#allocation7 + $0xb8] sm:$0xff]  ;;  %v696_v45 = vld [vmem:[#allocation7 + $0x130] sm:$0xff] }
  0x71   : > { %1676 = vmatprep.subr.bf16.mxu0 %v1675_v61  ;;  %v662_v38 = vld [vmem:[#allocation7 + $0x20] sm:$0xff]  ;;  %v663_v39 = vld [vmem:[#allocation7 + $0x28] sm:$0xff]  ;;  %v1727_v44 = vpack.c.bf16 %v681_v42, %v680_v41  ;;  %v697_v46 = vld [vmem:[#allocation7 + $0x138] sm:$0xff] }
  0x72   : > { %1706 = vmatpush3.bf16.msra.mxu1 %v1703_v55  ;;  %v1725_v43 = vpack.c.bf16 %v663_v39, %v662_v38  ;;  %v1759_v47 = vpack.c.bf16 %v697_v46, %v696_v45  ;;  %v698_v48 = vld [vmem:[#allocation7 + $0x140] sm:$0xff]  ;;  %v699_v50 = vld [vmem:[#allocation7 + $0x148] sm:$0xff]  ;;  %v664_v53 = vld [vmem:[#allocation7 + $0x30] sm:$0xff] }
  0x73   : > { %1708 = vmatprep.subr.bf16.mxu1 %v1707_v0  ;;  %v1763_v52 = vpack.c.bf16 %v699_v50, %v698_v48  ;;  %v665_v54 = vld [vmem:[#allocation7 + $0x38] sm:$0xff]  ;;  %v700_v56 = vld [vmem:[#allocation7 + $0x150] sm:$0xff]  ;;  %v682_v58 = vld [vmem:[#allocation7 + $0xc0] sm:$0xff] }
  0x74   : > { %1678 = vmatpush3.bf16.msra.mxu0 %v1677_v6  ;;  %v1729_v55 = vpack.c.bf16 %v665_v54, %v664_v53  ;;  %v701_v57 = vld [vmem:[#allocation7 + $0x158] sm:$0xff]  ;;  %v683_v59 = vld [vmem:[#allocation7 + $0xc8] sm:$0xff]  ;;  %v666_v62 = vld [vmem:[#allocation7 + $0x40] sm:$0xff] }
  0x75   : > { %1680 = vmatprep.subr.bf16.mxu0 %v1679_v7  ;;  %v1767_v60 = vpack.c.bf16 %v701_v57, %v700_v56  ;;  %v1731_v61 = vpack.c.bf16 %v683_v59, %v682_v58  ;;  %v667_v63 = vld [vmem:[#allocation7 + $0x48] sm:$0xff]  ;;  %v702_v1 = vld [vmem:[#allocation7 + $0x160] sm:$0xff]  ;;  %v684_v3 = vld [vmem:[#allocation7 + $0xd0] sm:$0xff] }
  0x76   : > { %1710 = vmatpush3.bf16.msra.mxu1 %v1707_v0  ;;  %v1733_v0 = vpack.c.bf16 %v667_v63, %v666_v62  ;;  %v703_v2 = vld [vmem:[#allocation7 + $0x168] sm:$0xff]  ;;  %v685_v4 = vld [vmem:[#allocation7 + $0xd8] sm:$0xff]  ;;  %v668_v7 = vld [vmem:[#allocation7 + $0x50] sm:$0xff] }
  0x77   : > { %1712 = vmatprep.subr.bf16.mxu1 %v1711_v10  ;;  %v1771_v5 = vpack.c.bf16 %v703_v2, %v702_v1  ;;  %v1735_v6 = vpack.c.bf16 %v685_v4, %v684_v3  ;;  %v669_v8 = vld [vmem:[#allocation7 + $0x58] sm:$0xff]  ;;  %v686_v12 = vld [vmem:[#allocation7 + $0xe0] sm:$0xff]  ;;  %v687_v13 = vld [vmem:[#allocation7 + $0xe8] sm:$0xff] }
  0x78   : > { %1682 = vmatpush3.bf16.msra.mxu0 %v1681_v15  ;;  %v1737_v9 = vpack.c.bf16 %v669_v8, %v668_v7  ;;  %v705_v11 = vld [vmem:[#allocation7 + $0x178] sm:$0xff]  ;;  %v1739_v15 = vpack.c.bf16 %v687_v13, %v686_v12  ;;  %v671_v17 = vld [vmem:[#allocation7 + $0x68] sm:$0xff]  ;;  %v672_v22 = vld [vmem:[#allocation7 + $0x70] sm:$0xff] }
  0x79   : > { %1716 = vmatprep.subr.bf16.mxu0 %v1715_v16  ;;  %v670_v16 = vld [vmem:[#allocation7 + $0x60] sm:$0xff]  ;;  %v689_v20 = vld [vmem:[#allocation7 + $0xf8] sm:$0xff]  ;;  %v906_v29 = vld [vmem:[#allocation9 + $0x108] sm:$0xff] }
  0x7a   : > { %1714 = vmatpush3.bf16.msra.mxu1 %v1711_v10  ;;  %v704_v10 = vld [vmem:[#allocation7 + $0x170] sm:$0xff]  ;;  %v1741_v18 = vpack.c.bf16 %v671_v17, %v670_v16  ;;  %v673_v23 = vld [vmem:[#allocation7 + $0x78] sm:$0xff]  ;;  %v905_v28 = vld [vmem:[#allocation9 + $0x100] sm:$0xff] }
  0x7b   : > { %1748 = vmatprep.subr.bf16.mxu1 %v1747_v19  ;;  %563 = vmatmul.mubr.f32.vlgmr.msra.gmra.mrb[0].mxu0 %v437_v24  ;;  %v1775_v14 = vpack.c.bf16 %v705_v11, %v704_v10  ;;  %v1745_v24 = vpack.c.bf16 %v673_v23, %v672_v22  ;;  %v1317_v34 = vld [vmem:[%s2338_s2] ss:$0 sm:$0xff]  ;;  %v873_v48 = vld [vmem:[#allocation9] sm:$0xff]  ;;  %v910_v54 = vld [vmem:[#allocation9 + $0x128] sm:$0xff] }
  0x7c   : > { %567 = vmatprep.mubr.f32.mxu0 %v440_v25  ;;  %1718 = vmatpush3.bf16.msra.mxu0 %v1717_v26  ;;  %v889_v25 = vld [vmem:[#allocation9 + $0x80] sm:$0xff]  ;;  %v890_v26 = vld [vmem:[#allocation9 + $0x88] sm:$0xff]  ;;  %v908_v45 = vld [vmem:[#allocation9 + $0x118] sm:$0xff] }
  0x7d   : > { %1544 = vmatmul.mubr.f32.vlgmr.msra.gmra.mrb[0].mxu1 %v2256_v51  ;;  %1720 = vmatprep.subr.bf16.mxu0 %v1719_v27  ;;  %v1779_v27 = vpack.c.bf16 %v890_v26, %v889_v25  ;;  %v909_v53 = vld [vmem:[#allocation9 + $0x120] sm:$0xff]  ;;  %v892_v56 = vld [vmem:[#allocation9 + $0x98] sm:$0xff]  ;;  %v875_v58 = vld [vmem:[#allocation9 + $0x10] sm:$0xff] }
  0x7e   : > { %1750 = vmatpush3.bf16.msra.mxu1 %v1747_v19  ;;  %v688_v19 = vld [vmem:[#allocation7 + $0xf0] sm:$0xff]  ;;  %v1819_v59 = vpack.c.bf16 %v910_v54, %v909_v53  ;;  %v876_v63 = vld [vmem:[#allocation9 + $0x18] sm:$0xff]  ;;  %v894_v1 = vld [vmem:[#allocation9 + $0xa8] sm:$0xff] }
  0x7f   : > { %1752 = vmatprep.subr.bf16.mxu1 %v1751_v30  ;;  %568 = vmatmul.mubr.f32.gmra.mrb[2].mxu0 %v438_v35  ;;  %v1743_v21 = vpack.c.bf16 %v689_v20, %v688_v19  ;;  %v1785_v2 = vpack.c.bf16 %v876_v63, %v875_v58  ;;  %v877_v3 = vld [vmem:[#allocation9 + $0x20] sm:$0xff]  ;;  %v878_v7 = vld [vmem:[#allocation9 + $0x28] sm:$0xff]  ;;  %v895_v8 = vld [vmem:[#allocation9 + $0xb0] sm:$0xff] }
  0x80   : > { %1722 = vmatpush3.bf16.msra.mxu0 %v1721_v36  ;;  %v1789_v10 = vpack.c.bf16 %v878_v7, %v877_v3  ;;  %v911_v12 = vld [vmem:[#allocation9 + $0x130] sm:$0xff]  ;;  %v912_v13 = vld [vmem:[#allocation9 + $0x138] sm:$0xff]  ;;  %v914_v16 = vld [vmem:[#allocation9 + $0x148] sm:$0xff] }
  0x81   : > { %1724 = vmatprep.subr.bf16.mxu0 %v1723_v37  ;;  %v880_v19 = vld [vmem:[#allocation9 + $0x38] sm:$0xff]  ;;  %v898_v25 = vld [vmem:[#allocation9 + $0xc8] sm:$0xff]  ;;  %v903_v53 = vld [vmem:[#allocation9 + $0xf0] sm:$0xff] }
  0x82   : > { %1754 = vmatpush3.bf16.msra.mxu1 %v1751_v30  ;;  %v1811_v30 = vpack.c.bf16 %v906_v29, %v905_v28  ;;  %v916_v22 = vld [vmem:[#allocation9 + $0x158] sm:$0xff]  ;;  %v882_v28 = vld [vmem:[#allocation9 + $0x48] sm:$0xff] }
  0x83   : > { %1756 = vmatprep.subr.bf16.mxu1 %v1755_v40  ;;  %v904_v54 = vld [vmem:[#allocation9 + $0xf8] sm:$0xff] }
  0x84   : > { %1726 = vmatpush3.bf16.msra.mxu0 %v1725_v43  ;;  %v1318_v63 = vld [vmem:[%s2340_s4] ss:$0 sm:$0xff] }
  0x85   : > { %1728 = vmatprep.subr.bf16.mxu0 %v1727_v44  ;;  %v907_v44 = vld [vmem:[#allocation9 + $0x110] sm:$0xff] }
  0x86   : > { %1758 = vmatpush3.bf16.msra.mxu1 %v1755_v40  ;;  %v1815_v50 = vpack.c.bf16 %v908_v45, %v907_v44  ;;  %v885_v45 = vld [vmem:[#allocation9 + $0x60] sm:$0xff] }
  0x87   : > { %1760 = vmatprep.subr.bf16.mxu1 %v1759_v47 }
  0x88   : > { %1730 = vmatpush3.bf16.msra.mxu0 %v1729_v55  ;;  %v891_v55 = vld [vmem:[#allocation9 + $0x90] sm:$0xff] }
  0x89   : > { %1732 = vmatprep.subr.bf16.mxu0 %v1731_v61  ;;  %v1783_v62 = vpack.c.bf16 %v892_v56, %v891_v55  ;;  %v1807_v55 = vpack.c.bf16 %v904_v54, %v903_v53  ;;  %v887_v56 = vld [vmem:[#allocation9 + $0x70] sm:$0xff] }
  0x8a   : > { %1762 = vmatpush3.bf16.msra.mxu1 %v1759_v47 }
  0x8b   : > { %1764 = vmatprep.subr.bf16.mxu1 %v1763_v52 }
  0x8c   : > { %1734 = vmatpush3.bf16.msra.mxu0 %v1733_v0  ;;  %v893_v0 = vld [vmem:[#allocation9 + $0xa0] sm:$0xff] }
  0x8d   : > { %1736 = vmatprep.subr.bf16.mxu0 %v1735_v6  ;;  %v1787_v6 = vpack.c.bf16 %v894_v1, %v893_v0 }
  0x8e   : > { %1766 = vmatpush3.bf16.msra.mxu1 %v1763_v52  ;;  %v874_v52 = vld [vmem:[#allocation9 + $0x8] sm:$0xff] }
  0x8f   : > { %1768 = vmatprep.subr.bf16.mxu1 %v1767_v60  ;;  %v1781_v57 = vpack.c.bf16 %v874_v52, %v873_v48  ;;  %v1080_v48 = vld [vmem:[%s2343_s7] sm:$0xff] }
  0x90   : > { %1738 = vmatpush3.bf16.msra.mxu0 %v1737_v9  ;;  %v896_v9 = vld [vmem:[#allocation9 + $0xb8] sm:$0xff] }
  0x91   : > { %1740 = vmatprep.subr.bf16.mxu0 %v1739_v15  ;;  %v1791_v11 = vpack.c.bf16 %v896_v9, %v895_v8  ;;  %v913_v15 = vld [vmem:[#allocation9 + $0x140] sm:$0xff]  ;;  %v1082_v8 = vld [vmem:[%s2343_s7 + $0x10] sm:$0xff]  ;;  %v1083_v9 = vld [vmem:[%s2343_s7 + $0x18] sm:$0xff] }
  0x92   : > { %1770 = vmatpush3.bf16.msra.mxu1 %v1767_v60  ;;  %v1827_v17 = vpack.c.bf16 %v914_v16, %v913_v15  ;;  %v1086_v16 = vld [vmem:[%s2343_s7 + $0x30] sm:$0xff] }
  0x93   : > { %1772 = vmatprep.subr.bf16.mxu1 %v1771_v5 }
  0x94   : > { %1742 = vmatpush3.bf16.msra.mxu0 %v1741_v18  ;;  %v879_v18 = vld [vmem:[#allocation9 + $0x30] sm:$0xff] }
  0x95   : > { %1744 = vmatprep.subr.bf16.mxu0 %v1743_v21  ;;  %v1793_v20 = vpack.c.bf16 %v880_v19, %v879_v18  ;;  %v915_v21 = vld [vmem:[#allocation9 + $0x150] sm:$0xff] }
  0x96   : > { %1774 = vmatpush3.bf16.msra.mxu1 %v1771_v5  ;;  %v1831_v23 = vpack.c.bf16 %v916_v22, %v915_v21  ;;  %v1087_v19 = vld [vmem:[%s2343_s7 + $0x38] sm:$0xff] }
  0x97   : > { %1776 = vmatprep.subr.bf16.mxu1 %v1775_v14 }
  0x98   : > { %1746 = vmatpush3.bf16.msra.mxu0 %v1745_v24  ;;  %v897_v24 = vld [vmem:[#allocation9 + $0xc0] sm:$0xff] }
  0x99   : > { %1780 = vmatprep.subr.bf16.mxu0 %v1779_v27  ;;  %v1795_v26 = vpack.c.bf16 %v898_v25, %v897_v24  ;;  %v881_v27 = vld [vmem:[#allocation9 + $0x40] sm:$0xff]  ;;  %v1090_v25 = vld [vmem:[%s2343_s7 + $0x50] sm:$0xff] }
  0x9a   : > { %1778 = vmatpush3.bf16.msra.mxu1 %v1775_v14  ;;  %v1823_v14 = vpack.c.bf16 %v912_v13, %v911_v12  ;;  %v1797_v29 = vpack.c.bf16 %v882_v28, %v881_v27  ;;  %v1847_v12 = vpack.c.bf16 %v1083_v9, %v1082_v8  ;;  %v1084_v13 = vld [vmem:[%s2343_s7 + $0x20] sm:$0xff] }
  0x9b   : > { %1812 = vmatprep.subr.bf16.mxu1 %v1811_v30  ;;  %v1092_v28 = vld [vmem:[%s2343_s7 + $0x60] sm:$0xff] }
 0x14e   : > { %v1357_v31 = vpop.f32.mrb[0].mxu0 }
 0x14f   : > { %v1358_v32 = vpop.f32.mrb[1].mxu0 }
 0x150   : > { %v1545_v33 = vpop.f32.mrb[0].mxu1  ;;  %v1359_v35 = vadd.f32 %v1358_v32, %v1357_v31  ;;  %v918_v31 = vld [vmem:[#allocation9 + $0x168] sm:$0xff] }
 0x151   : > { %v639_v36 = vpop.f32.mrb[1].mxu1 }
 0x152   : > { %v1360_v37 = vpop.f32.mrb[2].mxu0  ;;  %v565_v38 = vadd.f32 %v1359_v35, %v1317_v34 }
 0x153   : > { %v1361_v39 = vpop.f32.mrb[3].mxu0 }
 0x154   : > { %v640_v40 = vadd.f32 %v639_v36, %v565_v38  ;;  %v1362_v41 = vadd.f32 %v1361_v39, %v1360_v37  ;;  %v883_v36 = vld [vmem:[#allocation9 + $0x50] sm:$0xff]  ;;  %v884_v37 = vld [vmem:[#allocation9 + $0x58] sm:$0xff] }
 0x155   : > { %v1801_v38 = vpack.c.bf16 %v884_v37, %v883_v36  ;;  %v919_v39 = vld [vmem:[#allocation9 + $0x170] sm:$0xff] }
 0x156   : > { %v648_v42 = vmax.f32 %v640_v40, 0.0  ;;  %v570_v43 = vadd.f32 %v1362_v41, %v1317_v34  ;;  %v900_v34 = vld [vmem:[#allocation9 + $0xd8] sm:$0xff] }
 0x157   : > { %v920_v40 = vld [vmem:[#allocation9 + $0x178] sm:$0xff] }
 0x158   : > { %650 = vst [vmem:[#allocation3 + $0x8] sm:$0xff] %v648_v42  ;;  %v645_v46 = vadd.f32 %v1545_v33, %v570_v43  ;;  %1578 = vmatprep.mubr.f32.mxu1 %v648_v42  ;;  %v899_v33 = vld [vmem:[#allocation9 + $0xd0] sm:$0xff]  ;;  %v1839_v41 = vpack.c.bf16 %v920_v40, %v919_v39  ;;  %v901_v42 = vld [vmem:[#allocation9 + $0xe0] sm:$0xff]  ;;  %v902_v43 = vld [vmem:[#allocation9 + $0xe8] sm:$0xff] }
 0x159   : > { %v1799_v35 = vpack.c.bf16 %v900_v34, %v899_v33  ;;  %v1803_v44 = vpack.c.bf16 %v902_v43, %v901_v42  ;;  %v1319_v40 = vld [vmem:[%s2342_s6] ss:$0 sm:$0xff] }
 0x15a   : > { %v649_v47 = vmax.f32 %v645_v46, 0.0  ;;  %v886_v46 = vld [vmem:[#allocation9 + $0x68] sm:$0xff]  ;;  %v1320_v43 = vld [vmem:[%s2344_s8] ss:$0 sm:$0xff] }
 0x15c   : > { %651 = vst [vmem:[#allocation3 + $0x10] sm:$0xff] %v649_v47  ;;  %1579 = vmatmul.mubr.f32.vlgmr.msra.gmra.mrb[2].mxu1 %v649_v47  ;;  %v1805_v47 = vpack.c.bf16 %v886_v46, %v885_v45 }
 0x15d   : > { %1814 = vmatpush3.bf16.msra.mxu1 %v1811_v30  ;;  %v917_v30 = vld [vmem:[#allocation9 + $0x160] sm:$0xff] }
 0x15e   : > { %1816 = vmatprep.subr.bf16.mxu1 %v1815_v50  ;;  %v1835_v32 = vpack.c.bf16 %v918_v31, %v917_v30  ;;  %v1094_v31 = vld [vmem:[%s2343_s7 + $0x70] sm:$0xff] }
 0x15f   : > { %v654_v60 = vld [vmem:[#allocation3 + $0x7] sm:$0xff] }
 0x160   : > { %v652_v61 = vld [vmem:[#allocation3 + $0x6] sm:$0xff]  ;;  %777 = vmatprep.mubr.f32.mxu0 %v654_v60 }
 0x161   : > { %778 = vmatmul.mubr.f32.vlgmr.msra.gmra.mrb[4].mxu0 %v652_v61  ;;  %1818 = vmatpush3.bf16.msra.mxu1 %v1815_v50  ;;  %v1081_v50 = vld [vmem:[%s2343_s7 + $0x8] sm:$0xff] }
 0x162   : > { %1782 = vmatpush3.bf16.msra.mxu0 %v1781_v57  ;;  %1820 = vmatprep.subr.bf16.mxu1 %v1819_v59  ;;  %v1843_v52 = vpack.c.bf16 %v1081_v50, %v1080_v48  ;;  %v888_v57 = vld [vmem:[#allocation9 + $0x78] sm:$0xff] }
 0x163   : > { %v655_v4 = vld [vmem:[#allocation3 + $0xf] sm:$0xff]  ;;  %1784 = vmatprep.subr.bf16.mxu0 %v1783_v62  ;;  %v1809_v58 = vpack.c.bf16 %v888_v57, %v887_v56 }
 0x164   : > { %v653_v5 = vld [vmem:[#allocation3 + $0xe] sm:$0xff]  ;;  %782 = vmatprep.mubr.f32.mxu0 %v655_v4 }
 0x165   : > { %783 = vmatmul.mubr.f32.gmra.mrb[6].mxu0 %v653_v5  ;;  %1822 = vmatpush3.bf16.msra.mxu1 %v1819_v59 }
 0x166   : > { %1786 = vmatpush3.bf16.msra.mxu0 %v1785_v2  ;;  %1824 = vmatprep.subr.bf16.mxu1 %v1823_v14 }
 0x167   : > { %1788 = vmatprep.subr.bf16.mxu0 %v1787_v6 }
 0x169   : > { %1826 = vmatpush3.bf16.msra.mxu1 %v1823_v14  ;;  %v1085_v14 = vld [vmem:[%s2343_s7 + $0x28] sm:$0xff] }
 0x16a   : > { %1790 = vmatpush3.bf16.msra.mxu0 %v1789_v10  ;;  %1828 = vmatprep.subr.bf16.mxu1 %v1827_v17  ;;  %v1851_v15 = vpack.c.bf16 %v1085_v14, %v1084_v13 }
 0x16b   : > { %1792 = vmatprep.subr.bf16.mxu0 %v1791_v11 }
 0x16d   : > { %1830 = vmatpush3.bf16.msra.mxu1 %v1827_v17 }
 0x16e   : > { %1794 = vmatpush3.bf16.msra.mxu0 %v1793_v20  ;;  %1832 = vmatprep.subr.bf16.mxu1 %v1831_v23  ;;  %v1855_v20 = vpack.c.bf16 %v1087_v19, %v1086_v16 }
 0x16f   : > { %1796 = vmatprep.subr.bf16.mxu0 %v1795_v26  ;;  %v1091_v26 = vld [vmem:[%s2343_s7 + $0x58] sm:$0xff] }
 0x170   : > { %v1863_v27 = vpack.c.bf16 %v1091_v26, %v1090_v25 }
 0x171   : > { %1834 = vmatpush3.bf16.msra.mxu1 %v1831_v23  ;;  %v1089_v23 = vld [vmem:[%s2343_s7 + $0x48] sm:$0xff] }
 0x172   : > { %1798 = vmatpush3.bf16.msra.mxu0 %v1797_v29  ;;  %1836 = vmatprep.subr.bf16.mxu1 %v1835_v32  ;;  %v1093_v29 = vld [vmem:[%s2343_s7 + $0x68] sm:$0xff] }
 0x173   : > { %1800 = vmatprep.subr.bf16.mxu0 %v1799_v35  ;;  %v1867_v30 = vpack.c.bf16 %v1093_v29, %v1092_v28 }
 0x175   : > { %1838 = vmatpush3.bf16.msra.mxu1 %v1835_v32  ;;  %v1095_v32 = vld [vmem:[%s2343_s7 + $0x78] sm:$0xff] }
 0x176   : > { %1802 = vmatpush3.bf16.msra.mxu0 %v1801_v38  ;;  %1840 = vmatprep.subr.bf16.mxu1 %v1839_v41  ;;  %v1871_v33 = vpack.c.bf16 %v1095_v32, %v1094_v31 }
 0x177   : > { %1804 = vmatprep.subr.bf16.mxu0 %v1803_v44 }
 0x179   : > { %1842 = vmatpush3.bf16.msra.mxu1 %v1839_v41 }
 0x17a   : > { %1806 = vmatpush3.bf16.msra.mxu0 %v1805_v47  ;;  %1844 = vmatprep.subr.bf16.mxu1 %v1843_v52 }
 0x17b   : > { %1808 = vmatprep.subr.bf16.mxu0 %v1807_v55 }
 0x17e   : > { %1810 = vmatpush3.bf16.msra.mxu0 %v1809_v58 }
 0x22f   : > { %v1580_v59 = vpop.f32.mrb[2].mxu1 }
 0x230   : > { %v854_v60 = vpop.f32.mrb[3].mxu1 }
 0x234   : > { %v1413_v61 = vpop.f32.mrb[4].mxu0 }
 0x235   : > { %v1414_v62 = vpop.f32.mrb[5].mxu0 }
 0x236   : > { %v1415_v0 = vadd.f32 %v1414_v62, %v1413_v61 }
 0x238   : > { %v1416_v1 = vpop.f32.mrb[6].mxu0  ;;  %v780_v2 = vadd.f32 %v1415_v0, %v1318_v63 }
 0x239   : > { %v1417_v3 = vpop.f32.mrb[7].mxu0 }
 0x23a   : > { %v855_v4 = vadd.f32 %v854_v60, %v780_v2  ;;  %v1418_v5 = vadd.f32 %v1417_v3, %v1416_v1 }
 0x23c   : > { %v863_v6 = vmax.f32 %v855_v4, 0.0  ;;  %v785_v7 = vadd.f32 %v1418_v5, %v1318_v63 }
 0x23e   : > { %865 = vst [vmem:[#allocation4 + $0x8] sm:$0xff] %v863_v6  ;;  %v860_v10 = vadd.f32 %v1580_v59, %v785_v7  ;;  %1613 = vmatprep.mubr.f32.mxu1 %v863_v6 }
 0x240   : > { %v864_v11 = vmax.f32 %v860_v10, 0.0 }
 0x242   : > { %866 = vst [vmem:[#allocation4 + $0x10] sm:$0xff] %v864_v11  ;;  %1614 = vmatmul.mubr.f32.vlgmr.msra.gmra.mrb[4].mxu1 %v864_v11 }
 0x243   : > { %1846 = vmatpush3.bf16.msra.mxu1 %v1843_v52  ;;  %1648 = vmatprep.mubr.f32.mxu1 %v2252_v49  ;;  %v1088_v49 = vld [vmem:[%s2343_s7 + $0x40] sm:$0xff] }
 0x244   : > { %1848 = vmatprep.subr.bf16.mxu1 %v1847_v12  ;;  %v1859_v24 = vpack.c.bf16 %v1089_v23, %v1088_v49 }
 0x245   : > { %v869_v17 = vld [vmem:[#allocation4 + $0x7] sm:$0xff] }
 0x246   : > { %v867_v18 = vld [vmem:[#allocation4 + $0x6] sm:$0xff]  ;;  %992 = vmatprep.mubr.f32.mxu0 %v869_v17 }
 0x247   : > { %993 = vmatmul.mubr.f32.vlgmr.msra.gmra.mrb[8].mxu0 %v867_v18  ;;  %1850 = vmatpush3.bf16.msra.mxu1 %v1847_v12 }
 0x248   : > { %1852 = vmatprep.subr.bf16.mxu1 %v1851_v15 }
 0x249   : > { %v870_v21 = vld [vmem:[#allocation4 + $0xf] sm:$0xff] }
 0x24a   : > { %v868_v22 = vld [vmem:[#allocation4 + $0xe] sm:$0xff]  ;;  %997 = vmatprep.mubr.f32.mxu0 %v870_v21 }
 0x24b   : > { %998 = vmatmul.mubr.f32.gmra.mrb[10].mxu0 %v868_v22  ;;  %1854 = vmatpush3.bf16.msra.mxu1 %v1851_v15 }
 0x24c   : > { %1856 = vmatprep.subr.bf16.mxu1 %v1855_v20 }
 0x24f   : > { %1858 = vmatpush3.bf16.msra.mxu1 %v1855_v20 }
 0x250   : > { %1860 = vmatprep.subr.bf16.mxu1 %v1859_v24 }
 0x253   : > { %1862 = vmatpush3.bf16.msra.mxu1 %v1859_v24 }
 0x254   : > { %1864 = vmatprep.subr.bf16.mxu1 %v1863_v27 }
 0x257   : > { %1866 = vmatpush3.bf16.msra.mxu1 %v1863_v27 }
 0x258   : > { %1868 = vmatprep.subr.bf16.mxu1 %v1867_v30 }
 0x25b   : > { %1870 = vmatpush3.bf16.msra.mxu1 %v1867_v30 }
 0x25c   : > { %1872 = vmatprep.subr.bf16.mxu1 %v1871_v33 }
 0x25f   : > { %1874 = vmatpush3.bf16.msra.mxu1 %v1871_v33 }
 0x262   : > { %1649 = vmatmul.mubr.f32.vlgmr.msra.gmra.mrb[4].mxu1 %v2256_v51 }
 0x31a   : > { %v1469_v34 = vpop.f32.mrb[8].mxu0 }
 0x31b   : > { %v1470_v35 = vpop.f32.mrb[9].mxu0 }
 0x31c   : > { %v1471_v36 = vadd.f32 %v1470_v35, %v1469_v34 }
 0x31e   : > { %v1472_v37 = vpop.f32.mrb[10].mxu0  ;;  %v995_v44 = vadd.f32 %v1471_v36, %v1319_v40 }
 0x31f   : > { %v1473_v38 = vpop.f32.mrb[11].mxu0 }
 0x320   : > { %v1474_v39 = vadd.f32 %v1473_v38, %v1472_v37 }
 0x322   : > { %v1000_v41 = vadd.f32 %v1474_v39, %v1319_v40 }
 0x335   : > { %v1650_v42 = vpop.f32.mrb[4].mxu1 }
 0x336   : > { %v1875_v45 = vadd.f32 %v1650_v42, %v1000_v41  ;;  %v1169_v51 = vpop.f32.mrb[5].mxu1 }
 0x337   : > { %v1877_v46 = vadd.f32 %v1169_v51, %v995_v44 }
 0x338   : > { %v1876_v47 = vadd.f32 %v1875_v45, %v1320_v43 }
 0x339   : > { %v1878_v48 = vadd.f32 %v1877_v46, %v1320_v43 }
 0x33a   : > { %v1181_v50 = vmax.f32 %v1876_v47, 0.0 }
 0x33b   : > { %v1180_v52 = vmax.f32 %v1878_v48, 0.0 }
 0x33c   : > { %1183 = vst [vmem:[%s414_s29 + $0x8] sm:$0xff] %v1181_v50 }
 0x33d   : > { %1182 = vst [vmem:[%s414_s29] sm:$0xff] %v1180_v52 }
 0x33e PF: > { %s21_s11 = sadd.s32 1, %s2053_s11   ;;  %s2358_s30 = sld [smem:[#allocation12_spill]] }
 0x33f   : > { %p18_p2 = scmp.ge.s32.totalorder %s21_s11, 4   ;;  %s2359_s10 = smov %s2361_s18 }
 0x341   :  { %20 = sbr.rel (!%p18_p2) target bundleno = 3 (0x3), region = 107 }
 0x348   :  { %1214 = vsyncpa [#allocation6], 1 }
 0x349   :  { %1216 = vsyncpa [#allocation6 + $0x1], 1 }
 0x34a   :  { %1217 = vsyncpa [#allocation8], 1 }

// kernel: _lambda_.7
= control target key start
LH: loop header
LB: loop body
LE: loop exit
PB: predicated region body
PF: predicated region fallthrough
CT: control target
= control target key end

     0   :  { %s1909_s30 = smov 0   ;;  %s1911_s10 = smov 0   ;;  %s2457_s0 = inlined_call_operand.vmem [shape: f32[2,16,128], index: 0, kind: input, shape index: {}]   ;;  %s2458_s1 = inlined_call_operand.vmem [shape: f32[384,128], index: 1, kind: input, shape index: {}]   ;;  %s2459_s2 = inlined_call_operand.vmem [shape: f32[1,128], index: 2, kind: input, shape index: {}, may-alias: {2,4,6,8}]   ;;  %s2460_s3 = inlined_call_operand.vmem [shape: f32[384,128], index: 3, kind: input, shape index: {}]   ;;  %s2461_s4 = inlined_call_operand.vmem [shape: f32[1,128], index: 4, kind: input, shape index: {}, may-alias: {2,4,6,8}]   ;;  %s2462_s5 = inlined_call_operand.vmem [shape: f32[384,128], index: 5, kind: input, shape index: {}]   ;;  %s2463_s6 = inlined_call_operand.vmem [shape: f32[1,128], index: 6, kind: input, shape index: {}, may-alias: {2,4,6,8}]   ;;  %s2464_s7 = inlined_call_operand.vmem [shape: f32[128,128], index: 7, kind: input, shape index: {}]   ;;  %s2465_s8 = inlined_call_operand.vmem [shape: f32[1,128], index: 8, kind: input, shape index: {}, may-alias: {2,4,6,8}]   ;;  %s2466_s9 = inlined_call_operand.vmem [shape: f32[2,16,128], index: 9, kind: output, shape index: {}]  }
   0x1   :  { %s1913_s11 = smov 0  }
   0x2 LB: > { %s31_s12 = sadd.s32 1, %s1852_s10  ;;  %p1240_p0 = scmp.ge.s32.totalorder %s1856_s11, 1  ;;  %s1856_s11 = sphi %s1913_s11, %s19_s11   ;;  %s1852_s10 = sphi %s1911_s10, %s2468_s10   ;;  %s1848_s30 = sphi %s1909_s30, %s2467_s30  }
   0x3   : > { %p33_p1 = scmp.ge.s32.totalorder %s31_s12, 2  ;;  %p308_p2 = scmp.lt.s32.totalorder %s1856_s11, 3 }
   0x5   : > { %s2470_s12 = smov (%p33_p1, %s31_s12), 0  ;;  %p309_p3 = pnand %p1240_p0, %p308_p2 }
   0x6   : > { %v424_v0 = vld [vmem:[%s2458_s1 + $0x80] sm:$0xff] (!%p309_p3)  ;;  %v425_v1 = vld [vmem:[%s2458_s1 + $0x88] sm:$0xff] (!%p309_p3)  ;;  %p353_p4 = scmp.lt.s32.totalorder (!%p309_p3), %s1848_s30, 1  ;;  %v1858_v7 = vmov (!%p309_p3), 0.0   ;;  %v426_v10 = vld [vmem:[%s2458_s1 + $0x90] sm:$0xff] (!%p309_p3) }
   0x7   : > { %312 = sbr.rel (%p309_p3) target bundleno = 748 (0x2ec), region = 56  ;;  %v408_v2 = vld [vmem:[%s2458_s1] sm:$0xff] (!%p309_p3)  ;;  %v1579_v3 = vpack.c.bf16 (!%p309_p3), %v425_v1, %v424_v0  ;;  %v409_v4 = vld [vmem:[%s2458_s1 + $0x8] sm:$0xff] (!%p309_p3)  ;;  %377 = vst [vmem:[#allocation2 + $0x8] sm:$0xff] (!%p309_p3), %v1858_v7  ;;  %376 = vst [vmem:[#allocation2] sm:$0xff] (!%p309_p3), %v1858_v7 }
   0x8   : > { %v440_v5 = vld [vmem:[%s2458_s1 + $0x100] sm:$0xff] (!%p309_p3)  ;;  %v441_v6 = vld [vmem:[%s2458_s1 + $0x108] sm:$0xff] (!%p309_p3)  ;;  %378 = vst [vmem:[#allocation3] sm:$0xff] (!%p309_p3), %v1858_v7  ;;  %379 = vst [vmem:[#allocation3 + $0x8] sm:$0xff] (!%p309_p3), %v1858_v7  ;;  %v1581_v8 = vpack.c.bf16 (!%p309_p3), %v409_v4, %v408_v2 }
   0x9   : > { %380 = vst [vmem:[#allocation4] sm:$0xff] (!%p309_p3), %v1858_v7  ;;  %381 = vst [vmem:[#allocation4 + $0x8] sm:$0xff] (!%p309_p3), %v1858_v7  ;;  %v1611_v9 = vpack.c.bf16 (!%p309_p3), %v441_v6, %v440_v5  ;;  %v427_v11 = vld [vmem:[%s2458_s1 + $0x98] sm:$0xff] (!%p309_p3)  ;;  %v410_v12 = vld [vmem:[%s2458_s1 + $0x10] sm:$0xff] (!%p309_p3)  ;;  %1580 = vmatprep.subr.bf16.mxu0 (!%p309_p3), %v1579_v3 }
   0xa   : > { %v1583_v13 = vpack.c.bf16 (!%p309_p3), %v427_v11, %v426_v10  ;;  %v411_v14 = vld [vmem:[%s2458_s1 + $0x18] sm:$0xff] (!%p309_p3)  ;;  %v442_v15 = vld [vmem:[%s2458_s1 + $0x110] sm:$0xff] (!%p309_p3)  ;;  %1582 = vmatpush3.bf16.msra.mxu0 (!%p309_p3), %v1581_v8  ;;  %v428_v19 = vld [vmem:[%s2458_s1 + $0xa0] sm:$0xff] (!%p309_p3) }
   0xb   : > { %v443_v16 = vld [vmem:[%s2458_s1 + $0x118] sm:$0xff] (!%p309_p3)  ;;  %1612 = vmatprep.subr.bf16.mxu1 (!%p309_p3), %v1611_v9  ;;  %v1585_v17 = vpack.c.bf16 (!%p309_p3), %v411_v14, %v410_v12  ;;  %v429_v20 = vld [vmem:[%s2458_s1 + $0xa8] sm:$0xff] (!%p309_p3)  ;;  %v412_v21 = vld [vmem:[%s2458_s1 + $0x20] sm:$0xff] (!%p309_p3) }
   0xc   : > { %v1615_v18 = vpack.c.bf16 (!%p309_p3), %v443_v16, %v442_v15  ;;  %1584 = vmatprep.subr.bf16.mxu0 (!%p309_p3), %v1583_v13  ;;  %1614 = vmatpush3.bf16.msra.mxu1 (!%p309_p3), %v1611_v9  ;;  %v1587_v22 = vpack.c.bf16 (!%p309_p3), %v429_v20, %v428_v19  ;;  %v413_v23 = vld [vmem:[%s2458_s1 + $0x28] sm:$0xff] (!%p309_p3)  ;;  %v444_v24 = vld [vmem:[%s2458_s1 + $0x120] sm:$0xff] (!%p309_p3)  ;;  %v430_v27 = vld [vmem:[%s2458_s1 + $0xb0] sm:$0xff] (!%p309_p3) }
   0xd   : > { %v445_v25 = vld [vmem:[%s2458_s1 + $0x128] sm:$0xff] (!%p309_p3)  ;;  %v431_v28 = vld [vmem:[%s2458_s1 + $0xb8] sm:$0xff] (!%p309_p3)  ;;  %v446_v29 = vld [vmem:[%s2458_s1 + $0x130] sm:$0xff] (!%p309_p3)  ;;  %v1589_v31 = vpack.c.bf16 (!%p309_p3), %v413_v23, %v412_v21 }
   0xe   : > { %s2472_s30 = smov (!%p353_p4, %s1848_s30), 1  ;;  %1616 = vmatprep.subr.bf16.mxu1 %v1615_v18  ;;  %v1619_v26 = vpack.c.bf16 %v445_v25, %v444_v24  ;;  %v447_v30 = vld [vmem:[%s2458_s1 + $0x138] sm:$0xff]  ;;  %1586 = vmatpush3.bf16.msra.mxu0 %v1585_v17  ;;  %v1591_v32 = vpack.c.bf16 %v431_v28, %v430_v27  ;;  %v414_v33 = vld [vmem:[%s2458_s1 + $0x30] sm:$0xff]  ;;  %v432_v36 = vld [vmem:[%s2458_s1 + $0xc0] sm:$0xff] }
   0xf   : > { %1588 = vmatprep.subr.bf16.mxu0 %v1587_v22  ;;  %v415_v34 = vld [vmem:[%s2458_s1 + $0x38] sm:$0xff]  ;;  %s1251_s27 = sshll.u32 %s2472_s30, 4  ;;  %v1623_v35 = vpack.c.bf16 %v447_v30, %v446_v29  ;;  %v433_v37 = vld [vmem:[%s2458_s1 + $0xc8] sm:$0xff]  ;;  %v448_v38 = vld [vmem:[%s2458_s1 + $0x140] sm:$0xff] }
  0x10   : > { %1618 = vmatpush3.bf16.msra.mxu1 %v1615_v18  ;;  %v449_v39 = vld [vmem:[%s2458_s1 + $0x148] sm:$0xff]  ;;  %v1593_v40 = vpack.c.bf16 %v415_v34, %v414_v33  ;;  %s360_s21 = scalar_lea.vmem %s2457_s0, %s1251_s27  ;;  %v1595_v41 = vpack.c.bf16 %v433_v37, %v432_v36  ;;  %v416_v42 = vld [vmem:[%s2458_s1 + $0x40] sm:$0xff]  ;;  %v434_v45 = vld [vmem:[%s2458_s1 + $0xd0] sm:$0xff] }
  0x11   : > { %1620 = vmatprep.subr.bf16.mxu1 %v1619_v26  ;;  %v417_v43 = vld [vmem:[%s2458_s1 + $0x48] sm:$0xff]  ;;  %v1627_v44 = vpack.c.bf16 %v449_v39, %v448_v38  ;;  %v435_v46 = vld [vmem:[%s2458_s1 + $0xd8] sm:$0xff]  ;;  %v450_v47 = vld [vmem:[%s2458_s1 + $0x150] sm:$0xff] }
  0x12   : > { %1590 = vmatpush3.bf16.msra.mxu0 %v1589_v31  ;;  %v451_v48 = vld [vmem:[%s2458_s1 + $0x158] sm:$0xff]  ;;  %v2043_v49 = vld [vmem:[%s360_s21] sm:$0xff]  ;;  %v1597_v50 = vpack.c.bf16 %v417_v43, %v416_v42  ;;  %v2047_v51 = vld [vmem:[%s360_s21 + $0x8] sm:$0xff]  ;;  %v1599_v52 = vpack.c.bf16 %v435_v46, %v434_v45  ;;  %s370_s21 = scalar_lea.vmem %s2466_s9, %s1251_s27 }
  0x13   : > { %1592 = vmatprep.subr.bf16.mxu0 %v1591_v32  ;;  %400 = vst [vmem:[#allocation2 + $0x10] sm:$0xff] %v2043_v49  ;;  %1471 = vmatprep.mubr.f32.mxu1 %v2043_v49  ;;  %v418_v53 = vld [vmem:[%s2458_s1 + $0x50] sm:$0xff]  ;;  %v419_v54 = vld [vmem:[%s2458_s1 + $0x58] sm:$0xff]  ;;  %401 = vst [vmem:[#allocation2 + $0x18] sm:$0xff] %v2047_v51  ;;  %v1631_v55 = vpack.c.bf16 %v451_v48, %v450_v47 }
  0x14   : > { %1622 = vmatpush3.bf16.msra.mxu1 %v1619_v26  ;;  %v436_v56 = vld [vmem:[%s2458_s1 + $0xe0] sm:$0xff]  ;;  %v437_v57 = vld [vmem:[%s2458_s1 + $0xe8] sm:$0xff]  ;;  %v1601_v60 = vpack.c.bf16 %v419_v54, %v418_v53  ;;  %v438_v1 = vld [vmem:[%s2458_s1 + $0xf0] sm:$0xff] }
  0x15   : > { %1624 = vmatprep.subr.bf16.mxu1 %v1623_v35  ;;  %v452_v58 = vld [vmem:[%s2458_s1 + $0x160] sm:$0xff]  ;;  %v453_v59 = vld [vmem:[%s2458_s1 + $0x168] sm:$0xff]  ;;  %v1603_v61 = vpack.c.bf16 %v437_v57, %v436_v56  ;;  %v439_v2 = vld [vmem:[%s2458_s1 + $0xf8] sm:$0xff] }
  0x16   : > { %1594 = vmatpush3.bf16.msra.mxu0 %v1593_v40  ;;  %v420_v62 = vld [vmem:[%s2458_s1 + $0x60] sm:$0xff]  ;;  %v421_v63 = vld [vmem:[%s2458_s1 + $0x68] sm:$0xff]  ;;  %v1635_v0 = vpack.c.bf16 %v453_v59, %v452_v58  ;;  %v454_v4 = vld [vmem:[%s2458_s1 + $0x170] sm:$0xff]  ;;  %v1607_v7 = vpack.c.bf16 %v439_v2, %v438_v1 }
  0x17   : > { %1596 = vmatprep.subr.bf16.mxu0 %v1595_v41  ;;  %v455_v5 = vld [vmem:[%s2458_s1 + $0x178] sm:$0xff]  ;;  %v1605_v6 = vpack.c.bf16 %v421_v63, %v420_v62  ;;  %v422_v8 = vld [vmem:[%s2458_s1 + $0x70] sm:$0xff]  ;;  %v639_v11 = vld [vmem:[%s2460_s3 + $0x80] sm:$0xff] }
  0x18   : > { %1626 = vmatpush3.bf16.msra.mxu1 %v1623_v35  ;;  %v423_v9 = vld [vmem:[%s2458_s1 + $0x78] sm:$0xff]  ;;  %v1639_v10 = vpack.c.bf16 %v455_v5, %v454_v4  ;;  %v640_v12 = vld [vmem:[%s2460_s3 + $0x88] sm:$0xff]  ;;  %v655_v13 = vld [vmem:[%s2460_s3 + $0x100] sm:$0xff] }
  0x19   : > { %1628 = vmatprep.subr.bf16.mxu1 %v1627_v44  ;;  %v656_v14 = vld [vmem:[%s2460_s3 + $0x108] sm:$0xff]  ;;  %v1609_v15 = vpack.c.bf16 %v423_v9, %v422_v8  ;;  %v1643_v16 = vpack.c.bf16 %v640_v12, %v639_v11  ;;  %v623_v17 = vld [vmem:[%s2460_s3] sm:$0xff]  ;;  %v641_v20 = vld [vmem:[%s2460_s3 + $0x90] sm:$0xff] }
  0x1a   : > { %1598 = vmatpush3.bf16.msra.mxu0 %v1597_v50  ;;  %v404_v3 = vld [vmem:[#allocation2 + $0xb] sm:$0xff]  ;;  %v1675_v19 = vpack.c.bf16 %v656_v14, %v655_v13  ;;  %v642_v21 = vld [vmem:[%s2460_s3 + $0x98] sm:$0xff]  ;;  %v643_v31 = vld [vmem:[%s2460_s3 + $0xa0] sm:$0xff] }
  0x1b   : > { %1600 = vmatprep.subr.bf16.mxu0 %v1599_v52  ;;  %527 = vmatprep.mubr.f32.mxu0 %v404_v3  ;;  %v624_v18 = vld [vmem:[%s2460_s3 + $0x8] sm:$0xff]  ;;  %v657_v22 = vld [vmem:[%s2460_s3 + $0x110] sm:$0xff]  ;;  %v658_v23 = vld [vmem:[%s2460_s3 + $0x118] sm:$0xff]  ;;  %v1647_v27 = vpack.c.bf16 %v642_v21, %v641_v20 }
  0x1c   : > { %1630 = vmatpush3.bf16.msra.mxu1 %v1627_v44  ;;  %v402_v24 = vld [vmem:[#allocation2 + $0x6] sm:$0xff]  ;;  %v405_v25 = vld [vmem:[#allocation2 + $0x13] sm:$0xff]  ;;  %v1645_v26 = vpack.c.bf16 %v624_v18, %v623_v17  ;;  %v1679_v30 = vpack.c.bf16 %v658_v23, %v657_v22 }
  0x1d   : > { %1632 = vmatprep.subr.bf16.mxu1 %v1631_v55  ;;  %v625_v28 = vld [vmem:[%s2460_s3 + $0x10] sm:$0xff]  ;;  %v626_v29 = vld [vmem:[%s2460_s3 + $0x18] sm:$0xff]  ;;  %v644_v32 = vld [vmem:[%s2460_s3 + $0xa8] sm:$0xff] }
  0x1e   : > { %1602 = vmatpush3.bf16.msra.mxu0 %v1601_v60  ;;  %v659_v33 = vld [vmem:[%s2460_s3 + $0x120] sm:$0xff]  ;;  %v660_v34 = vld [vmem:[%s2460_s3 + $0x128] sm:$0xff]  ;;  %v1649_v36 = vpack.c.bf16 %v626_v29, %v625_v28  ;;  %v1651_v37 = vpack.c.bf16 %v644_v32, %v643_v31  ;;  %v645_v41 = vld [vmem:[%s2460_s3 + $0xb0] sm:$0xff] }
  0x1f   : > { %1604 = vmatprep.subr.bf16.mxu0 %v1603_v61  ;;  %v403_v35 = vld [vmem:[#allocation2 + $0xe] sm:$0xff]  ;;  %v627_v38 = vld [vmem:[%s2460_s3 + $0x20] sm:$0xff]  ;;  %v1683_v40 = vpack.c.bf16 %v660_v34, %v659_v33  ;;  %v646_v42 = vld [vmem:[%s2460_s3 + $0xb8] sm:$0xff] }
  0x20   : > { %1634 = vmatpush3.bf16.msra.mxu1 %v1631_v55  ;;  %v628_v39 = vld [vmem:[%s2460_s3 + $0x28] sm:$0xff]  ;;  %v1655_v44 = vpack.c.bf16 %v646_v42, %v645_v41  ;;  %v661_v45 = vld [vmem:[%s2460_s3 + $0x130] sm:$0xff]  ;;  %v662_v46 = vld [vmem:[%s2460_s3 + $0x138] sm:$0xff] }
  0x21   : > { %1636 = vmatprep.subr.bf16.mxu1 %v1635_v0  ;;  %v1653_v43 = vpack.c.bf16 %v628_v39, %v627_v38  ;;  %v1687_v47 = vpack.c.bf16 %v662_v46, %v661_v45  ;;  %v663_v48 = vld [vmem:[%s2460_s3 + $0x140] sm:$0xff]  ;;  %v664_v50 = vld [vmem:[%s2460_s3 + $0x148] sm:$0xff]  ;;  %v629_v53 = vld [vmem:[%s2460_s3 + $0x30] sm:$0xff] }
  0x22   : > { %1606 = vmatpush3.bf16.msra.mxu0 %v1605_v6  ;;  %v1691_v52 = vpack.c.bf16 %v664_v50, %v663_v48  ;;  %v630_v54 = vld [vmem:[%s2460_s3 + $0x38] sm:$0xff]  ;;  %v665_v56 = vld [vmem:[%s2460_s3 + $0x150] sm:$0xff]  ;;  %v647_v58 = vld [vmem:[%s2460_s3 + $0xc0] sm:$0xff] }
  0x23   : > { %1608 = vmatprep.subr.bf16.mxu0 %v1607_v7  ;;  %v1657_v55 = vpack.c.bf16 %v630_v54, %v629_v53  ;;  %v666_v57 = vld [vmem:[%s2460_s3 + $0x158] sm:$0xff]  ;;  %v648_v59 = vld [vmem:[%s2460_s3 + $0xc8] sm:$0xff]  ;;  %v631_v62 = vld [vmem:[%s2460_s3 + $0x40] sm:$0xff] }
  0x24   : > { %1638 = vmatpush3.bf16.msra.mxu1 %v1635_v0  ;;  %v1695_v60 = vpack.c.bf16 %v666_v57, %v665_v56  ;;  %v1659_v61 = vpack.c.bf16 %v648_v59, %v647_v58  ;;  %v632_v63 = vld [vmem:[%s2460_s3 + $0x48] sm:$0xff]  ;;  %v667_v1 = vld [vmem:[%s2460_s3 + $0x160] sm:$0xff]  ;;  %v649_v3 = vld [vmem:[%s2460_s3 + $0xd0] sm:$0xff] }
  0x25   : > { %1640 = vmatprep.subr.bf16.mxu1 %v1639_v10  ;;  %v1661_v0 = vpack.c.bf16 %v632_v63, %v631_v62  ;;  %v668_v2 = vld [vmem:[%s2460_s3 + $0x168] sm:$0xff]  ;;  %v650_v4 = vld [vmem:[%s2460_s3 + $0xd8] sm:$0xff]  ;;  %v633_v7 = vld [vmem:[%s2460_s3 + $0x50] sm:$0xff] }
  0x26   : > { %1610 = vmatpush3.bf16.msra.mxu0 %v1609_v15  ;;  %v1699_v5 = vpack.c.bf16 %v668_v2, %v667_v1  ;;  %v1663_v6 = vpack.c.bf16 %v650_v4, %v649_v3  ;;  %v634_v8 = vld [vmem:[%s2460_s3 + $0x58] sm:$0xff]  ;;  %v651_v12 = vld [vmem:[%s2460_s3 + $0xe0] sm:$0xff]  ;;  %v652_v13 = vld [vmem:[%s2460_s3 + $0xe8] sm:$0xff] }
  0x27   : > { %1644 = vmatprep.subr.bf16.mxu0 %v1643_v16  ;;  %v1665_v9 = vpack.c.bf16 %v634_v8, %v633_v7  ;;  %v670_v11 = vld [vmem:[%s2460_s3 + $0x178] sm:$0xff]  ;;  %v1667_v15 = vpack.c.bf16 %v652_v13, %v651_v12  ;;  %v635_v16 = vld [vmem:[%s2460_s3 + $0x60] sm:$0xff]  ;;  %v636_v17 = vld [vmem:[%s2460_s3 + $0x68] sm:$0xff] }
  0x28   : > { %1642 = vmatpush3.bf16.msra.mxu1 %v1639_v10  ;;  %v669_v10 = vld [vmem:[%s2460_s3 + $0x170] sm:$0xff]  ;;  %v1669_v18 = vpack.c.bf16 %v636_v17, %v635_v16  ;;  %v654_v20 = vld [vmem:[%s2460_s3 + $0xf8] sm:$0xff]  ;;  %v870_v28 = vld [vmem:[%s2462_s5 + $0x100] sm:$0xff] }
  0x29   : > { %1676 = vmatprep.subr.bf16.mxu1 %v1675_v19  ;;  %528 = vmatmul.mubr.f32.vlgmr.msra.gmra.mrb[0].mxu0 %v402_v24  ;;  %v1703_v14 = vpack.c.bf16 %v670_v11, %v669_v10  ;;  %v637_v22 = vld [vmem:[%s2460_s3 + $0x70] sm:$0xff]  ;;  %v638_v23 = vld [vmem:[%s2460_s3 + $0x78] sm:$0xff]  ;;  %v871_v29 = vld [vmem:[%s2462_s5 + $0x108] sm:$0xff] }
  0x2a   : > { %532 = vmatprep.mubr.f32.mxu0 %v405_v25  ;;  %1646 = vmatpush3.bf16.msra.mxu0 %v1645_v26  ;;  %v1673_v24 = vpack.c.bf16 %v638_v23, %v637_v22  ;;  %v854_v25 = vld [vmem:[%s2462_s5 + $0x80] sm:$0xff]  ;;  %v855_v26 = vld [vmem:[%s2462_s5 + $0x88] sm:$0xff]  ;;  %v873_v45 = vld [vmem:[%s2462_s5 + $0x118] sm:$0xff] }
  0x2b   : > { %1472 = vmatmul.mubr.f32.vlgmr.msra.gmra.mrb[0].mxu1 %v2047_v51  ;;  %1648 = vmatprep.subr.bf16.mxu0 %v1647_v27  ;;  %v1707_v27 = vpack.c.bf16 %v855_v26, %v854_v25  ;;  %v1245_v34 = vld [vmem:[%s2459_s2] ss:$0 sm:$0xff]  ;;  %v875_v54 = vld [vmem:[%s2462_s5 + $0x128] sm:$0xff]  ;;  %v857_v56 = vld [vmem:[%s2462_s5 + $0x98] sm:$0xff] }
  0x2c   : > { %1678 = vmatpush3.bf16.msra.mxu1 %v1675_v19  ;;  %v653_v19 = vld [vmem:[%s2460_s3 + $0xf0] sm:$0xff]  ;;  %v838_v48 = vld [vmem:[%s2462_s5] sm:$0xff]  ;;  %v841_v63 = vld [vmem:[%s2462_s5 + $0x18] sm:$0xff] }
  0x2d   : > { %1680 = vmatprep.subr.bf16.mxu1 %v1679_v30  ;;  %533 = vmatmul.mubr.f32.gmra.mrb[2].mxu0 %v403_v35  ;;  %v1671_v21 = vpack.c.bf16 %v654_v20, %v653_v19  ;;  %v874_v53 = vld [vmem:[%s2462_s5 + $0x120] sm:$0xff]  ;;  %v840_v62 = vld [vmem:[%s2462_s5 + $0x10] sm:$0xff]  ;;  %v859_v1 = vld [vmem:[%s2462_s5 + $0xa8] sm:$0xff] }
  0x2e   : > { %1650 = vmatpush3.bf16.msra.mxu0 %v1649_v36  ;;  %v617_v57 = vld [vmem:[#allocation3 + $0x6] sm:$0xff]  ;;  %v1747_v59 = vpack.c.bf16 %v875_v54, %v874_v53  ;;  %v1713_v2 = vpack.c.bf16 %v841_v63, %v840_v62  ;;  %v860_v8 = vld [vmem:[%s2462_s5 + $0xb0] sm:$0xff]  ;;  %v877_v13 = vld [vmem:[%s2462_s5 + $0x138] sm:$0xff] }
  0x2f   : > { %1652 = vmatprep.subr.bf16.mxu0 %v1651_v37  ;;  %v876_v12 = vld [vmem:[%s2462_s5 + $0x130] sm:$0xff]  ;;  %v879_v16 = vld [vmem:[%s2462_s5 + $0x148] sm:$0xff]  ;;  %v845_v19 = vld [vmem:[%s2462_s5 + $0x38] sm:$0xff] }
  0x30   : > { %1682 = vmatpush3.bf16.msra.mxu1 %v1679_v30  ;;  %v1739_v30 = vpack.c.bf16 %v871_v29, %v870_v28  ;;  %v881_v22 = vld [vmem:[%s2462_s5 + $0x158] sm:$0xff]  ;;  %v863_v25 = vld [vmem:[%s2462_s5 + $0xc8] sm:$0xff]  ;;  %v868_v53 = vld [vmem:[%s2462_s5 + $0xf0] sm:$0xff] }
  0x31   : > { %1684 = vmatprep.subr.bf16.mxu1 %v1683_v40  ;;  %v847_v28 = vld [vmem:[%s2462_s5 + $0x48] sm:$0xff]  ;;  %v869_v54 = vld [vmem:[%s2462_s5 + $0xf8] sm:$0xff]  ;;  %v1246_v63 = vld [vmem:[%s2461_s4] ss:$0 sm:$0xff] }
  0x32   : > { %1654 = vmatpush3.bf16.msra.mxu0 %v1653_v43 }
  0x33   : > { %1656 = vmatprep.subr.bf16.mxu0 %v1655_v44  ;;  %v872_v44 = vld [vmem:[%s2462_s5 + $0x110] sm:$0xff] }
  0x34   : > { %1686 = vmatpush3.bf16.msra.mxu1 %v1683_v40  ;;  %v1743_v50 = vpack.c.bf16 %v873_v45, %v872_v44  ;;  %v850_v45 = vld [vmem:[%s2462_s5 + $0x60] sm:$0xff] }
  0x35   : > { %1688 = vmatprep.subr.bf16.mxu1 %v1687_v47 }
  0x36   : > { %1658 = vmatpush3.bf16.msra.mxu0 %v1657_v55  ;;  %v856_v55 = vld [vmem:[%s2462_s5 + $0x90] sm:$0xff] }
  0x37   : > { %1660 = vmatprep.subr.bf16.mxu0 %v1659_v61  ;;  %v1711_v61 = vpack.c.bf16 %v857_v56, %v856_v55  ;;  %v1735_v55 = vpack.c.bf16 %v869_v54, %v868_v53  ;;  %v852_v56 = vld [vmem:[%s2462_s5 + $0x70] sm:$0xff] }
  0x38   : > { %1690 = vmatpush3.bf16.msra.mxu1 %v1687_v47 }
  0x39   : > { %1692 = vmatprep.subr.bf16.mxu1 %v1691_v52 }
  0x3a   : > { %1662 = vmatpush3.bf16.msra.mxu0 %v1661_v0  ;;  %v858_v0 = vld [vmem:[%s2462_s5 + $0xa0] sm:$0xff] }
  0x3b   : > { %1664 = vmatprep.subr.bf16.mxu0 %v1663_v6  ;;  %v1715_v4 = vpack.c.bf16 %v859_v1, %v858_v0  ;;  %v843_v6 = vld [vmem:[%s2462_s5 + $0x28] sm:$0xff] }
  0x3c   : > { %1694 = vmatpush3.bf16.msra.mxu1 %v1691_v52  ;;  %v839_v52 = vld [vmem:[%s2462_s5 + $0x8] sm:$0xff] }
  0x3d   : > { %1696 = vmatprep.subr.bf16.mxu1 %v1695_v60  ;;  %v1709_v58 = vpack.c.bf16 %v839_v52, %v838_v48  ;;  %v1045_v48 = vld [vmem:[%s2464_s7] sm:$0xff] }
  0x3e   : > { %1666 = vmatpush3.bf16.msra.mxu0 %v1665_v9  ;;  %v861_v9 = vld [vmem:[%s2462_s5 + $0xb8] sm:$0xff] }
  0x3f   : > { %1668 = vmatprep.subr.bf16.mxu0 %v1667_v15  ;;  %v1719_v11 = vpack.c.bf16 %v861_v9, %v860_v8  ;;  %v878_v15 = vld [vmem:[%s2462_s5 + $0x140] sm:$0xff]  ;;  %v1047_v8 = vld [vmem:[%s2464_s7 + $0x10] sm:$0xff]  ;;  %v1048_v9 = vld [vmem:[%s2464_s7 + $0x18] sm:$0xff] }
  0x40   : > { %1698 = vmatpush3.bf16.msra.mxu1 %v1695_v60  ;;  %v1755_v17 = vpack.c.bf16 %v879_v16, %v878_v15  ;;  %v832_v15 = vld [vmem:[#allocation4 + $0x6] sm:$0xff] }
  0x41   : > { %1700 = vmatprep.subr.bf16.mxu1 %v1699_v5 }
  0x42   : > { %1670 = vmatpush3.bf16.msra.mxu0 %v1669_v18  ;;  %v844_v18 = vld [vmem:[%s2462_s5 + $0x30] sm:$0xff] }
  0x43   : > { %1672 = vmatprep.subr.bf16.mxu0 %v1671_v21  ;;  %v1721_v20 = vpack.c.bf16 %v845_v19, %v844_v18  ;;  %v880_v21 = vld [vmem:[%s2462_s5 + $0x150] sm:$0xff]  ;;  %v1052_v19 = vld [vmem:[%s2464_s7 + $0x38] sm:$0xff] }
  0x44   : > { %1702 = vmatpush3.bf16.msra.mxu1 %v1699_v5  ;;  %v842_v5 = vld [vmem:[%s2462_s5 + $0x20] sm:$0xff]  ;;  %v1759_v23 = vpack.c.bf16 %v881_v22, %v880_v21  ;;  %v1051_v18 = vld [vmem:[%s2464_s7 + $0x30] sm:$0xff]  ;;  %v1054_v22 = vld [vmem:[%s2464_s7 + $0x48] sm:$0xff] }
  0x45   : > { %1704 = vmatprep.subr.bf16.mxu1 %v1703_v14  ;;  %v1717_v10 = vpack.c.bf16 %v843_v6, %v842_v5 }
  0x46   : > { %1674 = vmatpush3.bf16.msra.mxu0 %v1673_v24  ;;  %v862_v24 = vld [vmem:[%s2462_s5 + $0xc0] sm:$0xff] }
  0x47   : > { %1708 = vmatprep.subr.bf16.mxu0 %v1707_v27  ;;  %v1723_v26 = vpack.c.bf16 %v863_v25, %v862_v24  ;;  %v846_v27 = vld [vmem:[%s2462_s5 + $0x40] sm:$0xff]  ;;  %v1055_v25 = vld [vmem:[%s2464_s7 + $0x50] sm:$0xff] }
  0x48   : > { %1706 = vmatpush3.bf16.msra.mxu1 %v1703_v14  ;;  %v1751_v14 = vpack.c.bf16 %v877_v13, %v876_v12  ;;  %v1725_v29 = vpack.c.bf16 %v847_v28, %v846_v27  ;;  %v1775_v12 = vpack.c.bf16 %v1048_v9, %v1047_v8  ;;  %v1049_v13 = vld [vmem:[%s2464_s7 + $0x20] sm:$0xff] }
  0x49   : > { %1740 = vmatprep.subr.bf16.mxu1 %v1739_v30  ;;  %v1057_v28 = vld [vmem:[%s2464_s7 + $0x60] sm:$0xff] }
  0xfc   : > { %v1285_v31 = vpop.f32.mrb[0].mxu0 }
  0xfd   : > { %v1286_v32 = vpop.f32.mrb[1].mxu0 }
  0xfe   : > { %v1473_v33 = vpop.f32.mrb[0].mxu1  ;;  %v1287_v35 = vadd.f32 %v1286_v32, %v1285_v31  ;;  %v883_v31 = vld [vmem:[%s2462_s5 + $0x168] sm:$0xff] }
  0xff   : > { %v604_v36 = vpop.f32.mrb[1].mxu1 }
 0x100   : > { %v1288_v37 = vpop.f32.mrb[2].mxu0  ;;  %v530_v38 = vadd.f32 %v1287_v35, %v1245_v34 }
 0x101   : > { %v1289_v39 = vpop.f32.mrb[3].mxu0 }
 0x102   : > { %v605_v40 = vadd.f32 %v604_v36, %v530_v38  ;;  %v1290_v41 = vadd.f32 %v1289_v39, %v1288_v37  ;;  %v848_v36 = vld [vmem:[%s2462_s5 + $0x50] sm:$0xff]  ;;  %v849_v37 = vld [vmem:[%s2462_s5 + $0x58] sm:$0xff] }
 0x103   : > { %v1729_v38 = vpack.c.bf16 %v849_v37, %v848_v36  ;;  %v884_v39 = vld [vmem:[%s2462_s5 + $0x170] sm:$0xff] }
 0x104   : > { %v613_v42 = vmax.f32 %v605_v40, 0.0  ;;  %v535_v43 = vadd.f32 %v1290_v41, %v1245_v34  ;;  %v865_v34 = vld [vmem:[%s2462_s5 + $0xd8] sm:$0xff] }
 0x105   : > { %v885_v40 = vld [vmem:[%s2462_s5 + $0x178] sm:$0xff] }
 0x106   : > { %615 = vst [vmem:[#allocation3 + $0x10] sm:$0xff] %v613_v42  ;;  %v610_v46 = vadd.f32 %v1473_v33, %v535_v43  ;;  %1506 = vmatprep.mubr.f32.mxu1 %v613_v42  ;;  %v864_v33 = vld [vmem:[%s2462_s5 + $0xd0] sm:$0xff]  ;;  %v1767_v41 = vpack.c.bf16 %v885_v40, %v884_v39  ;;  %v866_v42 = vld [vmem:[%s2462_s5 + $0xe0] sm:$0xff]  ;;  %v867_v43 = vld [vmem:[%s2462_s5 + $0xe8] sm:$0xff] }
 0x107   : > { %v1727_v35 = vpack.c.bf16 %v865_v34, %v864_v33  ;;  %v1731_v44 = vpack.c.bf16 %v867_v43, %v866_v42  ;;  %v1247_v40 = vld [vmem:[%s2463_s6] ss:$0 sm:$0xff] }
 0x108   : > { %v614_v47 = vmax.f32 %v610_v46, 0.0  ;;  %v851_v46 = vld [vmem:[%s2462_s5 + $0x68] sm:$0xff]  ;;  %v1248_v43 = vld [vmem:[%s2465_s8] ss:$0 sm:$0xff] }
 0x10a   : > { %616 = vst [vmem:[#allocation3 + $0x18] sm:$0xff] %v614_v47  ;;  %1507 = vmatmul.mubr.f32.vlgmr.msra.gmra.mrb[2].mxu1 %v614_v47  ;;  %v1733_v47 = vpack.c.bf16 %v851_v46, %v850_v45 }
 0x10b   : > { %1742 = vmatpush3.bf16.msra.mxu1 %v1739_v30  ;;  %v882_v30 = vld [vmem:[%s2462_s5 + $0x160] sm:$0xff] }
 0x10c   : > { %1744 = vmatprep.subr.bf16.mxu1 %v1743_v50  ;;  %v1763_v32 = vpack.c.bf16 %v883_v31, %v882_v30  ;;  %v1059_v31 = vld [vmem:[%s2464_s7 + $0x70] sm:$0xff] }
 0x10d   : > { %v619_v60 = vld [vmem:[#allocation3 + $0xb] sm:$0xff] }
 0x10e   : > { %742 = vmatprep.mubr.f32.mxu0 %v619_v60  ;;  %v618_v7 = vld [vmem:[#allocation3 + $0xe] sm:$0xff] }
 0x10f   : > { %743 = vmatmul.mubr.f32.vlgmr.msra.gmra.mrb[4].mxu0 %v617_v57  ;;  %1746 = vmatpush3.bf16.msra.mxu1 %v1743_v50  ;;  %v1046_v50 = vld [vmem:[%s2464_s7 + $0x8] sm:$0xff]  ;;  %v853_v57 = vld [vmem:[%s2462_s5 + $0x78] sm:$0xff] }
 0x110   : > { %1710 = vmatpush3.bf16.msra.mxu0 %v1709_v58  ;;  %1748 = vmatprep.subr.bf16.mxu1 %v1747_v59  ;;  %v1771_v52 = vpack.c.bf16 %v1046_v50, %v1045_v48  ;;  %v1737_v58 = vpack.c.bf16 %v853_v57, %v852_v56 }
 0x111   : > { %v620_v3 = vld [vmem:[#allocation3 + $0x13] sm:$0xff]  ;;  %1712 = vmatprep.subr.bf16.mxu0 %v1711_v61 }
 0x112   : > { %747 = vmatprep.mubr.f32.mxu0 %v620_v3 }
 0x113   : > { %748 = vmatmul.mubr.f32.gmra.mrb[6].mxu0 %v618_v7  ;;  %1750 = vmatpush3.bf16.msra.mxu1 %v1747_v59 }
 0x114   : > { %1714 = vmatpush3.bf16.msra.mxu0 %v1713_v2  ;;  %1752 = vmatprep.subr.bf16.mxu1 %v1751_v14 }
 0x115   : > { %1716 = vmatprep.subr.bf16.mxu0 %v1715_v4 }
 0x117   : > { %1754 = vmatpush3.bf16.msra.mxu1 %v1751_v14  ;;  %v1050_v14 = vld [vmem:[%s2464_s7 + $0x28] sm:$0xff] }
 0x118   : > { %1718 = vmatpush3.bf16.msra.mxu0 %v1717_v10  ;;  %1756 = vmatprep.subr.bf16.mxu1 %v1755_v17  ;;  %v1779_v16 = vpack.c.bf16 %v1050_v14, %v1049_v13 }
 0x119   : > { %1720 = vmatprep.subr.bf16.mxu0 %v1719_v11 }
 0x11b   : > { %1758 = vmatpush3.bf16.msra.mxu1 %v1755_v17 }
 0x11c   : > { %1722 = vmatpush3.bf16.msra.mxu0 %v1721_v20  ;;  %1760 = vmatprep.subr.bf16.mxu1 %v1759_v23  ;;  %v1783_v20 = vpack.c.bf16 %v1052_v19, %v1051_v18 }
 0x11d   : > { %1724 = vmatprep.subr.bf16.mxu0 %v1723_v26  ;;  %v1056_v26 = vld [vmem:[%s2464_s7 + $0x58] sm:$0xff] }
 0x11e   : > { %v1791_v27 = vpack.c.bf16 %v1056_v26, %v1055_v25 }
 0x11f   : > { %1762 = vmatpush3.bf16.msra.mxu1 %v1759_v23 }
 0x120   : > { %1726 = vmatpush3.bf16.msra.mxu0 %v1725_v29  ;;  %1764 = vmatprep.subr.bf16.mxu1 %v1763_v32  ;;  %v1058_v29 = vld [vmem:[%s2464_s7 + $0x68] sm:$0xff] }
 0x121   : > { %1728 = vmatprep.subr.bf16.mxu0 %v1727_v35  ;;  %v1795_v30 = vpack.c.bf16 %v1058_v29, %v1057_v28 }
 0x123   : > { %1766 = vmatpush3.bf16.msra.mxu1 %v1763_v32  ;;  %v1060_v32 = vld [vmem:[%s2464_s7 + $0x78] sm:$0xff] }
 0x124   : > { %1730 = vmatpush3.bf16.msra.mxu0 %v1729_v38  ;;  %1768 = vmatprep.subr.bf16.mxu1 %v1767_v41  ;;  %v1799_v33 = vpack.c.bf16 %v1060_v32, %v1059_v31 }
 0x125   : > { %1732 = vmatprep.subr.bf16.mxu0 %v1731_v44 }
 0x127   : > { %1770 = vmatpush3.bf16.msra.mxu1 %v1767_v41 }
 0x128   : > { %1734 = vmatpush3.bf16.msra.mxu0 %v1733_v47  ;;  %1772 = vmatprep.subr.bf16.mxu1 %v1771_v52 }
 0x129   : > { %1736 = vmatprep.subr.bf16.mxu0 %v1735_v55 }
 0x12c   : > { %1738 = vmatpush3.bf16.msra.mxu0 %v1737_v58 }
 0x1dd   : > { %v1508_v59 = vpop.f32.mrb[2].mxu1 }
 0x1de   : > { %v819_v60 = vpop.f32.mrb[3].mxu1 }
 0x1e2   : > { %v1341_v61 = vpop.f32.mrb[4].mxu0 }
 0x1e3   : > { %v1342_v62 = vpop.f32.mrb[5].mxu0 }
 0x1e4   : > { %v1343_v0 = vadd.f32 %v1342_v62, %v1341_v61 }
 0x1e6   : > { %v1344_v1 = vpop.f32.mrb[6].mxu0  ;;  %v745_v2 = vadd.f32 %v1343_v0, %v1246_v63 }
 0x1e7   : > { %v1345_v3 = vpop.f32.mrb[7].mxu0 }
 0x1e8   : > { %v820_v4 = vadd.f32 %v819_v60, %v745_v2  ;;  %v1346_v5 = vadd.f32 %v1345_v3, %v1344_v1 }
 0x1ea   : > { %v828_v6 = vmax.f32 %v820_v4, 0.0  ;;  %v750_v7 = vadd.f32 %v1346_v5, %v1246_v63 }
 0x1ec   : > { %830 = vst [vmem:[#allocation4 + $0x10] sm:$0xff] %v828_v6  ;;  %v825_v10 = vadd.f32 %v1508_v59, %v750_v7  ;;  %1541 = vmatprep.mubr.f32.mxu1 %v828_v6 }
 0x1ee   : > { %v829_v11 = vmax.f32 %v825_v10, 0.0 }
 0x1f0   : > { %831 = vst [vmem:[#allocation4 + $0x18] sm:$0xff] %v829_v11  ;;  %1542 = vmatmul.mubr.f32.vlgmr.msra.gmra.mrb[4].mxu1 %v829_v11 }
 0x1f1   : > { %1774 = vmatpush3.bf16.msra.mxu1 %v1771_v52  ;;  %1576 = vmatprep.mubr.f32.mxu1 %v2043_v49  ;;  %v1053_v49 = vld [vmem:[%s2464_s7 + $0x40] sm:$0xff] }
 0x1f2   : > { %1776 = vmatprep.subr.bf16.mxu1 %v1775_v12  ;;  %v1787_v24 = vpack.c.bf16 %v1054_v22, %v1053_v49 }
 0x1f3   : > { %v834_v17 = vld [vmem:[#allocation4 + $0xb] sm:$0xff] }
 0x1f4   : > { %957 = vmatprep.mubr.f32.mxu0 %v834_v17  ;;  %v833_v23 = vld [vmem:[#allocation4 + $0xe] sm:$0xff] }
 0x1f5   : > { %958 = vmatmul.mubr.f32.vlgmr.msra.gmra.mrb[8].mxu0 %v832_v15  ;;  %1778 = vmatpush3.bf16.msra.mxu1 %v1775_v12 }
 0x1f6   : > { %1780 = vmatprep.subr.bf16.mxu1 %v1779_v16 }
 0x1f7   : > { %v835_v21 = vld [vmem:[#allocation4 + $0x13] sm:$0xff] }
 0x1f8   : > { %962 = vmatprep.mubr.f32.mxu0 %v835_v21 }
 0x1f9   : > { %963 = vmatmul.mubr.f32.gmra.mrb[10].mxu0 %v833_v23  ;;  %1782 = vmatpush3.bf16.msra.mxu1 %v1779_v16 }
 0x1fa   : > { %1784 = vmatprep.subr.bf16.mxu1 %v1783_v20 }
 0x1fd   : > { %1786 = vmatpush3.bf16.msra.mxu1 %v1783_v20 }
 0x1fe   : > { %1788 = vmatprep.subr.bf16.mxu1 %v1787_v24 }
 0x201   : > { %1790 = vmatpush3.bf16.msra.mxu1 %v1787_v24 }
 0x202   : > { %1792 = vmatprep.subr.bf16.mxu1 %v1791_v27 }
 0x205   : > { %1794 = vmatpush3.bf16.msra.mxu1 %v1791_v27 }
 0x206   : > { %1796 = vmatprep.subr.bf16.mxu1 %v1795_v30 }
 0x209   : > { %1798 = vmatpush3.bf16.msra.mxu1 %v1795_v30 }
 0x20a   : > { %1800 = vmatprep.subr.bf16.mxu1 %v1799_v33 }
 0x20d   : > { %1802 = vmatpush3.bf16.msra.mxu1 %v1799_v33 }
 0x210   : > { %1577 = vmatmul.mubr.f32.vlgmr.msra.gmra.mrb[4].mxu1 %v2047_v51 }
 0x2c8   : > { %v1397_v34 = vpop.f32.mrb[8].mxu0 }
 0x2c9   : > { %v1398_v35 = vpop.f32.mrb[9].mxu0 }
 0x2ca   : > { %v1399_v36 = vadd.f32 %v1398_v35, %v1397_v34 }
 0x2cc   : > { %v1400_v37 = vpop.f32.mrb[10].mxu0  ;;  %v960_v44 = vadd.f32 %v1399_v36, %v1247_v40 }
 0x2cd   : > { %v1401_v38 = vpop.f32.mrb[11].mxu0 }
 0x2ce   : > { %v1402_v39 = vadd.f32 %v1401_v38, %v1400_v37 }
 0x2d0   : > { %v965_v41 = vadd.f32 %v1402_v39, %v1247_v40 }
 0x2e3   : > { %v1578_v42 = vpop.f32.mrb[4].mxu1 }
 0x2e4   : > { %v1803_v45 = vadd.f32 %v1578_v42, %v965_v41  ;;  %v1134_v51 = vpop.f32.mrb[5].mxu1 }
 0x2e5   : > { %v1805_v46 = vadd.f32 %v1134_v51, %v960_v44 }
 0x2e6   : > { %v1804_v47 = vadd.f32 %v1803_v45, %v1248_v43 }
 0x2e7   : > { %v1806_v48 = vadd.f32 %v1805_v46, %v1248_v43 }
 0x2e8   : > { %v1146_v50 = vmax.f32 %v1804_v47, 0.0 }
 0x2e9   : > { %v1145_v52 = vmax.f32 %v1806_v48, 0.0 }
 0x2ea   : > { %1148 = vst [vmem:[%s370_s21 + $0x8] sm:$0xff] %v1146_v50 }
 0x2eb   : > { %1147 = vst [vmem:[%s370_s21] sm:$0xff] %v1145_v52 }
 0x2ec PF: > { %s19_s11 = sadd.s32 1, %s1856_s11   ;;  %s2467_s30 = smov %s1852_s10 }
 0x2ed   : > { %p16_p5 = scmp.ge.s32.totalorder %s19_s11, 4   ;;  %s2468_s10 = smov %s2470_s12 }
 0x2ef   :  { %18 = sbr.rel (!%p16_p5) target bundleno = 2 (0x2), region = 94 }

</bundles_post_ra>
